<compile_context>
chip_gen: v7x
topology: tpu7x:2x2x1
jax: 0.10.0
libtpu: 0.0.40
codegen_flags: <defaults>
</compile_context>

<pallas_src>
import jax
import jax.numpy as jnp
from jax.experimental import pallas as pl
from jax.experimental.pallas import tpu as pltpu

LANE = 128        # channel padding target (TPU lane width)
_PAD_ROWS = 8     # spare rows so full-width tap slices never run off the end


def _round_up(x, m):
    return (x + m - 1) // m * m


# ----------------------------- fused kernel --------------------------------
def _make_kernel(W, k_in, k_out, m1, m2, m3):
    """m1/m2: stride-1 full-width row counts of conv1/conv2 outputs.
       m3: stride-1 rows computed for conv3 (only the band kept by stride 2)."""

    # Tap row offsets: conv1 has kw folded into lanes -> k_in taps only.
    offs1 = [i * W for i in range(k_in)]
    offs2 = [i * W + j for i in range(k_in) for j in range(k_in)]
    offs3 = [i * W + j for i in range(k_out) for j in range(k_out)]

    def tap_conv(src_ref, w_ref, b_ref, offsets, m_out):
        # src_ref: (rows, cin_p) bf16 VMEM; w_ref: (n_taps, cin_p, cout_p) bf16;
        # b_ref: (1, cout_p) f32.  Each tap is a CONTIGUOUS (m_out, cin_p)
        # slice fed to one lane-dense MXU dot; accumulate in f32.
        cout = w_ref.shape[-1]
        acc = jnp.zeros((m_out, cout), jnp.float32)
        for t, off in enumerate(offsets):
            tap = src_ref[pl.ds(off, m_out), :]
            acc = acc + jnp.dot(tap, w_ref[t],
                                preferred_element_type=jnp.float32)
        return jnp.maximum(acc + b_ref[...], 0.0)      # bias + ReLU (f32)

    def kernel(x_ref, w0_ref, b0_ref, w1_ref, b1_ref, w2_ref, b2_ref,
               o_ref, act1_ref, act2_ref):
        # ---- conv1 (stride 1, kw folded into lanes: k_in taps) ----
        y1 = tap_conv(x_ref, w0_ref, b0_ref, offs1, m1)
        act1_ref[pl.ds(0, m1), :] = y1.astype(act1_ref.dtype)
        act1_ref[pl.ds(m1, _PAD_ROWS), :] = jnp.zeros(
            (_PAD_ROWS, act1_ref.shape[1]), act1_ref.dtype)

        # ---- conv2 (stride 1, k_in*k_in taps) ----
        y2 = tap_conv(act1_ref, w1_ref, b1_ref, offs2, m2)
        act2_ref[pl.ds(0, m2), :] = y2.astype(act2_ref.dtype)
        act2_ref[pl.ds(m2, _PAD_ROWS), :] = jnp.zeros(
            (_PAD_ROWS, act2_ref.shape[1]), act2_ref.dtype)

        # ---- conv3: stride 1 over the needed row band; wrapper subsamples ----
        y3 = tap_conv(act2_ref, w2_ref, b2_ref, offs3, m3)
        o_ref[...] = y3.astype(o_ref.dtype)

    return kernel


# --------------------------- packing helpers --------------------------------
def _pack_weight_taps(wt, cin_p, cout_p):
    # torch layout (Cout, Cin, KH, KW) -> (KH*KW, Cin_pad, Cout_pad) bf16
    cout, cin, kh, kw = wt.shape
    w = jnp.transpose(wt, (2, 3, 1, 0)).reshape(kh * kw, cin, cout)
    w = jnp.pad(w, ((0, 0), (0, cin_p - cin), (0, cout_p - cout)))
    return w.astype(jnp.bfloat16)


def _pack_weight_jfolded(wt, cin_p, cout_p):
    # (Cout, Cin, KH, KW) -> (KH, KW*Cin -> pad, Cout_pad) bf16
    # index [i, j*Cin + c, o] == wt[o, c, i, j]
    cout, cin, kh, kw = wt.shape
    w = jnp.transpose(wt, (2, 3, 1, 0)).reshape(kh, kw * cin, cout)
    w = jnp.pad(w, ((0, 0), (0, cin_p - kw * cin), (0, cout_p - cout)))
    return w.astype(jnp.bfloat16)


def _pack_bias(b, cout_p):
    return jnp.pad(b, (0, cout_p - b.shape[0])).reshape(1, cout_p).astype(jnp.float32)


# ----------------------------- module forward -------------------------------
def stacked_conv_block(x_nchw, params):
    n, cin, H, W = x_nchw.shape
    w0, b0 = params["w0"], params["b0"]
    w1, b1 = params["w1"], params["b1"]
    w2, b2 = params["w2"], params["b2"]
    h_ch, _, k_in, _ = w0.shape
    out_ch, _, k_out, _ = w2.shape

    c0p = _round_up(k_in * cin, LANE)     # kw folded into input channels
    c1p = _round_up(h_ch, LANE)
    c2p = _round_up(out_ch, LANE)

    h1 = H - (k_in - 1)                   # conv1 output height (stride 1)
    h2 = h1 - (k_in - 1)                  # conv2 output height (stride 1)
    ho = (h2 - k_out) // 2 + 1            # conv3 output height (stride 2)
    wo = (W - 2 * (k_in - 1) - k_out) // 2 + 1
    m1, m2 = h1 * W, h2 * W
    h3t = 2 * (ho - 1) + 1                # stride-1 rows actually needed
    m3 = h3t * W

    # input: NCHW -> NHWC, fold the kw taps into the channel dim (im2col along
    # x only), flatten rows, pad channels to a full lane group, cast to bf16.
    xt = jnp.transpose(x_nchw, (0, 2, 3, 1))                    # (n, H, W, cin)
    cols = []
    for j in range(k_in):
        cj = xt[:, :, j:, :]
        cols.append(jnp.pad(cj, ((0, 0), (0, 0), (0, j), (0, 0))))
    xp = jnp.concatenate(cols, axis=-1).reshape(n, H * W, k_in * cin)
    xp = jnp.pad(xp, ((0, 0), (0, 0), (0, c0p - k_in * cin))).astype(jnp.bfloat16)

    w0p = _pack_weight_jfolded(w0, c0p, c1p)
    w1p = _pack_weight_taps(w1, c1p, c1p)
    w2p = _pack_weight_taps(w2, c1p, c2p)
    b0p = _pack_bias(b0, c1p)
    b1p = _pack_bias(b1, c1p)
    b2p = _pack_bias(b2, c2p)

    kernel = _make_kernel(W, k_in, k_out, m1, m2, m3)

    out = pl.pallas_call(
        kernel,
        out_shape=jax.ShapeDtypeStruct((n, m3, c2p), jnp.float32),
        grid=(n,),
        in_specs=[
            pl.BlockSpec((None, H * W, c0p), lambda b: (b, 0, 0)),   # per-batch image
            pl.BlockSpec(w0p.shape, lambda b: (0, 0, 0)),            # weights: constant
            pl.BlockSpec(b0p.shape, lambda b: (0, 0)),               # index -> loaded once
            pl.BlockSpec(w1p.shape, lambda b: (0, 0, 0)),
            pl.BlockSpec(b1p.shape, lambda b: (0, 0)),
            pl.BlockSpec(w2p.shape, lambda b: (0, 0, 0)),
            pl.BlockSpec(b2p.shape, lambda b: (0, 0)),
        ],
        out_specs=pl.BlockSpec((None, m3, c2p), lambda b: (b, 0, 0)),
        scratch_shapes=[
            pltpu.VMEM((m1 + _PAD_ROWS, c1p), jnp.bfloat16),         # act after conv1
            pltpu.VMEM((m2 + _PAD_ROWS, c1p), jnp.bfloat16),         # act after conv2
        ],
        compiler_params=pltpu.CompilerParams(
            dimension_semantics=("parallel",)),
    )(xp, w0p, b0p, w1p, b1p, w2p, b2p)

    # stride-2 subsample of the stride-1 conv3 band, drop padding, to NCHW
    y = out.reshape(n, h3t, W, c2p)[:, ::2, 0:2 * wo - 1:2, :out_ch]
    return jnp.transpose(y, (0, 3, 1, 2))


# ------------------------------- init / ref ---------------------------------
def init_params(key, in_channel, h_channel, out_channel,
                in_kernel_size=3, out_kernel_size=3):
    ks = jax.random.split(key, 6)

    def conv_init(kw_, kb_, cout, cin, ksz):
        fan_in = cin * ksz * ksz
        bound = 1.0 / jnp.sqrt(fan_in)
        w = jax.random.uniform(kw_, (cout, cin, ksz, ksz), jnp.float32, -bound, bound)
        b = jax.random.uniform(kb_, (cout,), jnp.float32, -bound, bound)
        return w, b

    w0, b0 = conv_init(ks[0], ks[1], h_channel, in_channel, in_kernel_size)
    w1, b1 = conv_init(ks[2], ks[3], h_channel, h_channel, in_kernel_size)
    w2, b2 = conv_init(ks[4], ks[5], out_channel, h_channel, out_kernel_size)
    return {"w0": w0, "b0": b0, "w1": w1, "b1": b1, "w2": w2, "b2": b2}


def _reference_bf16(x_nchw, params):
    """Plain-JAX reference with the same bf16 quantization points as the kernel."""
    def conv(x, wt, b, stride):
        y = jax.lax.conv_general_dilated(
            x.astype(jnp.bfloat16), wt.astype(jnp.bfloat16),
            window_strides=(stride, stride), padding="VALID",
            dimension_numbers=("NCHW", "OIHW", "NCHW"),
            preferred_element_type=jnp.float32)
        return jnp.maximum(y + b[None, :, None, None].astype(jnp.float32), 0.0)

    z = conv(x_nchw, params["w0"], params["b0"], 1)
    z = conv(z, params["w1"], params["b1"], 1)
    z = conv(z, params["w2"], params["b2"], 2)
    return z


if __name__ == "__main__":
    key = jax.random.PRNGKey(0)
    k_x, k_p = jax.random.split(key)

    batch, in_ch, h_ch, out_ch, spatial = 2, 4, 8, 8, 16
    x = jax.random.normal(k_x, (batch, in_ch, spatial, spatial), jnp.float32)
    params = init_params(k_p, in_ch, h_ch, out_ch)

    fwd = jax.jit(stacked_conv_block)
    y = jax.block_until_ready(fwd(x, params))

    # shape check: 16 ->(3x3,s1) 14 ->(3x3,s1) 12 ->(3x3,s2) 5
    assert y.shape == (batch, out_ch, 5, 5), y.shape
    assert bool(jnp.all(y >= 0.0))  # ReLU applied

    ref = _reference_bf16(x, params)
    assert bool(jnp.allclose(y, ref, atol=5e-2, rtol=5e-2)), float(
        jnp.max(jnp.abs(y - ref)))

    print("KERNEL_OK")
</pallas_src>

<mosaic_0001>
module attributes {stable_mosaic.version = 11 : i64} {
  func.func @kernel(%arg0: i32, %arg1: memref<1x256x128xbf16, #tpu.memory_space<vmem>>, %arg2: memref<3x128x128xbf16, #tpu.memory_space<vmem>>, %arg3: memref<1x128xf32, #tpu.memory_space<vmem>>, %arg4: memref<9x128x128xbf16, #tpu.memory_space<vmem>>, %arg5: memref<1x128xf32, #tpu.memory_space<vmem>>, %arg6: memref<9x128x128xbf16, #tpu.memory_space<vmem>>, %arg7: memref<1x128xf32, #tpu.memory_space<vmem>>, %arg8: memref<1x144x128xf32, #tpu.memory_space<vmem>>, %arg9: memref<232x128xbf16, #tpu.memory_space<vmem>>, %arg10: memref<200x128xbf16, #tpu.memory_space<vmem>>) attributes {dimension_semantics = [#tpu.dimension_semantics<parallel>], iteration_bounds = array<i64: 2>, scalar_prefetch = 0 : i64, scratch_operands = 2 : i64, tpu.core_type = #tpu.core_type<tc>, window_params = [{transform_indices = @transform_0, window_bounds = array<i64: 1, 256, 128>}, {pipeline_mode = #tpu.pipeline_mode<synchronous>, transform_indices = @transform_1, window_bounds = array<i64: 3, 128, 128>}, {pipeline_mode = #tpu.pipeline_mode<synchronous>, transform_indices = @transform_2, window_bounds = array<i64: 1, 128>}, {pipeline_mode = #tpu.pipeline_mode<synchronous>, transform_indices = @transform_3, window_bounds = array<i64: 9, 128, 128>}, {pipeline_mode = #tpu.pipeline_mode<synchronous>, transform_indices = @transform_4, window_bounds = array<i64: 1, 128>}, {pipeline_mode = #tpu.pipeline_mode<synchronous>, transform_indices = @transform_5, window_bounds = array<i64: 9, 128, 128>}, {pipeline_mode = #tpu.pipeline_mode<synchronous>, transform_indices = @transform_6, window_bounds = array<i64: 1, 128>}, {transform_indices = @transform_7, window_bounds = array<i64: 1, 144, 128>}]} {
    %cst = arith.constant 0.000000e+00 : f32
    %0 = vector.broadcast %cst : f32 to vector<224x128xf32>
    %c0 = arith.constant 0 : index
    %c0_0 = arith.constant 0 : index
    %c0_1 = arith.constant 0 : index
    %1 = vector.load %arg1[%c0, %c0_0, %c0_1] : memref<1x256x128xbf16, #tpu.memory_space<vmem>>, vector<1x224x128xbf16>
    %2 = vector.shape_cast %1 : vector<1x224x128xbf16> to vector<224x128xbf16>
    %c0_2 = arith.constant 0 : index
    %c0_3 = arith.constant 0 : index
    %c0_4 = arith.constant 0 : index
    %3 = vector.load %arg2[%c0_2, %c0_3, %c0_4] : memref<3x128x128xbf16, #tpu.memory_space<vmem>>, vector<1x128x128xbf16>
    %4 = vector.shape_cast %3 : vector<1x128x128xbf16> to vector<128x128xbf16>
    %cst_5 = arith.constant dense<0.000000e+00> : vector<224x128xf32>
    %5 = tpu.matmul %2, %4, %cst_5 {dimension_numbers = #tpu.dot_dimension_numbers<[1], [0], [0], [1], [0, 0, 1, 1], [], []>} : vector<224x128xbf16>, vector<128x128xbf16>, vector<224x128xf32> -> vector<224x128xf32>
    %6 = arith.addf %0, %5 : vector<224x128xf32>
    %c0_6 = arith.constant 0 : index
    %c16 = arith.constant 16 : index
    %c0_7 = arith.constant 0 : index
    %7 = vector.load %arg1[%c0_6, %c16, %c0_7] : memref<1x256x128xbf16, #tpu.memory_space<vmem>>, vector<1x224x128xbf16>
    %8 = vector.shape_cast %7 : vector<1x224x128xbf16> to vector<224x128xbf16>
    %c1 = arith.constant 1 : index
    %c0_8 = arith.constant 0 : index
    %c0_9 = arith.constant 0 : index
    %9 = vector.load %arg2[%c1, %c0_8, %c0_9] : memref<3x128x128xbf16, #tpu.memory_space<vmem>>, vector<1x128x128xbf16>
    %10 = vector.shape_cast %9 : vector<1x128x128xbf16> to vector<128x128xbf16>
    %cst_10 = arith.constant dense<0.000000e+00> : vector<224x128xf32>
    %11 = tpu.matmul %8, %10, %cst_10 {dimension_numbers = #tpu.dot_dimension_numbers<[1], [0], [0], [1], [0, 0, 1, 1], [], []>} : vector<224x128xbf16>, vector<128x128xbf16>, vector<224x128xf32> -> vector<224x128xf32>
    %12 = arith.addf %6, %11 : vector<224x128xf32>
    %c0_11 = arith.constant 0 : index
    %c32 = arith.constant 32 : index
    %c0_12 = arith.constant 0 : index
    %13 = vector.load %arg1[%c0_11, %c32, %c0_12] : memref<1x256x128xbf16, #tpu.memory_space<vmem>>, vector<1x224x128xbf16>
    %14 = vector.shape_cast %13 : vector<1x224x128xbf16> to vector<224x128xbf16>
    %c2 = arith.constant 2 : index
    %c0_13 = arith.constant 0 : index
    %c0_14 = arith.constant 0 : index
    %15 = vector.load %arg2[%c2, %c0_13, %c0_14] : memref<3x128x128xbf16, #tpu.memory_space<vmem>>, vector<1x128x128xbf16>
    %16 = vector.shape_cast %15 : vector<1x128x128xbf16> to vector<128x128xbf16>
    %cst_15 = arith.constant dense<0.000000e+00> : vector<224x128xf32>
    %17 = tpu.matmul %14, %16, %cst_15 {dimension_numbers = #tpu.dot_dimension_numbers<[1], [0], [0], [1], [0, 0, 1, 1], [], []>} : vector<224x128xbf16>, vector<128x128xbf16>, vector<224x128xf32> -> vector<224x128xf32>
    %18 = arith.addf %12, %17 : vector<224x128xf32>
    %c0_16 = arith.constant 0 : index
    %c0_17 = arith.constant 0 : index
    %19 = vector.load %arg3[%c0_16, %c0_17] : memref<1x128xf32, #tpu.memory_space<vmem>>, vector<1x128xf32>
    %20 = vector.broadcast %19 : vector<1x128xf32> to vector<224x128xf32>
    %21 = arith.addf %18, %20 : vector<224x128xf32>
    %cst_18 = arith.constant 0.000000e+00 : f32
    %22 = vector.broadcast %cst_18 : f32 to vector<224x128xf32>
    %23 = arith.maximumf %21, %22 : vector<224x128xf32>
    %24 = arith.truncf %23 : vector<224x128xf32> to vector<224x128xbf16>
    %c0_19 = arith.constant 0 : index
    %c0_20 = arith.constant 0 : index
    %25 = vector.load %arg9[%c0_19, %c0_20] : memref<232x128xbf16, #tpu.memory_space<vmem>>, vector<224x128xbf16>
    tpu.vector_store %arg9[%c0_19, %c0_20], %24 {strides = array<i32>} : memref<232x128xbf16, #tpu.memory_space<vmem>>, vector<224x128xbf16>,
    %cst_21 = arith.constant 0.000000e+00 : bf16
    %26 = vector.broadcast %cst_21 : bf16 to vector<8x128xbf16>
    %c224 = arith.constant 224 : index
    %c0_22 = arith.constant 0 : index
    %27 = vector.load %arg9[%c224, %c0_22] : memref<232x128xbf16, #tpu.memory_space<vmem>>, vector<8x128xbf16>
    tpu.vector_store %arg9[%c224, %c0_22], %26 {strides = array<i32>} : memref<232x128xbf16, #tpu.memory_space<vmem>>, vector<8x128xbf16>,
    %cst_23 = arith.constant 0.000000e+00 : f32
    %28 = vector.broadcast %cst_23 : f32 to vector<192x128xf32>
    %c0_24 = arith.constant 0 : index
    %c0_25 = arith.constant 0 : index
    %29 = vector.load %arg9[%c0_24, %c0_25] : memref<232x128xbf16, #tpu.memory_space<vmem>>, vector<192x128xbf16>
    %c0_26 = arith.constant 0 : index
    %c0_27 = arith.constant 0 : index
    %c0_28 = arith.constant 0 : index
    %30 = vector.load %arg4[%c0_26, %c0_27, %c0_28] : memref<9x128x128xbf16, #tpu.memory_space<vmem>>, vector<1x128x128xbf16>
    %31 = vector.shape_cast %30 : vector<1x128x128xbf16> to vector<128x128xbf16>
    %cst_29 = arith.constant dense<0.000000e+00> : vector<192x128xf32>
    %32 = tpu.matmul %29, %31, %cst_29 {dimension_numbers = #tpu.dot_dimension_numbers<[1], [0], [0], [1], [0, 0, 1, 1], [], []>} : vector<192x128xbf16>, vector<128x128xbf16>, vector<192x128xf32> -> vector<192x128xf32>
    %33 = arith.addf %28, %32 : vector<192x128xf32>
    %c1_30 = arith.constant 1 : index
    %c0_31 = arith.constant 0 : index
    %34 = vector.load %arg9[%c1_30, %c0_31] : memref<232x128xbf16, #tpu.memory_space<vmem>>, vector<192x128xbf16>
    %c1_32 = arith.constant 1 : index
    %c0_33 = arith.constant 0 : index
    %c0_34 = arith.constant 0 : index
    %35 = vector.load %arg4[%c1_32, %c0_33, %c0_34] : memref<9x128x128xbf16, #tpu.memory_space<vmem>>, vector<1x128x128xbf16>
    %36 = vector.shape_cast %35 : vector<1x128x128xbf16> to vector<128x128xbf16>
    %cst_35 = arith.constant dense<0.000000e+00> : vector<192x128xf32>
    %37 = tpu.matmul %34, %36, %cst_35 {dimension_numbers = #tpu.dot_dimension_numbers<[1], [0], [0], [1], [0, 0, 1, 1], [], []>} : vector<192x128xbf16>, vector<128x128xbf16>, vector<192x128xf32> -> vector<192x128xf32>
    %38 = arith.addf %33, %37 : vector<192x128xf32>
    %c2_36 = arith.constant 2 : index
    %c0_37 = arith.constant 0 : index
    %39 = vector.load %arg9[%c2_36, %c0_37] : memref<232x128xbf16, #tpu.memory_space<vmem>>, vector<192x128xbf16>
    %c2_38 = arith.constant 2 : index
    %c0_39 = arith.constant 0 : index
    %c0_40 = arith.constant 0 : index
    %40 = vector.load %arg4[%c2_38, %c0_39, %c0_40] : memref<9x128x128xbf16, #tpu.memory_space<vmem>>, vector<1x128x128xbf16>
    %41 = vector.shape_cast %40 : vector<1x128x128xbf16> to vector<128x128xbf16>
    %cst_41 = arith.constant dense<0.000000e+00> : vector<192x128xf32>
    %42 = tpu.matmul %39, %41, %cst_41 {dimension_numbers = #tpu.dot_dimension_numbers<[1], [0], [0], [1], [0, 0, 1, 1], [], []>} : vector<192x128xbf16>, vector<128x128xbf16>, vector<192x128xf32> -> vector<192x128xf32>
    %43 = arith.addf %38, %42 : vector<192x128xf32>
    %c16_42 = arith.constant 16 : index
    %c0_43 = arith.constant 0 : index
    %44 = vector.load %arg9[%c16_42, %c0_43] : memref<232x128xbf16, #tpu.memory_space<vmem>>, vector<192x128xbf16>
    %c3 = arith.constant 3 : index
    %c0_44 = arith.constant 0 : index
    %c0_45 = arith.constant 0 : index
    %45 = vector.load %arg4[%c3, %c0_44, %c0_45] : memref<9x128x128xbf16, #tpu.memory_space<vmem>>, vector<1x128x128xbf16>
    %46 = vector.shape_cast %45 : vector<1x128x128xbf16> to vector<128x128xbf16>
    %cst_46 = arith.constant dense<0.000000e+00> : vector<192x128xf32>
    %47 = tpu.matmul %44, %46, %cst_46 {dimension_numbers = #tpu.dot_dimension_numbers<[1], [0], [0], [1], [0, 0, 1, 1], [], []>} : vector<192x128xbf16>, vector<128x128xbf16>, vector<192x128xf32> -> vector<192x128xf32>
    %48 = arith.addf %43, %47 : vector<192x128xf32>
    %c17 = arith.constant 17 : index
    %c0_47 = arith.constant 0 : index
    %49 = vector.load %arg9[%c17, %c0_47] : memref<232x128xbf16, #tpu.memory_space<vmem>>, vector<192x128xbf16>
    %c4 = arith.constant 4 : index
    %c0_48 = arith.constant 0 : index
    %c0_49 = arith.constant 0 : index
    %50 = vector.load %arg4[%c4, %c0_48, %c0_49] : memref<9x128x128xbf16, #tpu.memory_space<vmem>>, vector<1x128x128xbf16>
    %51 = vector.shape_cast %50 : vector<1x128x128xbf16> to vector<128x128xbf16>
    %cst_50 = arith.constant dense<0.000000e+00> : vector<192x128xf32>
    %52 = tpu.matmul %49, %51, %cst_50 {dimension_numbers = #tpu.dot_dimension_numbers<[1], [0], [0], [1], [0, 0, 1, 1], [], []>} : vector<192x128xbf16>, vector<128x128xbf16>, vector<192x128xf32> -> vector<192x128xf32>
    %53 = arith.addf %48, %52 : vector<192x128xf32>
    %c18 = arith.constant 18 : index
    %c0_51 = arith.constant 0 : index
    %54 = vector.load %arg9[%c18, %c0_51] : memref<232x128xbf16, #tpu.memory_space<vmem>>, vector<192x128xbf16>
    %c5 = arith.constant 5 : index
    %c0_52 = arith.constant 0 : index
    %c0_53 = arith.constant 0 : index
    %55 = vector.load %arg4[%c5, %c0_52, %c0_53] : memref<9x128x128xbf16, #tpu.memory_space<vmem>>, vector<1x128x128xbf16>
    %56 = vector.shape_cast %55 : vector<1x128x128xbf16> to vector<128x128xbf16>
    %cst_54 = arith.constant dense<0.000000e+00> : vector<192x128xf32>
    %57 = tpu.matmul %54, %56, %cst_54 {dimension_numbers = #tpu.dot_dimension_numbers<[1], [0], [0], [1], [0, 0, 1, 1], [], []>} : vector<192x128xbf16>, vector<128x128xbf16>, vector<192x128xf32> -> vector<192x128xf32>
    %58 = arith.addf %53, %57 : vector<192x128xf32>
    %c32_55 = arith.constant 32 : index
    %c0_56 = arith.constant 0 : index
    %59 = vector.load %arg9[%c32_55, %c0_56] : memref<232x128xbf16, #tpu.memory_space<vmem>>, vector<192x128xbf16>
    %c6 = arith.constant 6 : index
    %c0_57 = arith.constant 0 : index
    %c0_58 = arith.constant 0 : index
    %60 = vector.load %arg4[%c6, %c0_57, %c0_58] : memref<9x128x128xbf16, #tpu.memory_space<vmem>>, vector<1x128x128xbf16>
    %61 = vector.shape_cast %60 : vector<1x128x128xbf16> to vector<128x128xbf16>
    %cst_59 = arith.constant dense<0.000000e+00> : vector<192x128xf32>
    %62 = tpu.matmul %59, %61, %cst_59 {dimension_numbers = #tpu.dot_dimension_numbers<[1], [0], [0], [1], [0, 0, 1, 1], [], []>} : vector<192x128xbf16>, vector<128x128xbf16>, vector<192x128xf32> -> vector<192x128xf32>
    %63 = arith.addf %58, %62 : vector<192x128xf32>
    %c33 = arith.constant 33 : index
    %c0_60 = arith.constant 0 : index
    %64 = vector.load %arg9[%c33, %c0_60] : memref<232x128xbf16, #tpu.memory_space<vmem>>, vector<192x128xbf16>
    %c7 = arith.constant 7 : index
    %c0_61 = arith.constant 0 : index
    %c0_62 = arith.constant 0 : index
    %65 = vector.load %arg4[%c7, %c0_61, %c0_62] : memref<9x128x128xbf16, #tpu.memory_space<vmem>>, vector<1x128x128xbf16>
    %66 = vector.shape_cast %65 : vector<1x128x128xbf16> to vector<128x128xbf16>
    %cst_63 = arith.constant dense<0.000000e+00> : vector<192x128xf32>
    %67 = tpu.matmul %64, %66, %cst_63 {dimension_numbers = #tpu.dot_dimension_numbers<[1], [0], [0], [1], [0, 0, 1, 1], [], []>} : vector<192x128xbf16>, vector<128x128xbf16>, vector<192x128xf32> -> vector<192x128xf32>
    %68 = arith.addf %63, %67 : vector<192x128xf32>
    %c34 = arith.constant 34 : index
    %c0_64 = arith.constant 0 : index
    %69 = vector.load %arg9[%c34, %c0_64] : memref<232x128xbf16, #tpu.memory_space<vmem>>, vector<192x128xbf16>
    %c8 = arith.constant 8 : index
    %c0_65 = arith.constant 0 : index
    %c0_66 = arith.constant 0 : index
    %70 = vector.load %arg4[%c8, %c0_65, %c0_66] : memref<9x128x128xbf16, #tpu.memory_space<vmem>>, vector<1x128x128xbf16>
    %71 = vector.shape_cast %70 : vector<1x128x128xbf16> to vector<128x128xbf16>
    %cst_67 = arith.constant dense<0.000000e+00> : vector<192x128xf32>
    %72 = tpu.matmul %69, %71, %cst_67 {dimension_numbers = #tpu.dot_dimension_numbers<[1], [0], [0], [1], [0, 0, 1, 1], [], []>} : vector<192x128xbf16>, vector<128x128xbf16>, vector<192x128xf32> -> vector<192x128xf32>
    %73 = arith.addf %68, %72 : vector<192x128xf32>
    %c0_68 = arith.constant 0 : index
    %c0_69 = arith.constant 0 : index
    %74 = vector.load %arg5[%c0_68, %c0_69] : memref<1x128xf32, #tpu.memory_space<vmem>>, vector<1x128xf32>
    %75 = vector.broadcast %74 : vector<1x128xf32> to vector<192x128xf32>
    %76 = arith.addf %73, %75 : vector<192x128xf32>
    %cst_70 = arith.constant 0.000000e+00 : f32
    %77 = vector.broadcast %cst_70 : f32 to vector<192x128xf32>
    %78 = arith.maximumf %76, %77 : vector<192x128xf32>
    %79 = arith.truncf %78 : vector<192x128xf32> to vector<192x128xbf16>
    %c0_71 = arith.constant 0 : index
    %c0_72 = arith.constant 0 : index
    %80 = vector.load %arg10[%c0_71, %c0_72] : memref<200x128xbf16, #tpu.memory_space<vmem>>, vector<192x128xbf16>
    tpu.vector_store %arg10[%c0_71, %c0_72], %79 {strides = array<i32>} : memref<200x128xbf16, #tpu.memory_space<vmem>>, vector<192x128xbf16>,
    %cst_73 = arith.constant 0.000000e+00 : bf16
    %81 = vector.broadcast %cst_73 : bf16 to vector<8x128xbf16>
    %c192 = arith.constant 192 : index
    %c0_74 = arith.constant 0 : index
    %82 = vector.load %arg10[%c192, %c0_74] : memref<200x128xbf16, #tpu.memory_space<vmem>>, vector<8x128xbf16>
    tpu.vector_store %arg10[%c192, %c0_74], %81 {strides = array<i32>} : memref<200x128xbf16, #tpu.memory_space<vmem>>, vector<8x128xbf16>,
    %cst_75 = arith.constant 0.000000e+00 : f32
    %83 = vector.broadcast %cst_75 : f32 to vector<144x128xf32>
    %c0_76 = arith.constant 0 : index
    %c0_77 = arith.constant 0 : index
    %84 = vector.load %arg10[%c0_76, %c0_77] : memref<200x128xbf16, #tpu.memory_space<vmem>>, vector<144x128xbf16>
    %c0_78 = arith.constant 0 : index
    %c0_79 = arith.constant 0 : index
    %c0_80 = arith.constant 0 : index
    %85 = vector.load %arg6[%c0_78, %c0_79, %c0_80] : memref<9x128x128xbf16, #tpu.memory_space<vmem>>, vector<1x128x128xbf16>
    %86 = vector.shape_cast %85 : vector<1x128x128xbf16> to vector<128x128xbf16>
    %cst_81 = arith.constant dense<0.000000e+00> : vector<144x128xf32>
    %87 = tpu.matmul %84, %86, %cst_81 {dimension_numbers = #tpu.dot_dimension_numbers<[1], [0], [0], [1], [0, 0, 1, 1], [], []>} : vector<144x128xbf16>, vector<128x128xbf16>, vector<144x128xf32> -> vector<144x128xf32>
    %88 = arith.addf %83, %87 : vector<144x128xf32>
    %c1_82 = arith.constant 1 : index
    %c0_83 = arith.constant 0 : index
    %89 = vector.load %arg10[%c1_82, %c0_83] : memref<200x128xbf16, #tpu.memory_space<vmem>>, vector<144x128xbf16>
    %c1_84 = arith.constant 1 : index
    %c0_85 = arith.constant 0 : index
    %c0_86 = arith.constant 0 : index
    %90 = vector.load %arg6[%c1_84, %c0_85, %c0_86] : memref<9x128x128xbf16, #tpu.memory_space<vmem>>, vector<1x128x128xbf16>
    %91 = vector.shape_cast %90 : vector<1x128x128xbf16> to vector<128x128xbf16>
    %cst_87 = arith.constant dense<0.000000e+00> : vector<144x128xf32>
    %92 = tpu.matmul %89, %91, %cst_87 {dimension_numbers = #tpu.dot_dimension_numbers<[1], [0], [0], [1], [0, 0, 1, 1], [], []>} : vector<144x128xbf16>, vector<128x128xbf16>, vector<144x128xf32> -> vector<144x128xf32>
    %93 = arith.addf %88, %92 : vector<144x128xf32>
    %c2_88 = arith.constant 2 : index
    %c0_89 = arith.constant 0 : index
    %94 = vector.load %arg10[%c2_88, %c0_89] : memref<200x128xbf16, #tpu.memory_space<vmem>>, vector<144x128xbf16>
    %c2_90 = arith.constant 2 : index
    %c0_91 = arith.constant 0 : index
    %c0_92 = arith.constant 0 : index
    %95 = vector.load %arg6[%c2_90, %c0_91, %c0_92] : memref<9x128x128xbf16, #tpu.memory_space<vmem>>, vector<1x128x128xbf16>
    %96 = vector.shape_cast %95 : vector<1x128x128xbf16> to vector<128x128xbf16>
    %cst_93 = arith.constant dense<0.000000e+00> : vector<144x128xf32>
    %97 = tpu.matmul %94, %96, %cst_93 {dimension_numbers = #tpu.dot_dimension_numbers<[1], [0], [0], [1], [0, 0, 1, 1], [], []>} : vector<144x128xbf16>, vector<128x128xbf16>, vector<144x128xf32> -> vector<144x128xf32>
    %98 = arith.addf %93, %97 : vector<144x128xf32>
    %c16_94 = arith.constant 16 : index
    %c0_95 = arith.constant 0 : index
    %99 = vector.load %arg10[%c16_94, %c0_95] : memref<200x128xbf16, #tpu.memory_space<vmem>>, vector<144x128xbf16>
    %c3_96 = arith.constant 3 : index
    %c0_97 = arith.constant 0 : index
    %c0_98 = arith.constant 0 : index
    %100 = vector.load %arg6[%c3_96, %c0_97, %c0_98] : memref<9x128x128xbf16, #tpu.memory_space<vmem>>, vector<1x128x128xbf16>
    %101 = vector.shape_cast %100 : vector<1x128x128xbf16> to vector<128x128xbf16>
    %cst_99 = arith.constant dense<0.000000e+00> : vector<144x128xf32>
    %102 = tpu.matmul %99, %101, %cst_99 {dimension_numbers = #tpu.dot_dimension_numbers<[1], [0], [0], [1], [0, 0, 1, 1], [], []>} : vector<144x128xbf16>, vector<128x128xbf16>, vector<144x128xf32> -> vector<144x128xf32>
    %103 = arith.addf %98, %102 : vector<144x128xf32>
    %c17_100 = arith.constant 17 : index
    %c0_101 = arith.constant 0 : index
    %104 = vector.load %arg10[%c17_100, %c0_101] : memref<200x128xbf16, #tpu.memory_space<vmem>>, vector<144x128xbf16>
    %c4_102 = arith.constant 4 : index
    %c0_103 = arith.constant 0 : index
    %c0_104 = arith.constant 0 : index
    %105 = vector.load %arg6[%c4_102, %c0_103, %c0_104] : memref<9x128x128xbf16, #tpu.memory_space<vmem>>, vector<1x128x128xbf16>
    %106 = vector.shape_cast %105 : vector<1x128x128xbf16> to vector<128x128xbf16>
    %cst_105 = arith.constant dense<0.000000e+00> : vector<144x128xf32>
    %107 = tpu.matmul %104, %106, %cst_105 {dimension_numbers = #tpu.dot_dimension_numbers<[1], [0], [0], [1], [0, 0, 1, 1], [], []>} : vector<144x128xbf16>, vector<128x128xbf16>, vector<144x128xf32> -> vector<144x128xf32>
    %108 = arith.addf %103, %107 : vector<144x128xf32>
    %c18_106 = arith.constant 18 : index
    %c0_107 = arith.constant 0 : index
    %109 = vector.load %arg10[%c18_106, %c0_107] : memref<200x128xbf16, #tpu.memory_space<vmem>>, vector<144x128xbf16>
    %c5_108 = arith.constant 5 : index
    %c0_109 = arith.constant 0 : index
    %c0_110 = arith.constant 0 : index
    %110 = vector.load %arg6[%c5_108, %c0_109, %c0_110] : memref<9x128x128xbf16, #tpu.memory_space<vmem>>, vector<1x128x128xbf16>
    %111 = vector.shape_cast %110 : vector<1x128x128xbf16> to vector<128x128xbf16>
    %cst_111 = arith.constant dense<0.000000e+00> : vector<144x128xf32>
    %112 = tpu.matmul %109, %111, %cst_111 {dimension_numbers = #tpu.dot_dimension_numbers<[1], [0], [0], [1], [0, 0, 1, 1], [], []>} : vector<144x128xbf16>, vector<128x128xbf16>, vector<144x128xf32> -> vector<144x128xf32>
    %113 = arith.addf %108, %112 : vector<144x128xf32>
    %c32_112 = arith.constant 32 : index
    %c0_113 = arith.constant 0 : index
    %114 = vector.load %arg10[%c32_112, %c0_113] : memref<200x128xbf16, #tpu.memory_space<vmem>>, vector<144x128xbf16>
    %c6_114 = arith.constant 6 : index
    %c0_115 = arith.constant 0 : index
    %c0_116 = arith.constant 0 : index
    %115 = vector.load %arg6[%c6_114, %c0_115, %c0_116] : memref<9x128x128xbf16, #tpu.memory_space<vmem>>, vector<1x128x128xbf16>
    %116 = vector.shape_cast %115 : vector<1x128x128xbf16> to vector<128x128xbf16>
    %cst_117 = arith.constant dense<0.000000e+00> : vector<144x128xf32>
    %117 = tpu.matmul %114, %116, %cst_117 {dimension_numbers = #tpu.dot_dimension_numbers<[1], [0], [0], [1], [0, 0, 1, 1], [], []>} : vector<144x128xbf16>, vector<128x128xbf16>, vector<144x128xf32> -> vector<144x128xf32>
    %118 = arith.addf %113, %117 : vector<144x128xf32>
    %c33_118 = arith.constant 33 : index
    %c0_119 = arith.constant 0 : index
    %119 = vector.load %arg10[%c33_118, %c0_119] : memref<200x128xbf16, #tpu.memory_space<vmem>>, vector<144x128xbf16>
    %c7_120 = arith.constant 7 : index
    %c0_121 = arith.constant 0 : index
    %c0_122 = arith.constant 0 : index
    %120 = vector.load %arg6[%c7_120, %c0_121, %c0_122] : memref<9x128x128xbf16, #tpu.memory_space<vmem>>, vector<1x128x128xbf16>
    %121 = vector.shape_cast %120 : vector<1x128x128xbf16> to vector<128x128xbf16>
    %cst_123 = arith.constant dense<0.000000e+00> : vector<144x128xf32>
    %122 = tpu.matmul %119, %121, %cst_123 {dimension_numbers = #tpu.dot_dimension_numbers<[1], [0], [0], [1], [0, 0, 1, 1], [], []>} : vector<144x128xbf16>, vector<128x128xbf16>, vector<144x128xf32> -> vector<144x128xf32>
    %123 = arith.addf %118, %122 : vector<144x128xf32>
    %c34_124 = arith.constant 34 : index
    %c0_125 = arith.constant 0 : index
    %124 = vector.load %arg10[%c34_124, %c0_125] : memref<200x128xbf16, #tpu.memory_space<vmem>>, vector<144x128xbf16>
    %c8_126 = arith.constant 8 : index
    %c0_127 = arith.constant 0 : index
    %c0_128 = arith.constant 0 : index
    %125 = vector.load %arg6[%c8_126, %c0_127, %c0_128] : memref<9x128x128xbf16, #tpu.memory_space<vmem>>, vector<1x128x128xbf16>
    %126 = vector.shape_cast %125 : vector<1x128x128xbf16> to vector<128x128xbf16>
    %cst_129 = arith.constant dense<0.000000e+00> : vector<144x128xf32>
    %127 = tpu.matmul %124, %126, %cst_129 {dimension_numbers = #tpu.dot_dimension_numbers<[1], [0], [0], [1], [0, 0, 1, 1], [], []>} : vector<144x128xbf16>, vector<128x128xbf16>, vector<144x128xf32> -> vector<144x128xf32>
    %128 = arith.addf %123, %127 : vector<144x128xf32>
    %c0_130 = arith.constant 0 : index
    %c0_131 = arith.constant 0 : index
    %129 = vector.load %arg7[%c0_130, %c0_131] : memref<1x128xf32, #tpu.memory_space<vmem>>, vector<1x128xf32>
    %130 = vector.broadcast %129 : vector<1x128xf32> to vector<144x128xf32>
    %131 = arith.addf %128, %130 : vector<144x128xf32>
    %cst_132 = arith.constant 0.000000e+00 : f32
    %132 = vector.broadcast %cst_132 : f32 to vector<144x128xf32>
    %133 = arith.maximumf %131, %132 : vector<144x128xf32>
    %c0_133 = arith.constant 0 : index
    %c0_134 = arith.constant 0 : index
    %c0_135 = arith.constant 0 : index
    %134 = vector.load %arg8[%c0_133, %c0_134, %c0_135] : memref<1x144x128xf32, #tpu.memory_space<vmem>>, vector<1x144x128xf32>
    %135 = vector.shape_cast %134 : vector<1x144x128xf32> to vector<144x128xf32>
    %136 = vector.shape_cast %133 : vector<144x128xf32> to vector<1x144x128xf32>
    tpu.vector_store %arg8[%c0_133, %c0_134, %c0_135], %136 {strides = array<i32>} : memref<1x144x128xf32, #tpu.memory_space<vmem>>, vector<1x144x128xf32>,
    return
  }
  func.func @transform_0(%arg0: i32) -> (i32, i32, i32) {
    %c0_i32 = arith.constant 0 : i32
    %c0_i32_0 = arith.constant 0 : i32
    %c0_i32_1 = arith.constant 0 : i32
    return %arg0, %c0_i32, %c0_i32_0 : i32, i32, i32
  }
  func.func @transform_1(%arg0: i32) -> (i32, i32, i32) {
    %c0_i32 = arith.constant 0 : i32
    %c0_i32_0 = arith.constant 0 : i32
    %c0_i32_1 = arith.constant 0 : i32
    %c0_i32_2 = arith.constant 0 : i32
    return %c0_i32, %c0_i32_0, %c0_i32_1 : i32, i32, i32
  }
  func.func @transform_2(%arg0: i32) -> (i32, i32) {
    %c0_i32 = arith.constant 0 : i32
    %c0_i32_0 = arith.constant 0 : i32
    %c0_i32_1 = arith.constant 0 : i32
    return %c0_i32, %c0_i32_0 : i32, i32
  }
  func.func @transform_3(%arg0: i32) -> (i32, i32, i32) {
    %c0_i32 = arith.constant 0 : i32
    %c0_i32_0 = arith.constant 0 : i32
    %c0_i32_1 = arith.constant 0 : i32
    %c0_i32_2 = arith.constant 0 : i32
    return %c0_i32, %c0_i32_0, %c0_i32_1 : i32, i32, i32
  }
  func.func @transform_4(%arg0: i32) -> (i32, i32) {
    %c0_i32 = arith.constant 0 : i32
    %c0_i32_0 = arith.constant 0 : i32
    %c0_i32_1 = arith.constant 0 : i32
    return %c0_i32, %c0_i32_0 : i32, i32
  }
  func.func @transform_5(%arg0: i32) -> (i32, i32, i32) {
    %c0_i32 = arith.constant 0 : i32
    %c0_i32_0 = arith.constant 0 : i32
    %c0_i32_1 = arith.constant 0 : i32
    %c0_i32_2 = arith.constant 0 : i32
    return %c0_i32, %c0_i32_0, %c0_i32_1 : i32, i32, i32
  }
  func.func @transform_6(%arg0: i32) -> (i32, i32) {
    %c0_i32 = arith.constant 0 : i32
    %c0_i32_0 = arith.constant 0 : i32
    %c0_i32_1 = arith.constant 0 : i32
    return %c0_i32, %c0_i32_0 : i32, i32
  }
  func.func @transform_7(%arg0: i32) -> (i32, i32, i32) {
    %c0_i32 = arith.constant 0 : i32
    %c0_i32_0 = arith.constant 0 : i32
    %c0_i32_1 = arith.constant 0 : i32
    return %arg0, %c0_i32, %c0_i32_0 : i32, i32, i32
  }
}

</mosaic_0001>

<bundles_post_ra>
// kernel: stacked_conv_block.1
= control target key start
LH: loop header
LB: loop body
LE: loop exit
PB: predicated region body
PF: predicated region fallthrough
CT: control target
= control target key end

     0   :  { %s9743_s24 = smov 0   ;;  %s11687_s0 = inlined_call_operand.vmem [shape: bf16[2,256,128], index: 0, kind: input, shape index: {}]   ;;  %s11688_s1 = inlined_call_operand.vmem [shape: bf16[3,128,128], index: 1, kind: input, shape index: {}]   ;;  %s11689_s2 = inlined_call_operand.vmem [shape: f32[1,128], index: 2, kind: input, shape index: {}]   ;;  %s11690_s3 = inlined_call_operand.vmem [shape: bf16[9,128,128], index: 3, kind: input, shape index: {}]   ;;  %s11691_s4 = inlined_call_operand.vmem [shape: f32[1,128], index: 4, kind: input, shape index: {}]   ;;  %s11692_s5 = inlined_call_operand.vmem [shape: bf16[9,128,128], index: 5, kind: input, shape index: {}]   ;;  %s11693_s6 = inlined_call_operand.vmem [shape: f32[1,128], index: 6, kind: input, shape index: {}]   ;;  %s11694_s7 = inlined_call_operand.vmem [shape: f32[2,144,128], index: 7, kind: output, shape index: {}]  }
   0x1 LB: > { %s6867_s25 = sadd.s32 4294967295, %s9698_s24   ;;  %p6871_p0 = scmp.ge.s32.totalorder %s9698_s24, 1  ;;  %s9698_s24 = sphi %s9743_s24, %s17_s24  }
   0x2   : > { %p237_p1 = scmp.lt.s32.totalorder %s9698_s24, 3 }
   0x4   : > { %p238_p2 = pnand %p6871_p0, %p237_p1 }
   0x6   : > { %241 = sbr.rel (%p238_p2) target bundleno = 1691 (0x69b), region = 48 }
   0xd   : > { %v9376_v0 = vld [vmem:[%s11688_s1 + $0x40] sm:$0xff]   ;;  %p269_p3 = scmp.lt.s32.totalorder %s6867_s25, 1  ;;  %v9377_v1 = vld [vmem:[%s11688_s1 + $0x48] sm:$0xff]   ;;  %v9378_v2 = vld [vmem:[%s11688_s1 + $0x50] sm:$0xff]   ;;  %v9700_v62 = vmov 0   ;;  %vm1994_vm1 = vcmask 1046528  }
   0xe   : > { %8140 = vmatprep.subr.bf16.mxu0 %v9376_v0  ;;  %v9379_v3 = vld [vmem:[%s11688_s1 + $0x58] sm:$0xff]   ;;  %v9380_v5 = vld [vmem:[%s11688_s1 + $0x60] sm:$0xff]   ;;  %v9381_v6 = vld [vmem:[%s11688_s1 + $0x68] sm:$0xff]   ;;  %1372 = vst [vmem:[#allocation2 + $0x70] sm:$0xf] %v9700_v62  ;;  %vm9702_vm2 = vmmov 0  }
   0xf   : > { %s11751_s25 = smov (!%p269_p3, %s6867_s25), 1  ;;  %8141 = vmatpush3.bf16.msra.mxu0 %v9376_v0  ;;  %v9382_v7 = vld [vmem:[%s11688_s1 + $0x70] sm:$0xff]   ;;  %v9383_v8 = vld [vmem:[%s11688_s1 + $0x78] sm:$0xff]   ;;  %v9386_v9 = vld [vmem:[%s11688_s1] sm:$0xff]   ;;  %vm1494_vm0 = vsmask.f32 7424 }
  0x10   : > { %8142 = vmatprep.subr.bf16.mxu0 %v9377_v1  ;;  %s7534_s9 = sshll.u32 %s11751_s25, 7  ;;  %v9388_v12 = vld [vmem:[%s11688_s1 + $0x8] sm:$0xff]   ;;  %v9390_v13 = vld [vmem:[%s11688_s1 + $0x10] sm:$0xff]   ;;  %v9393_v16 = vld [vmem:[%s11688_s1 + $0x18] sm:$0xff]   ;;  %s9364_s13 = smul.u32 144, %s11751_s25 }
  0x11   : > { %s9766_s12 = scalar_lea.vmem %s11687_s0, %s7534_s9  ;;  %v9396_v17 = vld [vmem:[%s11688_s1 + $0x20] sm:$0xff]   ;;  %v9399_v20 = vld [vmem:[%s11688_s1 + $0x28] sm:$0xff]   ;;  %v9402_v21 = vld [vmem:[%s11688_s1 + $0x30] sm:$0xff]  }
  0x12   : > { %v9772_v4 = vld [vmem:[%s9766_s12 + $0x8] sm:$0xff]   ;;  %v9385_v10 = vld [vmem:[%s9766_s12 + $0x10] sm:$0xff]   ;;  %v9387_v11 = vld [vmem:[%s9766_s12 + $0x18] sm:$0xff]   ;;  %s11621_s18 = scalar_lea.vmem %s11694_s7, %s9364_s13 }
  0x13   : > { %8143 = vmatpush3.bf16.msra.mxu0 %v9377_v1  ;;  %8156 = vmatprep.mubr.bf16.mxu0 %v9772_v4  ;;  %v9389_v14 = vld [vmem:[%s9766_s12 + $0x20] sm:$0xff]   ;;  %v9391_v15 = vld [vmem:[%s9766_s12 + $0x28] sm:$0xff]   ;;  %v9392_v18 = vld [vmem:[%s9766_s12 + $0x30] sm:$0xff]  }
  0x14   : > { %8144 = vmatprep.subr.bf16.mxu0 %v9378_v2  ;;  %v9394_v19 = vld [vmem:[%s9766_s12 + $0x38] sm:$0xff]   ;;  %v9395_v22 = vld [vmem:[%s9766_s12 + $0x40] sm:$0xff]   ;;  %v9397_v23 = vld [vmem:[%s9766_s12 + $0x48] sm:$0xff]  }
  0x15   : > { %v9405_v24 = vld [vmem:[%s11688_s1 + $0x38] sm:$0xff]   ;;  %v9407_v25 = vld [vmem:[%s11688_s1 + $0x80] sm:$0xff]   ;;  %v9398_v26 = vld [vmem:[%s9766_s12 + $0x50] sm:$0xff]  }
  0x16   : > { %v9400_v27 = vld [vmem:[%s9766_s12 + $0x58] sm:$0xff]   ;;  %v9401_v28 = vld [vmem:[%s9766_s12 + $0x60] sm:$0xff]   ;;  %v9403_v29 = vld [vmem:[%s9766_s12 + $0x68] sm:$0xff]  }
  0x17   : > { %8145 = vmatpush3.bf16.msra.mxu0 %v9378_v2  ;;  %v9404_v30 = vld [vmem:[%s9766_s12 + $0x70] sm:$0xff]   ;;  %v9406_v31 = vld [vmem:[%s9766_s12] sm:$0xff]   ;;  %v9408_v32 = vld [vmem:[%s11688_s1 + $0x88] sm:$0xff]  }
  0x18   : > { %8146 = vmatprep.subr.bf16.mxu0 %v9379_v3  ;;  %v9409_v33 = vld [vmem:[%s11688_s1 + $0x90] sm:$0xff]   ;;  %v9410_v34 = vld [vmem:[%s11688_s1 + $0x98] sm:$0xff]   ;;  %v9411_v35 = vld [vmem:[%s11688_s1 + $0xa0] sm:$0xff]  }
  0x19   : > { %v9412_v36 = vld [vmem:[%s11688_s1 + $0xa8] sm:$0xff]   ;;  %v9413_v37 = vld [vmem:[%s11688_s1 + $0xb0] sm:$0xff]   ;;  %v9414_v38 = vld [vmem:[%s11688_s1 + $0xb8] sm:$0xff]  }
  0x1a   : > { %v9415_v39 = vld [vmem:[%s9766_s12 + $0x10] sm:$0xff]   ;;  %v9416_v40 = vld [vmem:[%s9766_s12 + $0x18] sm:$0xff]   ;;  %v9417_v41 = vld [vmem:[%s9766_s12 + $0x20] sm:$0xff]  }
  0x1b   : > { %8147 = vmatpush3.bf16.msra.mxu0 %v9379_v3  ;;  %v9418_v42 = vld [vmem:[%s9766_s12 + $0x28] sm:$0xff]   ;;  %v9419_v43 = vld [vmem:[%s9766_s12 + $0x30] sm:$0xff]   ;;  %v9420_v44 = vld [vmem:[%s9766_s12 + $0x38] sm:$0xff]  }
  0x1c   : > { %8148 = vmatprep.subr.bf16.mxu0 %v9380_v5  ;;  %v9421_v45 = vld [vmem:[%s9766_s12 + $0x40] sm:$0xff]   ;;  %v9422_v46 = vld [vmem:[%s9766_s12 + $0x48] sm:$0xff]   ;;  %v9423_v47 = vld [vmem:[%s9766_s12 + $0x50] sm:$0xff]  }
  0x1d   : > { %v9424_v48 = vld [vmem:[%s9766_s12 + $0x58] sm:$0xff]   ;;  %v9425_v49 = vld [vmem:[%s9766_s12 + $0x60] sm:$0xff]   ;;  %v9426_v50 = vld [vmem:[%s9766_s12 + $0x68] sm:$0xff]  }
  0x1e   : > { %v9427_v51 = vld [vmem:[%s9766_s12 + $0x70] sm:$0xff]   ;;  %v9428_v52 = vld [vmem:[%s9766_s12 + $0x78] sm:$0xff]   ;;  %v9429_v53 = vld [vmem:[%s11690_s3 + $0x40] sm:$0xff]  }
  0x1f   : > { %8149 = vmatpush3.bf16.msra.mxu0 %v9380_v5  ;;  %8272 = vmatprep.subr.bf16.mxu1 %v9429_v53  ;;  %v9430_v54 = vld [vmem:[%s11690_s3 + $0x48] sm:$0xff]   ;;  %v9431_v55 = vld [vmem:[%s11690_s3 + $0x50] sm:$0xff]   ;;  %v9432_v56 = vld [vmem:[%s11690_s3 + $0x58] sm:$0xff]  }
  0x20   : > { %8150 = vmatprep.subr.bf16.mxu0 %v9381_v6  ;;  %8273 = vmatpush3.bf16.msra.mxu1 %v9429_v53  ;;  %v9433_v57 = vld [vmem:[%s11690_s3 + $0x60] sm:$0xff]   ;;  %v9434_v58 = vld [vmem:[%s11690_s3 + $0x68] sm:$0xff]   ;;  %v9435_v59 = vld [vmem:[%s11690_s3 + $0x70] sm:$0xff]  }
  0x21   : > { %8274 = vmatprep.subr.bf16.mxu1 %v9430_v54  ;;  %v9438_v60 = vld [vmem:[%s11690_s3 + $0x78] sm:$0xff]   ;;  %v9891_v61 = vld [vmem:[%s11690_s3] sm:$0xff]  }
  0x22   : > { %v9897_v63 = vld [vmem:[%s11689_s2] ss:$0 sm:$0xff] }
  0x23   : > { %8151 = vmatpush3.bf16.msra.mxu0 %v9381_v6 }
  0x24   : > { %8152 = vmatprep.subr.bf16.mxu0 %v9382_v7  ;;  %8275 = vmatpush3.bf16.msra.mxu1 %v9430_v54 }
  0x25   : > { %8276 = vmatprep.subr.bf16.mxu1 %v9431_v55 }
  0x27   : > { %8153 = vmatpush3.bf16.msra.mxu0 %v9382_v7 }
  0x28   : > { %8154 = vmatprep.subr.bf16.mxu0 %v9383_v8  ;;  %8277 = vmatpush3.bf16.msra.mxu1 %v9431_v55 }
  0x29   : > { %8278 = vmatprep.subr.bf16.mxu1 %v9432_v56 }
  0x2b   : > { %8155 = vmatpush3.bf16.msra.mxu0 %v9383_v8 }
  0x2c   : > { %8184 = vmatprep.subr.bf16.mxu0 %v9386_v9  ;;  %8279 = vmatpush3.bf16.msra.mxu1 %v9432_v56 }
  0x2d   : > { %8280 = vmatprep.subr.bf16.mxu1 %v9433_v57 }
  0x2e   : > { %8157 = vmatmul.mubr.bf16.vlgmr.msra.gmra.mrb[0].mxu0 %v9385_v10 }
  0x2f   : > { %8185 = vmatpush3.bf16.msra.mxu0 %v9386_v9  ;;  %8160 = vmatprep.mubr.bf16.mxu0 %v9387_v11 }
  0x30   : > { %8186 = vmatprep.subr.bf16.mxu0 %v9388_v12  ;;  %8281 = vmatpush3.bf16.msra.mxu1 %v9433_v57 }
  0x31   : > { %8282 = vmatprep.subr.bf16.mxu1 %v9434_v58 }
  0x33   : > { %8187 = vmatpush3.bf16.msra.mxu0 %v9388_v12 }
  0x34   : > { %8188 = vmatprep.subr.bf16.mxu0 %v9390_v13  ;;  %8283 = vmatpush3.bf16.msra.mxu1 %v9434_v58 }
  0x35   : > { %8284 = vmatprep.subr.bf16.mxu1 %v9435_v59 }
  0x36   : > { %8161 = vmatmul.mubr.bf16.gmra.mrb[4].mxu0 %v9389_v14 }
  0x37   : > { %8164 = vmatprep.mubr.bf16.mxu0 %v9391_v15  ;;  %8189 = vmatpush3.bf16.msra.mxu0 %v9390_v13 }
  0x38   : > { %8190 = vmatprep.subr.bf16.mxu0 %v9393_v16  ;;  %8285 = vmatpush3.bf16.msra.mxu1 %v9435_v59 }
  0x39   : > { %8286 = vmatprep.subr.bf16.mxu1 %v9438_v60 }
  0x3b   : > { %8191 = vmatpush3.bf16.msra.mxu0 %v9393_v16 }
  0x3c   : > { %8192 = vmatprep.subr.bf16.mxu0 %v9396_v17  ;;  %8287 = vmatpush3.bf16.msra.mxu1 %v9438_v60 }
  0x3d   : > { %8312 = vmatprep.subr.bf16.mxu1 %v9891_v61 }
  0x3e   : > { %8165 = vmatmul.mubr.bf16.gmra.mrb[8].mxu0 %v9392_v18 }
  0x3f   : > { %8168 = vmatprep.mubr.bf16.mxu0 %v9394_v19  ;;  %8193 = vmatpush3.bf16.msra.mxu0 %v9396_v17 }
  0x40   : > { %8194 = vmatprep.subr.bf16.mxu0 %v9399_v20 }
  0x43   : > { %8195 = vmatpush3.bf16.msra.mxu0 %v9399_v20 }
  0x44   : > { %8196 = vmatprep.subr.bf16.mxu0 %v9402_v21 }
  0x46   : > { %8169 = vmatmul.mubr.bf16.gmra.mrb[12].mxu0 %v9395_v22 }
  0x47   : > { %8172 = vmatprep.mubr.bf16.mxu0 %v9397_v23  ;;  %8197 = vmatpush3.bf16.msra.mxu0 %v9402_v21 }
  0x48   : > { %8198 = vmatprep.subr.bf16.mxu0 %v9405_v24 }
  0x4b   : > { %8199 = vmatpush3.bf16.msra.mxu0 %v9405_v24 }
  0x4c   : > { %8228 = vmatprep.subr.bf16.mxu0 %v9407_v25 }
  0x4e   : > { %8173 = vmatmul.mubr.bf16.gmra.mrb[16].mxu0 %v9398_v26 }
  0x4f   : > { %8176 = vmatprep.mubr.bf16.mxu0 %v9400_v27 }
  0x56   : > { %8177 = vmatmul.mubr.bf16.gmra.mrb[20].mxu0 %v9401_v28 }
  0x57   : > { %8180 = vmatprep.mubr.bf16.mxu0 %v9403_v29 }
  0x5e   : > { %8181 = vmatmul.mubr.bf16.gmra.mrb[24].mxu0 %v9404_v30 }
  0x5f   : > { %8200 = vmatprep.mubr.bf16.mxu0 %v9406_v31 }
  0x66   : > { %8201 = vmatmul.mubr.bf16.vlgmr.msra.gmra.mrb[0].mxu0 %v9772_v4 }
  0x67   : > { %8229 = vmatpush3.bf16.msra.mxu0 %v9407_v25  ;;  %8204 = vmatprep.mubr.bf16.mxu0 %v9385_v10 }
  0x68   : > { %8230 = vmatprep.subr.bf16.mxu0 %v9408_v32 }
  0x6b   : > { %8231 = vmatpush3.bf16.msra.mxu0 %v9408_v32 }
  0x6c   : > { %8232 = vmatprep.subr.bf16.mxu0 %v9409_v33 }
  0x6e   : > { %8205 = vmatmul.mubr.bf16.gmra.mrb[4].mxu0 %v9387_v11 }
  0x6f   : > { %8208 = vmatprep.mubr.bf16.mxu0 %v9389_v14  ;;  %8233 = vmatpush3.bf16.msra.mxu0 %v9409_v33 }
  0x70   : > { %8234 = vmatprep.subr.bf16.mxu0 %v9410_v34 }
  0x73   : > { %8235 = vmatpush3.bf16.msra.mxu0 %v9410_v34 }
  0x74   : > { %8236 = vmatprep.subr.bf16.mxu0 %v9411_v35 }
  0x76   : > { %8209 = vmatmul.mubr.bf16.gmra.mrb[8].mxu0 %v9391_v15 }
  0x77   : > { %8212 = vmatprep.mubr.bf16.mxu0 %v9392_v18  ;;  %8237 = vmatpush3.bf16.msra.mxu0 %v9411_v35 }
  0x78   : > { %8238 = vmatprep.subr.bf16.mxu0 %v9412_v36 }
  0x7b   : > { %8239 = vmatpush3.bf16.msra.mxu0 %v9412_v36 }
  0x7c   : > { %8240 = vmatprep.subr.bf16.mxu0 %v9413_v37 }
  0x7e   : > { %8213 = vmatmul.mubr.bf16.gmra.mrb[12].mxu0 %v9394_v19 }
  0x7f   : > { %8216 = vmatprep.mubr.bf16.mxu0 %v9395_v22  ;;  %8241 = vmatpush3.bf16.msra.mxu0 %v9413_v37 }
  0x80   : > { %8242 = vmatprep.subr.bf16.mxu0 %v9414_v38 }
  0x83   : > { %8243 = vmatpush3.bf16.msra.mxu0 %v9414_v38 }
  0x86   : > { %8217 = vmatmul.mubr.bf16.gmra.mrb[16].mxu0 %v9397_v23 }
  0x87   : > { %8220 = vmatprep.mubr.bf16.mxu0 %v9398_v26 }
  0x8e   : > { %8221 = vmatmul.mubr.bf16.gmra.mrb[20].mxu0 %v9400_v27 }
  0x8f   : > { %8224 = vmatprep.mubr.bf16.mxu0 %v9401_v28 }
  0x96   : > { %8225 = vmatmul.mubr.bf16.gmra.mrb[24].mxu0 %v9403_v29 }
  0x97   : > { %8244 = vmatprep.mubr.bf16.mxu0 %v9415_v39 }
  0x9e   : > { %8245 = vmatmul.mubr.bf16.vlgmr.msra.gmra.mrb[0].mxu0 %v9416_v40 }
  0x9f   : > { %8248 = vmatprep.mubr.bf16.mxu0 %v9417_v41 }
  0xa6   : > { %8249 = vmatmul.mubr.bf16.gmra.mrb[4].mxu0 %v9418_v42 }
  0xa7   : > { %8252 = vmatprep.mubr.bf16.mxu0 %v9419_v43 }
  0xae   : > { %8253 = vmatmul.mubr.bf16.gmra.mrb[8].mxu0 %v9420_v44 }
  0xaf   : > { %8256 = vmatprep.mubr.bf16.mxu0 %v9421_v45 }
  0xb6   : > { %8257 = vmatmul.mubr.bf16.gmra.mrb[12].mxu0 %v9422_v46 }
  0xb7   : > { %8260 = vmatprep.mubr.bf16.mxu0 %v9423_v47 }
  0xbe   : > { %8261 = vmatmul.mubr.bf16.gmra.mrb[16].mxu0 %v9424_v48 }
  0xbf   : > { %8264 = vmatprep.mubr.bf16.mxu0 %v9425_v49 }
  0xc6   : > { %8265 = vmatmul.mubr.bf16.gmra.mrb[20].mxu0 %v9426_v50 }
  0xc7   : > { %8268 = vmatprep.mubr.bf16.mxu0 %v9427_v51 }
  0xce   : > { %8269 = vmatmul.mubr.bf16.gmra.mrb[24].mxu0 %v9428_v52 }
 0x171   : > { %v8246_v0 = vpop.f32.mrb[0].mxu0 }
 0x172   : > { %v1178_v1 = vadd.f32 %v8246_v0, %v9897_v63  ;;  %v1030_v2 = vpop.f32.mrb[1].mxu0 }
 0x173   : > { %v1176_v3 = vadd.f32 %v9897_v63, %v1030_v2  ;;  %v8247_v4 = vpop.f32.mrb[2].mxu0 }
 0x174   : > { %v1179_v5 = vadd.f32 %v8247_v4, %v9897_v63  ;;  %v1033_v6 = vpop.f32.mrb[3].mxu0  ;;  %v1206_v8 = vmax.f32 %v1178_v1, 0.0 }
 0x175   : > { %v1177_v7 = vadd.f32 %v9897_v63, %v1033_v6  ;;  %v1204_v10 = vmax.f32 %v1176_v3, 0.0 }
 0x176   : > { %v1207_v9 = vmax.f32 %v1179_v5, 0.0 }
 0x177   : > { %v1205_v11 = vmax.f32 %v1177_v7, 0.0 }
 0x178   : > { %v7595_v12 = vpack.c.bf16 %v1207_v9, %v1206_v8 }
 0x179   : > { %v7590_v13 = vpack.c.bf16 %v1205_v11, %v1204_v10  ;;  %v8250_v14 = vpop.f32.mrb[4].mxu0 }
 0x17a   : > { %7717 = vst [vmem:[#allocation2 + $0x8] sm:$0xff] %v7595_v12   ;;  %v1182_v15 = vadd.f32 %v8250_v14, %v9897_v63  ;;  %v1046_v16 = vpop.f32.mrb[5].mxu0  ;;  %v9442_v12 = vld [vmem:[%s11690_s3 + $0x8] sm:$0xff]  }
 0x17b   : > { %7591 = vst [vmem:[#allocation2] sm:$0xff] %v7590_v13   ;;  %v1180_v17 = vadd.f32 %v9897_v63, %v1046_v16  ;;  %v8251_v18 = vpop.f32.mrb[6].mxu0 }
 0x17c   : > { %v1183_v19 = vadd.f32 %v8251_v18, %v9897_v63  ;;  %v1049_v20 = vpop.f32.mrb[7].mxu0  ;;  %v1210_v22 = vmax.f32 %v1182_v15, 0.0 }
 0x17d   : > { %v1181_v21 = vadd.f32 %v9897_v63, %v1049_v20  ;;  %v1208_v24 = vmax.f32 %v1180_v17, 0.0 }
 0x17e   : > { %v1211_v23 = vmax.f32 %v1183_v19, 0.0 }
 0x17f   : > { %v1209_v25 = vmax.f32 %v1181_v21, 0.0 }
 0x180   : > { %v7605_v26 = vpack.c.bf16 %v1211_v23, %v1210_v22 }
 0x181   : > { %v7600_v27 = vpack.c.bf16 %v1209_v25, %v1208_v24  ;;  %v8254_v28 = vpop.f32.mrb[8].mxu0  ;;  %v9907_v29 = vld [vmem:[#allocation2 + $0x8] sm:$0xff]  }
 0x182   : > { %7719 = vst [vmem:[#allocation2 + $0x18] sm:$0xff] %v7605_v26   ;;  %v1186_v30 = vadd.f32 %v8254_v28, %v9897_v63  ;;  %v1062_v31 = vpop.f32.mrb[9].mxu0  ;;  %v1373_v32 = vld [vmem:[#allocation2] sm:$0xf]  ;;  %v1374_v33 = vld [vmem:[#allocation2 + $0x4] sm:$0xf] }
 0x183   : > { %7718 = vst [vmem:[#allocation2 + $0x10] sm:$0xff] %v7600_v27   ;;  %v1184_v34 = vadd.f32 %v9897_v63, %v1062_v31  ;;  %v8255_v35 = vpop.f32.mrb[10].mxu0  ;;  %v9911_v36 = vcombine.low %v1373_v32, %v1374_v33  ;;  %v1973_v37 = vld [vmem:[#allocation2] sm:$0xe]  ;;  %v1503_v40 = vshll.u32 %v9907_v29, 16  ;;  %v1996_v47 = vrot.slane %v9907_v29, 1 }
 0x184   : > { %v1187_v38 = vadd.f32 %v8255_v35, %v9897_v63  ;;  %v1065_v39 = vpop.f32.mrb[11].mxu0  ;;  %v7050_v41 = vcombine.low %v1973_v37, %v1374_v33  ;;  %v1214_v44 = vmax.f32 %v1186_v30, 0.0  ;;  %v1507_v54 = vshrl.u32 %v9907_v29, 16  ;;  %v9445_v35 = vld [vmem:[%s11690_s3 + $0x10] sm:$0xff]  }
 0x185   : > { %v1185_v42 = vadd.f32 %v9897_v63, %v1065_v39  ;;  %v1498_v43 = vshll.u32 %v9911_v36, 16  ;;  %v1212_v48 = vmax.f32 %v1184_v34, 0.0  ;;  %v1496_v50 = vshrl.u32 %v9911_v36, 16 }
 0x186   : > { %v1215_v45 = vmax.f32 %v1187_v38, 0.0  ;;  %v1995_v46 = vrot.slane %v7050_v41, 1  ;;  %v1505_v53 = vrot.slane %v1503_v40, 1 }
 0x187   : > { %v1213_v49 = vmax.f32 %v1185_v42, 0.0  ;;  %v1500_v51 = vrot.slane %v1498_v43, 1 }
 0x188   : > { %v7615_v52 = vpack.c.bf16 %v1215_v45, %v1214_v44  ;;  %v9921_v55 = vsel %vm1994_vm1, %v1995_v46, %v1996_v47  ;;  %v1509_v7 = vor.u32 %v1507_v54, %v1505_v53  ;;  %v9448_v45 = vld [vmem:[%s11690_s3 + $0x18] sm:$0xff]  }
 0x189   : > { %v7610_v56 = vpack.c.bf16 %v1213_v49, %v1212_v48  ;;  %v8258_v57 = vpop.f32.mrb[12].mxu0  ;;  %v1501_v58 = vor.u32 %v1500_v51, %v1496_v50  ;;  %v9923_v59 = vld [vmem:[#allocation2 + $0x18] sm:$0xff]  }
 0x18a   : > { %7721 = vst [vmem:[#allocation2 + $0x28] sm:$0xff] %v7615_v52   ;;  %v1190_v60 = vadd.f32 %v8258_v57, %v9897_v63  ;;  %v1078_v62 = vpop.f32.mrb[13].mxu0  ;;  %v9926_v0 = vld [vmem:[#allocation2 + $0x10] sm:$0xff]   ;;  %v1519_v4 = vshll.u32 %v9923_v59, 16  ;;  %v2000_v17 = vrot.slane %v9923_v59, 1 }
 0x18b   : > { %7720 = vst [vmem:[#allocation2 + $0x20] sm:$0xff] %v7610_v56   ;;  %v1188_v1 = vadd.f32 %v9897_v63, %v1078_v62  ;;  %v8259_v2 = vpop.f32.mrb[14].mxu0  ;;  %v1506_v3 = vsel %vm1494_vm0, %v1501_v58, %v1505_v53  ;;  %v1511_v8 = vshll.u32 %v9926_v0, 16  ;;  %v1515_v11 = vshrl.u32 %v9926_v0, 16 }
 0x18c   : > { %v1191_v5 = vadd.f32 %v8259_v2, %v9897_v63  ;;  %v1081_v6 = vpop.f32.mrb[15].mxu0  ;;  %8288 = vmatprep.mubr.bf16.mxu1 %v1506_v3  ;;  %v1218_v9 = vmax.f32 %v1190_v60, 0.0  ;;  %v1998_v13 = vrot.slane %v9926_v0, 1  ;;  %v1521_v19 = vrot.slane %v1519_v4, 1 }
 0x18d   : > { %v1189_v10 = vadd.f32 %v9897_v63, %v1081_v6  ;;  %v1216_v14 = vmax.f32 %v1188_v1, 0.0  ;;  %v1513_v16 = vrot.slane %v1511_v8, 1  ;;  %v9450_v8 = vld [vmem:[%s11690_s3 + $0x20] sm:$0xff]  }
 0x18e   : > { %v1219_v15 = vmax.f32 %v1191_v5, 0.0  ;;  %v9941_v20 = vsel %vm1994_vm1, %v1996_v47, %v1998_v13  ;;  %v9945_v24 = vsel %vm1994_vm1, %v1998_v13, %v2000_v17 }
 0x18f   : > { %v1217_v18 = vmax.f32 %v1189_v10, 0.0  ;;  %v1514_v22 = vsel %vm1494_vm0, %v1509_v7, %v1513_v16  ;;  %v1517_v23 = vor.u32 %v1515_v11, %v1513_v16 }
 0x190   : > { %v7625_v21 = vpack.c.bf16 %v1219_v15, %v1218_v9  ;;  %8289 = vmatmul.mubr.bf16.vlgmr.msra.gmra.mrb[0].mxu1 %v1514_v22 }
 0x191   : > { %v7620_v25 = vpack.c.bf16 %v1217_v18, %v1216_v14  ;;  %v8262_v26 = vpop.f32.mrb[16].mxu0  ;;  %v9947_v27 = vld [vmem:[#allocation2 + $0x28] sm:$0xff]   ;;  %8313 = vmatpush3.bf16.msra.mxu1 %v9891_v61  ;;  %v1522_v31 = vsel %vm1494_vm0, %v1517_v23, %v1521_v19  ;;  %v1523_v61 = vshrl.u32 %v9923_v59, 16 }
 0x192   : > { %7723 = vst [vmem:[#allocation2 + $0x38] sm:$0xff] %v7625_v21   ;;  %v1194_v28 = vadd.f32 %v8262_v26, %v9897_v63  ;;  %v1094_v30 = vpop.f32.mrb[17].mxu0  ;;  %v9952_v32 = vld [vmem:[#allocation2 + $0x20] sm:$0xff]   ;;  %8292 = vmatprep.mubr.bf16.mxu1 %v1522_v31  ;;  %8314 = vmatprep.subr.bf16.mxu1 %v9442_v12  ;;  %v2004_v37 = vrot.slane %v9947_v27, 1  ;;  %v1535_v41 = vshll.u32 %v9947_v27, 16  ;;  %v9452_v18 = vld [vmem:[%s11690_s3 + $0x28] sm:$0xff]  }
 0x193   : > { %7722 = vst [vmem:[#allocation2 + $0x30] sm:$0xff] %v7620_v25   ;;  %v1192_v33 = vadd.f32 %v9897_v63, %v1094_v30  ;;  %v8263_v34 = vpop.f32.mrb[18].mxu0  ;;  %v1527_v40 = vshll.u32 %v9952_v32, 16  ;;  %v1531_v44 = vshrl.u32 %v9952_v32, 16  ;;  %v2002_v46 = vrot.slane %v9952_v32, 1 }
 0x194   : > { %v1195_v38 = vadd.f32 %v8263_v34, %v9897_v63  ;;  %v1097_v39 = vpop.f32.mrb[19].mxu0  ;;  %v1222_v42 = vmax.f32 %v1194_v28, 0.0  ;;  %v1525_v48 = vor.u32 %v1523_v61, %v1521_v19  ;;  %v1537_v58 = vrot.slane %v1535_v41, 1 }
 0x195   : > { %v1193_v43 = vadd.f32 %v9897_v63, %v1097_v39  ;;  %8315 = vmatpush3.bf16.msra.mxu1 %v9442_v12  ;;  %v1529_v49 = vrot.slane %v1527_v40, 1  ;;  %v1220_v50 = vmax.f32 %v1192_v33, 0.0  ;;  %v9970_v52 = vsel %vm1994_vm1, %v2000_v17, %v2002_v46 }
 0x196   : > { %v1223_v47 = vmax.f32 %v1195_v38, 0.0  ;;  %8316 = vmatprep.subr.bf16.mxu1 %v9445_v35  ;;  %v9973_v53 = vsel %vm1994_vm1, %v2002_v46, %v2004_v37  ;;  %v1539_v12 = vshrl.u32 %v9947_v27, 16 }
 0x197   : > { %v1221_v51 = vmax.f32 %v1193_v43, 0.0  ;;  %v1530_v56 = vsel %vm1494_vm0, %v1525_v48, %v1529_v49  ;;  %v1533_v57 = vor.u32 %v1531_v44, %v1529_v49 }
 0x198   : > { %v7635_v54 = vpack.c.bf16 %v1223_v47, %v1222_v42  ;;  %8293 = vmatmul.mubr.bf16.gmra.mrb[4].mxu1 %v1530_v56  ;;  %v1541_v22 = vor.u32 %v1539_v12, %v1537_v58 }
 0x199   : > { %v7630_v60 = vpack.c.bf16 %v1221_v51, %v1220_v50  ;;  %v8266_v62 = vpop.f32.mrb[20].mxu0  ;;  %v9976_v1 = vld [vmem:[#allocation2 + $0x38] sm:$0xff]   ;;  %v1538_v4 = vsel %vm1494_vm0, %v1533_v57, %v1537_v58  ;;  %8317 = vmatpush3.bf16.msra.mxu1 %v9445_v35 }
 0x19a   : > { %7725 = vst [vmem:[#allocation2 + $0x48] sm:$0xff] %v7635_v54   ;;  %v1198_v2 = vadd.f32 %v8266_v62, %v9897_v63  ;;  %v1110_v3 = vpop.f32.mrb[21].mxu0  ;;  %v9980_v5 = vld [vmem:[#allocation2 + $0x30] sm:$0xff]   ;;  %8296 = vmatprep.mubr.bf16.mxu1 %v1538_v4  ;;  %8318 = vmatprep.subr.bf16.mxu1 %v9448_v45  ;;  %v2008_v9 = vrot.slane %v9976_v1, 1  ;;  %v1551_v14 = vshll.u32 %v9976_v1, 16  ;;  %v1555_v49 = vshrl.u32 %v9976_v1, 16 }
 0x19b   : > { %7724 = vst [vmem:[#allocation2 + $0x40] sm:$0xff] %v7630_v60   ;;  %v1196_v6 = vadd.f32 %v9897_v63, %v1110_v3  ;;  %v8267_v7 = vpop.f32.mrb[22].mxu0  ;;  %v1543_v13 = vshll.u32 %v9980_v5, 16  ;;  %v1547_v17 = vshrl.u32 %v9980_v5, 16  ;;  %v2006_v19 = vrot.slane %v9980_v5, 1 }
 0x19c   : > { %v1199_v10 = vadd.f32 %v8267_v7, %v9897_v63  ;;  %v1113_v11 = vpop.f32.mrb[23].mxu0  ;;  %v1226_v15 = vmax.f32 %v1198_v2, 0.0  ;;  %v1553_v35 = vrot.slane %v1551_v14, 1 }
 0x19d   : > { %v1197_v16 = vadd.f32 %v9897_v63, %v1113_v11  ;;  %v1545_v23 = vrot.slane %v1543_v13, 1  ;;  %8319 = vmatpush3.bf16.msra.mxu1 %v9448_v45  ;;  %v1224_v25 = vmax.f32 %v1196_v6, 0.0  ;;  %v9998_v28 = vsel %vm1994_vm1, %v2004_v37, %v2006_v19  ;;  %v9455_v45 = vld [vmem:[%s11690_s3 + $0x30] sm:$0xff]   ;;  %v9457_v6 = vld [vmem:[%s11690_s3 + $0x38] sm:$0xff]  }
 0x19e   : > { %v1227_v21 = vmax.f32 %v1199_v10, 0.0  ;;  %8320 = vmatprep.subr.bf16.mxu1 %v9450_v8  ;;  %v10001_v30 = vsel %vm1994_vm1, %v2006_v19, %v2008_v9  ;;  %v1557_v62 = vor.u32 %v1555_v49, %v1553_v35  ;;  %v9460_v49 = vld [vmem:[%s11690_s3 + $0x90] sm:$0xff]  }
 0x19f   : > { %v1225_v26 = vmax.f32 %v1197_v16, 0.0  ;;  %v1546_v33 = vsel %vm1494_vm0, %v1541_v22, %v1545_v23  ;;  %v1549_v34 = vor.u32 %v1547_v17, %v1545_v23  ;;  %v9458_v17 = vld [vmem:[%s11690_s3 + $0x80] sm:$0xff]  }
 0x1a0   : > { %v7645_v31 = vpack.c.bf16 %v1227_v21, %v1226_v15  ;;  %8297 = vmatmul.mubr.bf16.gmra.mrb[8].mxu1 %v1546_v33 }
 0x1a1   : > { %v7640_v38 = vpack.c.bf16 %v1225_v26, %v1224_v25  ;;  %v8270_v39 = vpop.f32.mrb[24].mxu0  ;;  %v10004_v61 = vld [vmem:[#allocation2 + $0x48] sm:$0xff]   ;;  %v1554_v37 = vsel %vm1494_vm0, %v1549_v34, %v1553_v35  ;;  %8321 = vmatpush3.bf16.msra.mxu1 %v9450_v8 }
 0x1a2   : > { %7727 = vst [vmem:[#allocation2 + $0x58] sm:$0xff] %v7645_v31   ;;  %v1202_v40 = vadd.f32 %v8270_v39, %v9897_v63  ;;  %v1126_v41 = vpop.f32.mrb[25].mxu0  ;;  %v10008_v42 = vld [vmem:[#allocation2 + $0x40] sm:$0xff]   ;;  %8300 = vmatprep.mubr.bf16.mxu1 %v1554_v37  ;;  %8322 = vmatprep.subr.bf16.mxu1 %v9452_v18  ;;  %v2012_v46 = vrot.slane %v10004_v61, 1  ;;  %v1567_v51 = vshll.u32 %v10004_v61, 16 }
 0x1a3   : > { %7726 = vst [vmem:[#allocation2 + $0x50] sm:$0xff] %v7640_v38   ;;  %v1200_v43 = vadd.f32 %v9897_v63, %v1126_v41  ;;  %v8271_v44 = vpop.f32.mrb[26].mxu0  ;;  %v1559_v50 = vshll.u32 %v10008_v42, 16  ;;  %v1563_v57 = vshrl.u32 %v10008_v42, 16  ;;  %v2010_v58 = vrot.slane %v10008_v42, 1 }
 0x1a4   : > { %v1203_v47 = vadd.f32 %v8271_v44, %v9897_v63  ;;  %v1129_v48 = vpop.f32.mrb[27].mxu0  ;;  %v1230_v54 = vmax.f32 %v1202_v40, 0.0  ;;  %v1569_v12 = vrot.slane %v1567_v51, 1  ;;  %v9482_v51 = vld [vmem:[%s11690_s3 + $0x110] sm:$0xff]  }
 0x1a5   : > { %v1201_v56 = vadd.f32 %v9897_v63, %v1129_v48  ;;  %v1561_v2 = vrot.slane %v1559_v50, 1  ;;  %8323 = vmatpush3.bf16.msra.mxu1 %v9452_v18  ;;  %v1228_v3 = vmax.f32 %v1200_v43, 0.0  ;;  %v10026_v7 = vsel %vm1994_vm1, %v2008_v9, %v2010_v58  ;;  %v9459_v48 = vld [vmem:[%s11690_s3 + $0x88] sm:$0xff]   ;;  %v9478_v50 = vld [vmem:[#allocation2 + $0x18] sm:$0xff]  }
 0x1a6   : > { %v1231_v60 = vmax.f32 %v1203_v47, 0.0  ;;  %8324 = vmatprep.subr.bf16.mxu1 %v9455_v45  ;;  %v10029_v63 = vsel %vm1994_vm1, %v2010_v58, %v2012_v46  ;;  %v1571_v9 = vshrl.u32 %v10004_v61, 16  ;;  %v9487_v58 = vld [vmem:[%s11690_s3 + $0x120] sm:$0xff]  }
 0x1a7   : > { %v1229_v4 = vmax.f32 %v1201_v56, 0.0  ;;  %v1562_v10 = vsel %vm1494_vm0, %v1557_v62, %v1561_v2  ;;  %v1565_v11 = vor.u32 %v1563_v57, %v1561_v2  ;;  %v9485_v56 = vld [vmem:[%s11690_s3 + $0x118] sm:$0xff]   ;;  %v9481_v57 = vld [vmem:[#allocation2 + $0x28] sm:$0xff]  }
 0x1a8   : > { %v7655_v8 = vpack.c.bf16 %v1231_v60, %v1230_v54  ;;  %8301 = vmatmul.mubr.bf16.gmra.mrb[12].mxu1 %v1562_v10  ;;  %v1573_v23 = vor.u32 %v1571_v9, %v1569_v12  ;;  %v9480_v54 = vld [vmem:[#allocation2 + $0x20] sm:$0xff]   ;;  %v9483_v60 = vld [vmem:[#allocation2 + $0x30] sm:$0xff]   ;;  %v9489_v62 = vld [vmem:[%s11690_s3 + $0x128] sm:$0xff]  }
 0x1a9   : > { %v7650_v13 = vpack.c.bf16 %v1229_v4, %v1228_v3  ;;  %v10032_v14 = vld [vmem:[#allocation2 + $0x58] sm:$0xff]   ;;  %v1570_v15 = vsel %vm1494_vm0, %v1565_v11, %v1569_v12  ;;  %8325 = vmatpush3.bf16.msra.mxu1 %v9455_v45  ;;  %v9492_v3 = vld [vmem:[%s11690_s3 + $0x130] sm:$0xff]   ;;  %v9486_v4 = vld [vmem:[#allocation2 + $0x40] sm:$0xff]  }
 0x1aa   : > { %7729 = vst [vmem:[#allocation2 + $0x68] sm:$0xff] %v7655_v8   ;;  %v10035_v16 = vld [vmem:[#allocation2 + $0x50] sm:$0xff]   ;;  %8304 = vmatprep.mubr.bf16.mxu1 %v1570_v15  ;;  %8326 = vmatprep.subr.bf16.mxu1 %v9457_v6  ;;  %v2016_v18 = vrot.slane %v10032_v14, 1  ;;  %v1583_v21 = vshll.u32 %v10032_v14, 16  ;;  %v1587_v41 = vshrl.u32 %v10032_v14, 16  ;;  %v9484_v2 = vld [vmem:[#allocation2 + $0x38] sm:$0xff]  }
 0x1ab   : > { %7728 = vst [vmem:[#allocation2 + $0x60] sm:$0xff] %v7650_v13   ;;  %v1575_v19 = vshll.u32 %v10035_v16, 16  ;;  %v2014_v22 = vrot.slane %v10035_v16, 1  ;;  %v1579_v26 = vshrl.u32 %v10035_v16, 16  ;;  %v10152_v8 = vld [vmem:[#allocation2 + $0xc] sm:$0xf] }
 0x1ac   : > { %v1585_v38 = vrot.slane %v1583_v21, 1  ;;  %v9498_v11 = vld [vmem:[%s11690_s3 + $0x140] sm:$0xff]   ;;  %v10158_v12 = vld [vmem:[#allocation2 + $0x10] sm:$0xff]   ;;  %v9491_v15 = vld [vmem:[#allocation2 + $0x58] sm:$0xff]  }
 0x1ad   : > { %v1577_v25 = vrot.slane %v1575_v19, 1  ;;  %8327 = vmatpush3.bf16.msra.mxu1 %v9457_v6  ;;  %v10047_v31 = vsel %vm1994_vm1, %v2012_v46, %v2014_v22  ;;  %v10050_v33 = vsel %vm1994_vm1, %v2014_v22, %v2016_v18  ;;  %v9496_v6 = vld [vmem:[%s11690_s3 + $0x138] sm:$0xff]   ;;  %v9490_v13 = vld [vmem:[#allocation2 + $0x50] sm:$0xff]   ;;  %v10163_v21 = vld [vmem:[#allocation2 + $0x20] sm:$0xff]  }
 0x1ae   : > { %8352 = vmatprep.subr.bf16.mxu1 %v9458_v17  ;;  %v1589_v44 = vor.u32 %v1587_v41, %v1585_v38  ;;  %v10172_v41 = vld [vmem:[#allocation2 + $0x30] sm:$0xff]  }
 0x1af   : > { %v1578_v34 = vsel %vm1494_vm0, %v1573_v23, %v1577_v25  ;;  %v1581_v35 = vor.u32 %v1579_v26, %v1577_v25 }
 0x1b0   : > { %8305 = vmatmul.mubr.bf16.gmra.mrb[16].mxu1 %v1578_v34 }
 0x1b1   : > { %v1586_v39 = vsel %vm1494_vm0, %v1581_v35, %v1585_v38  ;;  %v10169_v35 = vld [vmem:[#allocation2 + $0x28] sm:$0xff]  }
 0x1b2   : > { %v9456_v40 = vld [vmem:[#allocation2 + $0x60] ss:$0 sps:$4 sm:$0x11]   ;;  %8308 = vmatprep.mubr.bf16.mxu1 %v1586_v39 }
 0x1b3   : > { %v1591_v37 = vshll.u32 %v9456_v40, 16  ;;  %v2018_v43 = vrot.slane %v9456_v40, 1  ;;  %v9493_v22 = vld [vmem:[#allocation2 + $0x60] sm:$0xff]  }
 0x1b5   : > { %v1593_v45 = vrot.slane %v1591_v37, 1  ;;  %v10056_v46 = vsel %vm1994_vm1, %v2016_v18, %v2018_v43  ;;  %v9500_v43 = vld [vmem:[%s11690_s3 + $0x148] sm:$0xff]  }
 0x1b7   : > { %v1594_v47 = vsel %vm1494_vm0, %v1589_v44, %v1593_v45  ;;  %v2684_v44 = vshll.u32 %v10169_v35, 16 }
 0x1b8   : > { %8309 = vmatmul.mubr.bf16.gmra.mrb[20].mxu1 %v1594_v47  ;;  %v2692_v47 = vshll.u32 %v10172_v41, 16 }
 0x1b9   : > { %8328 = vmatprep.mubr.bf16.mxu1 %v9911_v36  ;;  %v9461_v36 = vld [vmem:[%s11690_s3 + $0x98] sm:$0xff]  }
 0x1c0   : > { %8329 = vmatmul.mubr.bf16.vlgmr.msra.gmra.mrb[0].mxu1 %v9907_v29  ;;  %v9462_v29 = vld [vmem:[%s11690_s3 + $0xa0] sm:$0xff]  }
 0x1c1   : > { %8332 = vmatprep.mubr.bf16.mxu1 %v9926_v0  ;;  %8353 = vmatpush3.bf16.msra.mxu1 %v9458_v17  ;;  %v9463_v0 = vld [vmem:[%s11690_s3 + $0xa8] sm:$0xff]   ;;  %v10161_v17 = vld [vmem:[#allocation2 + $0x18] sm:$0xff]  }
 0x1c2   : > { %8354 = vmatprep.subr.bf16.mxu1 %v9459_v48  ;;  %v2668_v25 = vshll.u32 %v10161_v17, 16  ;;  %v2672_v39 = vshrl.u32 %v10161_v17, 16 }
 0x1c4   : > { %v2670_v34 = vrot.slane %v2668_v25, 1  ;;  %v9517_v25 = vld [vmem:[%s11690_s3 + $0x180] sm:$0xff]  }
 0x1c5   : > { %8355 = vmatpush3.bf16.msra.mxu1 %v9459_v48  ;;  %v2680_v48 = vshrl.u32 %v10163_v21, 16 }
 0x1c6   : > { %8356 = vmatprep.subr.bf16.mxu1 %v9460_v49  ;;  %v2674_v37 = vor.u32 %v2672_v39, %v2670_v34 }
 0x1c8   : > { %8333 = vmatmul.mubr.bf16.gmra.mrb[4].mxu1 %v9923_v59  ;;  %v9464_v59 = vld [vmem:[%s11690_s3 + $0xb0] sm:$0xff]  }
 0x1c9   : > { %8336 = vmatprep.mubr.bf16.mxu1 %v9952_v32  ;;  %8357 = vmatpush3.bf16.msra.mxu1 %v9460_v49  ;;  %v9466_v32 = vld [vmem:[%s11690_s3 + $0xb8] sm:$0xff]   ;;  %v2686_v49 = vrot.slane %v2684_v44, 1 }
 0x1ca   : > { %8358 = vmatprep.subr.bf16.mxu1 %v9461_v36 }
 0x1cd   : > { %8359 = vmatpush3.bf16.msra.mxu1 %v9461_v36  ;;  %v9503_v36 = vld [vmem:[%s11690_s3 + $0x150] sm:$0xff]  }
 0x1ce   : > { %8360 = vmatprep.subr.bf16.mxu1 %v9462_v29 }
 0x1d0   : > { %8337 = vmatmul.mubr.bf16.gmra.mrb[8].mxu1 %v9947_v27  ;;  %v9467_v27 = vld [vmem:[%s11690_s3 + $0xc0] sm:$0xff]  }
 0x1d1   : > { %8340 = vmatprep.mubr.bf16.mxu1 %v9980_v5  ;;  %8361 = vmatpush3.bf16.msra.mxu1 %v9462_v29  ;;  %v9469_v5 = vld [vmem:[%s11690_s3 + $0xd0] sm:$0xff]   ;;  %v10185_v29 = vld [vmem:[#allocation2 + $0x38] sm:$0xff]  }
 0x1d2   : > { %8362 = vmatprep.subr.bf16.mxu1 %v9463_v0 }
 0x1d5   : > { %8363 = vmatpush3.bf16.msra.mxu1 %v9463_v0 }
 0x1d6   : > { %8364 = vmatprep.subr.bf16.mxu1 %v9464_v59 }
 0x1d8   : > { %8341 = vmatmul.mubr.bf16.gmra.mrb[12].mxu1 %v9976_v1  ;;  %v9468_v1 = vld [vmem:[%s11690_s3 + $0xc8] sm:$0xff]  }
 0x1d9   : > { %8344 = vmatprep.mubr.bf16.mxu1 %v10008_v42  ;;  %8365 = vmatpush3.bf16.msra.mxu1 %v9464_v59  ;;  %v9479_v42 = vld [vmem:[%s11690_s3 + $0x108] sm:$0xff]   ;;  %v2688_v59 = vshrl.u32 %v10169_v35, 16 }
 0x1da   : > { %8366 = vmatprep.subr.bf16.mxu1 %v9466_v32 }
 0x1dd   : > { %8367 = vmatpush3.bf16.msra.mxu1 %v9466_v32  ;;  %v2694_v32 = vrot.slane %v2692_v47, 1  ;;  %v2987_v47 = vrot.slane %v10158_v12, 1 }
 0x1de   : > { %8392 = vmatprep.subr.bf16.mxu1 %v9467_v27 }
 0x1e0   : > { %8345 = vmatmul.mubr.bf16.gmra.mrb[16].mxu1 %v10004_v61  ;;  %v9476_v61 = vld [vmem:[#allocation2 + $0x10] sm:$0xff]  }
 0x1e1   : > { %8348 = vmatprep.mubr.bf16.mxu1 %v10035_v16  ;;  %v2660_v16 = vshll.u32 %v10158_v12, 16 }
 0x1e3   : > { %v2662_v19 = vrot.slane %v2660_v16, 1  ;;  %v9516_v16 = vld [vmem:[%s11690_s3 + $0x178] sm:$0xff]  }
 0x1e8   : > { %8349 = vmatmul.mubr.bf16.gmra.mrb[20].mxu1 %v10032_v14 }
 0x1e9   : > { %8368 = vmatprep.mubr.bf16.mxu1 %v9921_v55  ;;  %v9470_v55 = vld [vmem:[%s11690_s3 + $0xd8] sm:$0xff]  }
 0x1f0   : > { %8369 = vmatmul.mubr.bf16.vlgmr.msra.gmra.mrb[0].mxu1 %v9941_v20  ;;  %v9471_v20 = vld [vmem:[%s11690_s3 + $0xe0] sm:$0xff]  }
 0x1f1   : > { %8372 = vmatprep.mubr.bf16.mxu1 %v9945_v24  ;;  %8393 = vmatpush3.bf16.msra.mxu1 %v9467_v27  ;;  %v9472_v24 = vld [vmem:[%s11690_s3 + $0xe8] sm:$0xff]   ;;  %v10188_v27 = vld [vmem:[#allocation2 + $0x40] sm:$0xff]  }
 0x1f2   : > { %8394 = vmatprep.subr.bf16.mxu1 %v9468_v1 }
 0x1f5   : > { %8395 = vmatpush3.bf16.msra.mxu1 %v9468_v1  ;;  %v2690_v1 = vor.u32 %v2688_v59, %v2686_v49  ;;  %v2989_v59 = vrot.slane %v10161_v17, 1  ;;  %v2993_v17 = vrot.slane %v10169_v35, 1  ;;  %v9521_v35 = vld [vmem:[%s11690_s3 + $0x1a0] sm:$0xff]  }
 0x1f6   : > { %8396 = vmatprep.subr.bf16.mxu1 %v9469_v5 }
 0x1f8   : > { %8373 = vmatmul.mubr.bf16.gmra.mrb[4].mxu1 %v9970_v52  ;;  %v9473_v52 = vld [vmem:[%s11690_s3 + $0xf0] sm:$0xff]  }
 0x1f9   : > { %8376 = vmatprep.mubr.bf16.mxu1 %v9973_v53  ;;  %8397 = vmatpush3.bf16.msra.mxu1 %v9469_v5  ;;  %v9475_v53 = vld [vmem:[%s11690_s3 + $0xf8] sm:$0xff]   ;;  %v2700_v5 = vshll.u32 %v10185_v29, 16 }
 0x1fa   : > { %8398 = vmatprep.subr.bf16.mxu1 %v9470_v55 }
 0x1fd   : > { %8399 = vmatpush3.bf16.msra.mxu1 %v9470_v55  ;;  %v9506_v55 = vld [vmem:[%s11690_s3 + $0x158] sm:$0xff]  }
 0x1fe   : > { %8400 = vmatprep.subr.bf16.mxu1 %v9471_v20 }
 0x200   : > { %8377 = vmatmul.mubr.bf16.gmra.mrb[8].mxu1 %v9998_v28  ;;  %v9477_v28 = vld [vmem:[%s11690_s3 + $0x100] sm:$0xff]  }
 0x201   : > { %8380 = vmatprep.mubr.bf16.mxu1 %v10001_v30  ;;  %8401 = vmatpush3.bf16.msra.mxu1 %v9471_v20  ;;  %v9474_v30 = vld [vmem:[#allocation2 + $0x8] sm:$0xff]  }
 0x202   : > { %8402 = vmatprep.subr.bf16.mxu1 %v9472_v24 }
 0x205   : > { %8403 = vmatpush3.bf16.msra.mxu1 %v9472_v24  ;;  %v2695_v24 = vsel %vm1494_vm0, %v2690_v1, %v2694_v32  ;;  %v9518_v1 = vld [vmem:[%s11690_s3 + $0x188] sm:$0xff]  }
 0x206   : > { %8404 = vmatprep.subr.bf16.mxu1 %v9473_v52 }
 0x208   : > { %8381 = vmatmul.mubr.bf16.gmra.mrb[12].mxu1 %v10026_v7  ;;  %v9488_v7 = vld [vmem:[#allocation2 + $0x48] sm:$0xff]  }
 0x209   : > { %8384 = vmatprep.mubr.bf16.mxu1 %v10029_v63  ;;  %8405 = vmatpush3.bf16.msra.mxu1 %v9473_v52  ;;  %v2547_v63 = vld [vmem:[#allocation2 + $0x8] sm:$0xf]  ;;  %v2708_v52 = vshll.u32 %v10188_v27, 16 }
 0x20a   : > { %8406 = vmatprep.subr.bf16.mxu1 %v9475_v53  ;;  %v7111_v10 = vcombine.low %v2547_v63, %v10152_v8 }
 0x20c   : > { %v2655_v14 = vshll.u32 %v7111_v10, 16  ;;  %v2653_v18 = vshrl.u32 %v7111_v10, 16 }
 0x20d   : > { %8407 = vmatpush3.bf16.msra.mxu1 %v9475_v53  ;;  %v2696_v53 = vshrl.u32 %v10172_v41, 16 }
 0x20e   : > { %8432 = vmatprep.subr.bf16.mxu1 %v9477_v28  ;;  %v2657_v9 = vrot.slane %v2655_v14, 1 }
 0x210   : > { %8385 = vmatmul.mubr.bf16.gmra.mrb[16].mxu1 %v10047_v31  ;;  %v2658_v23 = vor.u32 %v2657_v9, %v2653_v18  ;;  %v2676_v31 = vshll.u32 %v10163_v21, 16 }
 0x211   : > { %8388 = vmatprep.mubr.bf16.mxu1 %v10050_v33  ;;  %v2664_v33 = vshrl.u32 %v10158_v12, 16 }
 0x212   : > { %v2663_v26 = vsel %vm1494_vm0, %v2658_v23, %v2662_v19  ;;  %v2678_v40 = vrot.slane %v2676_v31, 1 }
 0x213   : > { %v2666_v38 = vor.u32 %v2664_v33, %v2662_v19 }
 0x214   : > { %v2682_v0 = vor.u32 %v2680_v48, %v2678_v40 }
 0x215   : > { %v2671_v45 = vsel %vm1494_vm0, %v2666_v38, %v2670_v34  ;;  %v10234_v34 = vld [vmem:[#allocation2 + $0x68] ss:$0 sps:$4 sm:$0x11]  }
 0x216   : > { %v2687_v20 = vsel %vm1494_vm0, %v2682_v0, %v2686_v49  ;;  %v2748_v44 = vshll.u32 %v10234_v34, 16 }
 0x218   : > { %8389 = vmatmul.mubr.bf16.gmra.mrb[20].mxu1 %v10056_v46  ;;  %v2679_v46 = vsel %vm1494_vm0, %v2674_v37, %v2678_v40  ;;  %v2965_v40 = vld [vmem:[#allocation2 + $0x8] sm:$0xe]  ;;  %v2750_v48 = vrot.slane %v2748_v44, 1  ;;  %v9540_v44 = vld [vmem:[#allocation2 + $0x58] sm:$0xff]  }
 0x219   : > { %8408 = vmatprep.mubr.bf16.mxu1 %v9474_v30  ;;  %v10198_v30 = vld [vmem:[#allocation2 + $0x48] sm:$0xff]  }
 0x21a   : > { %v2720_v10 = vshrl.u32 %v10198_v30, 16 }
 0x220   : > { %8409 = vmatmul.mubr.bf16.vlgmr.msra.gmra.mrb[0].mxu1 %v9476_v61  ;;  %v9508_v61 = vld [vmem:[%s11690_s3 + $0x160] sm:$0xff]  }
 0x221   : > { %8412 = vmatprep.mubr.bf16.mxu1 %v9478_v50  ;;  %8433 = vmatpush3.bf16.msra.mxu1 %v9477_v28  ;;  %v2702_v28 = vrot.slane %v2700_v5, 1  ;;  %v2704_v50 = vshrl.u32 %v10185_v29, 16  ;;  %v9519_v5 = vld [vmem:[%s11690_s3 + $0x190] sm:$0xff]  }
 0x222   : > { %8434 = vmatprep.subr.bf16.mxu1 %v9479_v42 }
 0x225   : > { %8435 = vmatpush3.bf16.msra.mxu1 %v9479_v42  ;;  %v2698_v42 = vor.u32 %v2696_v53, %v2694_v32  ;;  %v2991_v32 = vrot.slane %v10163_v21, 1  ;;  %v2995_v21 = vrot.slane %v10172_v41, 1  ;;  %v2997_v41 = vrot.slane %v10185_v29, 1  ;;  %v9522_v53 = vld [vmem:[%s11690_s3 + $0x1a8] sm:$0xff]   ;;  %v9523_v29 = vld [vmem:[%s11690_s3 + $0x1b0] sm:$0xff]  }
 0x226   : > { %8436 = vmatprep.subr.bf16.mxu1 %v9482_v51 }
 0x227   : > { %v2992_v12 = vsel %vm1994_vm1, %v2989_v59, %v2991_v32 }
 0x228   : > { %8413 = vmatmul.mubr.bf16.gmra.mrb[4].mxu1 %v9480_v54  ;;  %v10204_v54 = vld [vmem:[#allocation2 + $0x50] sm:$0xff]  }
 0x229   : > { %8416 = vmatprep.mubr.bf16.mxu1 %v9481_v57  ;;  %8437 = vmatpush3.bf16.msra.mxu1 %v9482_v51  ;;  %v2710_v51 = vrot.slane %v2708_v52, 1  ;;  %v2716_v57 = vshll.u32 %v10198_v30, 16  ;;  %v2999_v52 = vrot.slane %v10188_v27, 1 }
 0x22a   : > { %8438 = vmatprep.subr.bf16.mxu1 %v9485_v56 }
 0x22d   : > { %8439 = vmatpush3.bf16.msra.mxu1 %v9485_v56  ;;  %v2706_v56 = vor.u32 %v2704_v50, %v2702_v28  ;;  %v9525_v50 = vld [vmem:[%s11690_s3 + $0x1b8] sm:$0xff]  }
 0x22e   : > { %8440 = vmatprep.subr.bf16.mxu1 %v9487_v58 }
 0x230   : > { %8417 = vmatmul.mubr.bf16.gmra.mrb[8].mxu1 %v9483_v60  ;;  %v2703_v60 = vsel %vm1494_vm0, %v2698_v42, %v2702_v28  ;;  %v2998_v28 = vsel %vm1994_vm1, %v2995_v21, %v2997_v41  ;;  %v3003_v42 = vrot.slane %v10204_v54, 1 }
 0x231   : > { %8420 = vmatprep.mubr.bf16.mxu1 %v9484_v2  ;;  %8441 = vmatpush3.bf16.msra.mxu1 %v9487_v58  ;;  %v9510_v58 = vld [vmem:[%s11690_s3 + $0x168] sm:$0xff]   ;;  %v2724_v2 = vshll.u32 %v10204_v54, 16 }
 0x232   : > { %8442 = vmatprep.subr.bf16.mxu1 %v9489_v62 }
 0x235   : > { %8443 = vmatpush3.bf16.msra.mxu1 %v9489_v62  ;;  %v2711_v62 = vsel %vm1494_vm0, %v2706_v56, %v2710_v51 }
 0x236   : > { %8444 = vmatprep.subr.bf16.mxu1 %v9492_v3 }
 0x238   : > { %8421 = vmatmul.mubr.bf16.gmra.mrb[12].mxu1 %v9486_v4  ;;  %v2718_v4 = vrot.slane %v2716_v57, 1 }
 0x239   : > { %8424 = vmatprep.mubr.bf16.mxu1 %v9488_v7  ;;  %8445 = vmatpush3.bf16.msra.mxu1 %v9492_v3  ;;  %v2712_v3 = vshrl.u32 %v10188_v27, 16  ;;  %v9513_v7 = vld [vmem:[%s11690_s3 + $0x170] sm:$0xff]   ;;  %v3001_v27 = vrot.slane %v10198_v30, 1  ;;  %v9527_v30 = vld [vmem:[%s11690_s3 + $0x1c0] sm:$0xff]  }
 0x23a   : > { %8446 = vmatprep.subr.bf16.mxu1 %v9496_v6  ;;  %v2722_v14 = vor.u32 %v2720_v10, %v2718_v4  ;;  %v9530_v10 = vld [vmem:[#allocation2 + $0x28] sm:$0xff]  }
 0x23b   : > { %v2714_v63 = vor.u32 %v2712_v3, %v2710_v51  ;;  %v3002_v51 = vsel %vm1994_vm1, %v2999_v52, %v3001_v27  ;;  %v3004_v56 = vsel %vm1994_vm1, %v3001_v27, %v3003_v42  ;;  %v9524_v3 = vld [vmem:[#allocation2 + $0x10] sm:$0xff]  }
 0x23d   : > { %8447 = vmatpush3.bf16.msra.mxu1 %v9496_v6  ;;  %v10214_v6 = vld [vmem:[#allocation2 + $0x58] sm:$0xff]   ;;  %v2719_v9 = vsel %vm1494_vm0, %v2714_v63, %v2718_v4  ;;  %v9532_v63 = vld [vmem:[%s11690_s3 + $0x1d0] sm:$0xff]  }
 0x23e   : > { %8472 = vmatprep.subr.bf16.mxu1 %v9498_v11  ;;  %v2736_v31 = vshrl.u32 %v10214_v6, 16  ;;  %v9526_v4 = vld [vmem:[#allocation2 + $0x18] sm:$0xff]  }
 0x240   : > { %8425 = vmatmul.mubr.bf16.gmra.mrb[16].mxu1 %v9490_v13  ;;  %v10220_v13 = vld [vmem:[#allocation2 + $0x60] sm:$0xff]  }
 0x241   : > { %8428 = vmatprep.mubr.bf16.mxu1 %v9491_v15  ;;  %v2732_v15 = vshll.u32 %v10214_v6, 16  ;;  %v2740_v19 = vshll.u32 %v10220_v13, 16  ;;  %v3007_v57 = vrot.slane %v10220_v13, 1 }
 0x243   : > { %v2734_v23 = vrot.slane %v2732_v15, 1  ;;  %v2742_v33 = vrot.slane %v2740_v19, 1  ;;  %v9537_v15 = vld [vmem:[%s11690_s3 + $0x1e0] sm:$0xff]   ;;  %v9539_v19 = vld [vmem:[%s11690_s3 + $0x1e8] sm:$0xff]  }
 0x245   : > { %v2738_v38 = vor.u32 %v2736_v31, %v2734_v23  ;;  %v3538_v31 = vld [vmem:[#allocation2 + $0x10] sm:$0xf] }
 0x247   : > { %v2743_v37 = vsel %vm1494_vm0, %v2738_v38, %v2742_v33  ;;  %v9546_v38 = vld [vmem:[%s11690_s3 + $0x1f8] sm:$0xff]  }
 0x248   : > { %8429 = vmatmul.mubr.bf16.gmra.mrb[20].mxu1 %v9493_v22  ;;  %v2728_v22 = vshrl.u32 %v10204_v54, 16  ;;  %v3005_v54 = vrot.slane %v10214_v6, 1  ;;  %v9529_v6 = vld [vmem:[%s11690_s3 + $0x1c8] sm:$0xff]  }
 0x249   : > { %8448 = vmatprep.mubr.bf16.mxu1 %v2663_v26 }
 0x250   : > { %8449 = vmatmul.mubr.bf16.vlgmr.msra.gmra.mrb[0].mxu1 %v2671_v45  ;;  %v7148_v45 = vcombine.low %v2965_v40, %v10152_v8  ;;  %v2990_v8 = vsel %vm1994_vm1, %v2987_v47, %v2989_v59 }
 0x251   : > { %8452 = vmatprep.mubr.bf16.mxu1 %v2679_v46  ;;  %8473 = vmatpush3.bf16.msra.mxu1 %v9498_v11  ;;  %v2726_v11 = vrot.slane %v2724_v2, 1 }
 0x252   : > { %8474 = vmatprep.subr.bf16.mxu1 %v9500_v43  ;;  %v2986_v49 = vrot.slane %v7148_v45, 1  ;;  %v10334_v45 = vld [vmem:[#allocation2 + $0x18] sm:$0xff]  }
 0x253   : > { %v2727_v18 = vsel %vm1494_vm0, %v2722_v14, %v2726_v11  ;;  %v2730_v26 = vor.u32 %v2728_v22, %v2726_v11  ;;  %v9535_v11 = vld [vmem:[%s11690_s3 + $0x1d8] sm:$0xff]   ;;  %v9567_v14 = vld [vmem:[%s11692_s5 + $0x40] sm:$0xff]  }
 0x254   : > { %v2988_v0 = vsel %vm1994_vm1, %v2986_v49, %v2987_v47  ;;  %v9534_v22 = vld [vmem:[#allocation2 + $0x40] sm:$0xff]  }
 0x255   : > { %8475 = vmatpush3.bf16.msra.mxu1 %v9500_v43  ;;  %v2735_v39 = vsel %vm1494_vm0, %v2730_v26, %v2734_v23  ;;  %v2744_v43 = vshrl.u32 %v10220_v13, 16  ;;  %v9531_v13 = vld [vmem:[#allocation2 + $0x30] sm:$0xff]   ;;  %v9570_v26 = vld [vmem:[%s11692_s5 + $0x58] sm:$0xff]  }
 0x256   : > { %8476 = vmatprep.subr.bf16.mxu1 %v9503_v36  ;;  %v9569_v23 = vld [vmem:[%s11692_s5 + $0x50] sm:$0xff]  }
 0x257   : > { %v2746_v46 = vor.u32 %v2744_v43, %v2742_v33  ;;  %v10324_v33 = vld [vmem:[#allocation2 + $0x14] sm:$0xf] }
 0x258   : > { %8453 = vmatmul.mubr.bf16.gmra.mrb[4].mxu1 %v2687_v20  ;;  %v2994_v20 = vsel %vm1994_vm1, %v2991_v32, %v2993_v17  ;;  %v7209_v40 = vcombine.low %v3538_v31, %v10324_v33  ;;  %v9543_v32 = vld [vmem:[#allocation2 + $0x68] sm:$0xff]   ;;  %v10388_v31 = vld [vmem:[#allocation2 + $0x60] sm:$0xff]  }
 0x259   : > { %8456 = vmatprep.mubr.bf16.mxu1 %v2695_v24  ;;  %8477 = vmatpush3.bf16.msra.mxu1 %v9503_v36  ;;  %v2751_v36 = vsel %vm1494_vm0, %v2746_v46, %v2750_v48  ;;  %v2996_v24 = vsel %vm1994_vm1, %v2993_v17, %v2995_v21  ;;  %v9541_v46 = vld [vmem:[#allocation2 + $0x60] sm:$0xff]   ;;  %v10343_v17 = vld [vmem:[#allocation2 + $0x30] sm:$0xff]  }
 0x25a   : > { %8478 = vmatprep.subr.bf16.mxu1 %v9506_v55  ;;  %v3646_v43 = vshll.u32 %v7209_v40, 16  ;;  %v10336_v48 = vld [vmem:[#allocation2 + $0x20] sm:$0xff]   ;;  %v3644_v49 = vshrl.u32 %v7209_v40, 16 }
 0x25b   : > { %v3659_v59 = vshll.u32 %v10336_v48, 16  ;;  %v3663_v21 = vshrl.u32 %v10336_v48, 16 }
 0x25c   : > { %v3648_v47 = vrot.slane %v3646_v43, 1  ;;  %v3723_v43 = vshll.u32 %v10388_v31, 16 }
 0x25d   : > { %8479 = vmatpush3.bf16.msra.mxu1 %v9506_v55  ;;  %v9520_v55 = vld [vmem:[%s11690_s3 + $0x198] sm:$0xff]  }
 0x25e   : > { %8480 = vmatprep.subr.bf16.mxu1 %v9508_v61 }
 0x260   : > { %8457 = vmatmul.mubr.bf16.gmra.mrb[8].mxu1 %v2703_v60  ;;  %v3008_v60 = vsel %vm1994_vm1, %v3005_v54, %v3007_v57 }
 0x261   : > { %8460 = vmatprep.mubr.bf16.mxu1 %v2711_v62  ;;  %8481 = vmatpush3.bf16.msra.mxu1 %v9508_v61  ;;  %v3000_v61 = vsel %vm1994_vm1, %v2997_v41, %v2999_v52  ;;  %v3009_v62 = vrot.slane %v10234_v34, 1  ;;  %v9536_v34 = vld [vmem:[#allocation2 + $0x48] sm:$0xff]  }
 0x262   : > { %8482 = vmatprep.subr.bf16.mxu1 %v9510_v58 }
 0x263   : > { %v3010_v2 = vsel %vm1994_vm1, %v3007_v57, %v3009_v62  ;;  %v10365_v62 = vld [vmem:[#allocation2 + $0x48] sm:$0xff]  }
 0x264   : > { %v3703_v40 = vshrl.u32 %v10365_v62, 16 }
 0x265   : > { %8483 = vmatpush3.bf16.msra.mxu1 %v9510_v58  ;;  %v3006_v58 = vsel %vm1994_vm1, %v3003_v42, %v3005_v54  ;;  %v10356_v42 = vld [vmem:[#allocation2 + $0x40] sm:$0xff]  }
 0x266   : > { %8484 = vmatprep.subr.bf16.mxu1 %v9513_v7  ;;  %v3691_v57 = vshll.u32 %v10356_v42, 16 }
 0x268   : > { %8461 = vmatmul.mubr.bf16.gmra.mrb[12].mxu1 %v2719_v9  ;;  %v9568_v9 = vld [vmem:[%s11692_s5 + $0x48] sm:$0xff]  }
 0x269   : > { %8464 = vmatprep.mubr.bf16.mxu1 %v2727_v18  ;;  %8485 = vmatpush3.bf16.msra.mxu1 %v9513_v7  ;;  %v9528_v7 = vld [vmem:[#allocation2 + $0x20] sm:$0xff]   ;;  %v9533_v18 = vld [vmem:[#allocation2 + $0x38] sm:$0xff]  }
 0x26a   : > { %8486 = vmatprep.subr.bf16.mxu1 %v9516_v16 }
 0x26d   : > { %8487 = vmatpush3.bf16.msra.mxu1 %v9516_v16  ;;  %v11695_v16 = vmov 0.0  }
 0x26e   : > { %8512 = vmatprep.subr.bf16.mxu1 %v9517_v25  ;;  %8632 = vmatprep.subr.bf16.mxu0 %v11695_v16 }
 0x26f   : > { %8633 = vmatpush3.bf16.msra.mxu0 %v9567_v14  ;;  %8648 = vmatprep.mubr.msk.bf16.mxu0 %vm9702_vm2, %v11695_v16 }
 0x270   : > { %8465 = vmatmul.mubr.bf16.gmra.mrb[16].mxu1 %v2735_v39  ;;  %8634 = vmatprep.subr.bf16.mxu0 %v11695_v16  ;;  %v9538_v39 = vld [vmem:[#allocation2 + $0x50] sm:$0xff]  }
 0x271   : > { %8468 = vmatprep.mubr.bf16.mxu1 %v2743_v37  ;;  %v9548_v37 = vld [vmem:[%s11690_s3 + $0x200] sm:$0xff]  }
 0x273   : > { %8635 = vmatpush3.bf16.msra.mxu0 %v9568_v9 }
 0x274   : > { %8636 = vmatprep.subr.bf16.mxu0 %v11695_v16 }
 0x277   : > { %8637 = vmatpush3.bf16.msra.mxu0 %v9569_v23 }
 0x278   : > { %8469 = vmatmul.mubr.bf16.gmra.mrb[20].mxu1 %v2751_v36  ;;  %8638 = vmatprep.subr.bf16.mxu0 %v11695_v16  ;;  %v3651_v36 = vshll.u32 %v10334_v45, 16 }
 0x279   : > { %8488 = vmatprep.mubr.bf16.mxu1 %v2988_v0  ;;  %v3649_v0 = vor.u32 %v3648_v47, %v3644_v49  ;;  %v10397_v47 = vld [vmem:[#allocation2 + $0x68] sm:$0xff]   ;;  %v9566_v49 = vld [vmem:[%s11690_s3 + $0x238] sm:$0xff]  }
 0x27b   : > { %8639 = vmatpush3.bf16.msra.mxu0 %v9570_v26 }
 0x27c   : > { %8640 = vmatprep.subr.bf16.mxu0 %v11695_v16 }
 0x280   : > { %8489 = vmatmul.mubr.bf16.vlgmr.msra.gmra.mrb[0].mxu1 %v2990_v8  ;;  %v10340_v8 = vld [vmem:[#allocation2 + $0x28] sm:$0xff]  }
 0x281   : > { %8492 = vmatprep.mubr.bf16.mxu1 %v2992_v12  ;;  %8513 = vmatpush3.bf16.msra.mxu1 %v9517_v25  ;;  %v9542_v25 = vld [vmem:[%s11690_s3 + $0x1f0] sm:$0xff]  }
 0x282   : > { %8514 = vmatprep.subr.bf16.mxu1 %v9518_v1 }
 0x285   : > { %8515 = vmatpush3.bf16.msra.mxu1 %v9518_v1  ;;  %v3653_v1 = vrot.slane %v3651_v36, 1 }
 0x286   : > { %8516 = vmatprep.subr.bf16.mxu1 %v9519_v5 }
 0x287   : > { %v3654_v12 = vsel %vm1494_vm0, %v3649_v0, %v3653_v1 }
 0x288   : > { %8493 = vmatmul.mubr.bf16.gmra.mrb[4].mxu1 %v2994_v20  ;;  %v3655_v20 = vshrl.u32 %v10334_v45, 16 }
 0x289   : > { %8496 = vmatprep.mubr.bf16.mxu1 %v2996_v24  ;;  %8517 = vmatpush3.bf16.msra.mxu1 %v9519_v5  ;;  %v3661_v5 = vrot.slane %v3659_v59, 1  ;;  %v3725_v59 = vrot.slane %v3723_v43, 1 }
 0x28a   : > { %8518 = vmatprep.subr.bf16.mxu1 %v9520_v55  ;;  %v3657_v41 = vor.u32 %v3655_v20, %v3653_v1  ;;  %v3731_v1 = vshll.u32 %v10397_v47, 16  ;;  %v3956_v20 = vld [vmem:[#allocation2 + $0x10] sm:$0xe] }
 0x28b   : > { %v3665_v24 = vor.u32 %v3663_v21, %v3661_v5 }
 0x28d   : > { %8519 = vmatpush3.bf16.msra.mxu1 %v9520_v55  ;;  %v3667_v55 = vshll.u32 %v10340_v8, 16 }
 0x28e   : > { %8520 = vmatprep.subr.bf16.mxu1 %v9521_v35 }
 0x28f   : > { %v3669_v52 = vrot.slane %v3667_v55, 1  ;;  %v9564_v55 = vld [vmem:[#allocation2 + $0x70] ss:$0 sps:$4 sm:$0x11]  }
 0x290   : > { %8497 = vmatmul.mubr.bf16.gmra.mrb[8].mxu1 %v2998_v28  ;;  %v10352_v28 = vld [vmem:[#allocation2 + $0x38] sm:$0xff]  }
 0x291   : > { %8500 = vmatprep.mubr.bf16.mxu1 %v3000_v61  ;;  %8521 = vmatpush3.bf16.msra.mxu1 %v9521_v35  ;;  %v3675_v35 = vshll.u32 %v10343_v17, 16  ;;  %v3662_v61 = vsel %vm1494_vm0, %v3657_v41, %v3661_v5  ;;  %v3739_v41 = vshll.u32 %v9564_v55, 16 }
 0x292   : > { %8522 = vmatprep.subr.bf16.mxu1 %v9522_v53 }
 0x293   : > { %v3677_v27 = vrot.slane %v3675_v35, 1 }
 0x295   : > { %8523 = vmatpush3.bf16.msra.mxu1 %v9522_v53  ;;  %v9550_v53 = vld [vmem:[%s11690_s3 + $0x208] sm:$0xff]  }
 0x296   : > { %8524 = vmatprep.subr.bf16.mxu1 %v9523_v29 }
 0x298   : > { %8501 = vmatmul.mubr.bf16.gmra.mrb[12].mxu1 %v3002_v51  ;;  %v3683_v51 = vshll.u32 %v10352_v28, 16 }
 0x299   : > { %8504 = vmatprep.mubr.bf16.mxu1 %v3004_v56  ;;  %8525 = vmatpush3.bf16.msra.mxu1 %v9523_v29  ;;  %v3670_v29 = vsel %vm1494_vm0, %v3665_v24, %v3669_v52  ;;  %v9553_v56 = vld [vmem:[%s11690_s3 + $0x210] sm:$0xff]   ;;  %v3733_v24 = vrot.slane %v3731_v1, 1 }
 0x29a   : > { %8526 = vmatprep.subr.bf16.mxu1 %v9525_v50 }
 0x29d   : > { %8527 = vmatpush3.bf16.msra.mxu1 %v9525_v50  ;;  %v3679_v50 = vshrl.u32 %v10343_v17, 16 }
 0x29e   : > { %8552 = vmatprep.subr.bf16.mxu1 %v9527_v30 }
 0x29f   : > { %v3681_v54 = vor.u32 %v3679_v50, %v3677_v27 }
 0x2a0   : > { %8505 = vmatmul.mubr.bf16.gmra.mrb[16].mxu1 %v3006_v58 }
 0x2a1   : > { %8508 = vmatprep.mubr.bf16.mxu1 %v3008_v60  ;;  %v3685_v60 = vrot.slane %v3683_v51, 1  ;;  %v3978_v51 = vrot.slane %v10334_v45, 1  ;;  %v3986_v45 = vrot.slane %v10352_v28, 1 }
 0x2a8   : > { %8509 = vmatmul.mubr.bf16.gmra.mrb[20].mxu1 %v3010_v2  ;;  %v9556_v2 = vld [vmem:[%s11690_s3 + $0x218] sm:$0xff]  }
 0x2a9   : > { %8528 = vmatprep.mubr.bf16.mxu1 %v9524_v3 }
 0x2b0   : > { %8529 = vmatmul.mubr.bf16.vlgmr.msra.gmra.mrb[0].mxu1 %v9526_v4  ;;  %v3686_v4 = vsel %vm1494_vm0, %v3681_v54, %v3685_v60  ;;  %v3980_v54 = vrot.slane %v10336_v48, 1  ;;  %v3988_v48 = vrot.slane %v10356_v42, 1 }
 0x2b1   : > { %8532 = vmatprep.mubr.bf16.mxu1 %v9528_v7  ;;  %8553 = vmatpush3.bf16.msra.mxu1 %v9527_v30  ;;  %v3671_v30 = vshrl.u32 %v10340_v8, 16  ;;  %v10372_v7 = vld [vmem:[#allocation2 + $0x50] sm:$0xff]  }
 0x2b2   : > { %8554 = vmatprep.subr.bf16.mxu1 %v9529_v6 }
 0x2b3   : > { %v3673_v58 = vor.u32 %v3671_v30, %v3669_v52 }
 0x2b5   : > { %8555 = vmatpush3.bf16.msra.mxu1 %v9529_v6  ;;  %v3678_v3 = vsel %vm1494_vm0, %v3673_v58, %v3677_v27  ;;  %v3693_v6 = vrot.slane %v3691_v57, 1  ;;  %v3741_v27 = vrot.slane %v3739_v41, 1  ;;  %v3982_v57 = vrot.slane %v10340_v8, 1 }
 0x2b6   : > { %8556 = vmatprep.subr.bf16.mxu1 %v9532_v63  ;;  %v3990_v8 = vrot.slane %v10365_v62, 1 }
 0x2b7   : > { %v3983_v58 = vsel %vm1994_vm1, %v3980_v54, %v3982_v57 }
 0x2b8   : > { %8533 = vmatmul.mubr.bf16.gmra.mrb[4].mxu1 %v9530_v10  ;;  %v3699_v10 = vshll.u32 %v10365_v62, 16  ;;  %v3998_v62 = vrot.slane %v10397_v47, 1 }
 0x2b9   : > { %8536 = vmatprep.mubr.bf16.mxu1 %v9531_v13  ;;  %8557 = vmatpush3.bf16.msra.mxu1 %v9532_v63  ;;  %v3695_v63 = vshrl.u32 %v10356_v42, 16  ;;  %v3687_v13 = vshrl.u32 %v10352_v28, 16  ;;  %v3996_v42 = vrot.slane %v10388_v31, 1 }
 0x2ba   : > { %8558 = vmatprep.subr.bf16.mxu1 %v9535_v11 }
 0x2bb   : > { %v3697_v14 = vor.u32 %v3695_v63, %v3693_v6  ;;  %v3689_v9 = vor.u32 %v3687_v13, %v3685_v60  ;;  %v3984_v60 = vrot.slane %v10343_v17, 1  ;;  %v3992_v17 = vrot.slane %v10372_v7, 1 }
 0x2bc   : > { %v3999_v13 = vsel %vm1994_vm1, %v3996_v42, %v3998_v62 }
 0x2bd   : > { %8559 = vmatpush3.bf16.msra.mxu1 %v9535_v11  ;;  %v9558_v11 = vld [vmem:[%s11690_s3 + $0x220] sm:$0xff]   ;;  %v3694_v23 = vsel %vm1494_vm0, %v3689_v9, %v3693_v6  ;;  %v3991_v6 = vsel %vm1994_vm1, %v3988_v48, %v3990_v8  ;;  %v3993_v63 = vsel %vm1994_vm1, %v3990_v8, %v3992_v17 }
 0x2be   : > { %8560 = vmatprep.subr.bf16.mxu1 %v9537_v15  ;;  %v9572_v9 = vld [vmem:[%s11692_s5 + $0x100] sm:$0xff]  }
 0x2c0   : > { %8537 = vmatmul.mubr.bf16.gmra.mrb[8].mxu1 %v9533_v18  ;;  %v3701_v18 = vrot.slane %v3699_v10, 1 }
 0x2c1   : > { %8540 = vmatprep.mubr.bf16.mxu1 %v9534_v22  ;;  %8561 = vmatpush3.bf16.msra.mxu1 %v9537_v15  ;;  %v3707_v15 = vshll.u32 %v10372_v7, 16  ;;  %v9560_v22 = vld [vmem:[%s11690_s3 + $0x228] sm:$0xff]  }
 0x2c2   : > { %8562 = vmatprep.subr.bf16.mxu1 %v9539_v19 }
 0x2c3   : > { %v3709_v26 = vrot.slane %v3707_v15, 1  ;;  %v9571_v15 = vld [vmem:[%s11692_s5 + $0x60] sm:$0xff]  }
 0x2c4   : > { %8641 = vmatpush3.bf16.msra.mxu0 %v9571_v15 }
 0x2c5   : > { %8563 = vmatpush3.bf16.msra.mxu1 %v9539_v19  ;;  %v10381_v19 = vld [vmem:[#allocation2 + $0x58] sm:$0xff]   ;;  %8642 = vmatprep.subr.bf16.mxu0 %v11695_v16 }
 0x2c6   : > { %8564 = vmatprep.subr.bf16.mxu1 %v9542_v25  ;;  %v3994_v28 = vrot.slane %v10381_v19, 1 }
 0x2c8   : > { %8541 = vmatmul.mubr.bf16.gmra.mrb[12].mxu1 %v9536_v34  ;;  %v3711_v34 = vshrl.u32 %v10372_v7, 16  ;;  %v3995_v10 = vsel %vm1994_vm1, %v3992_v17, %v3994_v28 }
 0x2c9   : > { %8544 = vmatprep.mubr.bf16.mxu1 %v9538_v39  ;;  %8565 = vmatpush3.bf16.msra.mxu1 %v9542_v25  ;;  %v3702_v25 = vsel %vm1494_vm0, %v3697_v14, %v3701_v18  ;;  %v9563_v39 = vld [vmem:[%s11690_s3 + $0x230] sm:$0xff]   ;;  %v4000_v14 = vrot.slane %v9564_v55, 1 }
 0x2ca   : > { %8566 = vmatprep.subr.bf16.mxu1 %v9546_v38 }
 0x2cb   : > { %v4001_v7 = vsel %vm1994_vm1, %v3998_v62, %v4000_v14 }
 0x2cd   : > { %8567 = vmatpush3.bf16.msra.mxu1 %v9546_v38  ;;  %v3715_v38 = vshll.u32 %v10381_v19, 16 }
 0x2ce   : > { %8592 = vmatprep.subr.bf16.mxu1 %v9548_v37 }
 0x2d0   : > { %8545 = vmatmul.mubr.bf16.gmra.mrb[16].mxu1 %v9540_v44  ;;  %v3705_v44 = vor.u32 %v3703_v40, %v3701_v18  ;;  %v9574_v18 = vld [vmem:[%s11692_s5 + $0x68] sm:$0xff]   ;;  %v10491_v40 = vld [vmem:[%s11691_s4] ss:$0 sm:$0xff] }
 0x2d1   : > { %8548 = vmatprep.mubr.bf16.mxu1 %v9541_v46  ;;  %v3717_v46 = vrot.slane %v3715_v38, 1  ;;  %8643 = vmatpush3.bf16.msra.mxu0 %v9574_v18  ;;  %v9581_v38 = vld [vmem:[%s11692_s5 + $0x130] sm:$0xff]  }
 0x2d2   : > { %v3710_v36 = vsel %vm1494_vm0, %v3705_v44, %v3709_v26  ;;  %8644 = vmatprep.subr.bf16.mxu0 %v11695_v16 }
 0x2d8   : > { %8549 = vmatmul.mubr.bf16.gmra.mrb[20].mxu1 %v9543_v32  ;;  %v3727_v32 = vshrl.u32 %v10388_v31, 16  ;;  %v9579_v31 = vld [vmem:[%s11692_s5 + $0x78] sm:$0xff]  }
 0x2d9   : > { %8568 = vmatprep.mubr.bf16.mxu1 %v3654_v12  ;;  %v3719_v12 = vshrl.u32 %v10381_v19, 16  ;;  %v9573_v19 = vld [vmem:[%s11692_s5 + $0x108] sm:$0xff]  }
 0x2da   : > { %v3729_v5 = vor.u32 %v3727_v32, %v3725_v59 }
 0x2db   : > { %v3721_v21 = vor.u32 %v3719_v12, %v3717_v46 }
 0x2dc   : > { %v3734_v52 = vsel %vm1494_vm0, %v3729_v5, %v3733_v24 }
 0x2dd   : > { %v3726_v35 = vsel %vm1494_vm0, %v3721_v21, %v3725_v59 }
 0x2e0   : > { %8569 = vmatmul.mubr.bf16.vlgmr.msra.gmra.mrb[0].mxu1 %v3662_v61  ;;  %v3735_v61 = vshrl.u32 %v10397_v47, 16 }
 0x2e1   : > { %8572 = vmatprep.mubr.bf16.mxu1 %v3670_v29  ;;  %8593 = vmatpush3.bf16.msra.mxu1 %v9548_v37  ;;  %v3713_v37 = vor.u32 %v3711_v34, %v3709_v26  ;;  %v9578_v26 = vld [vmem:[%s11692_s5 + $0x120] sm:$0xff]   ;;  %v9580_v34 = vld [vmem:[%s11692_s5 + $0x128] sm:$0xff]  }
 0x2e2   : > { %8594 = vmatprep.subr.bf16.mxu1 %v9550_v53  ;;  %v3737_v29 = vor.u32 %v3735_v61, %v3733_v24 }
 0x2e3   : > { %v3718_v0 = vsel %vm1494_vm0, %v3713_v37, %v3717_v46 }
 0x2e5   : > { %8595 = vmatpush3.bf16.msra.mxu1 %v9550_v53  ;;  %v7246_v53 = vcombine.low %v3956_v20, %v10324_v33  ;;  %v3981_v33 = vsel %vm1994_vm1, %v3978_v51, %v3980_v54 }
 0x2e6   : > { %8596 = vmatprep.subr.bf16.mxu1 %v9553_v56 }
 0x2e7   : > { %v3977_v50 = vrot.slane %v7246_v53, 1 }
 0x2e8   : > { %8573 = vmatmul.mubr.bf16.gmra.mrb[4].mxu1 %v3678_v3  ;;  %v3987_v3 = vsel %vm1994_vm1, %v3984_v60, %v3986_v45 }
 0x2e9   : > { %8576 = vmatprep.mubr.bf16.mxu1 %v3686_v4  ;;  %8597 = vmatpush3.bf16.msra.mxu1 %v9553_v56  ;;  %v3742_v56 = vsel %vm1494_vm0, %v3737_v29, %v3741_v27  ;;  %v3979_v30 = vsel %vm1994_vm1, %v3977_v50, %v3978_v51  ;;  %v3989_v4 = vsel %vm1994_vm1, %v3986_v45, %v3988_v48 }
 0x2ea   : > { %8598 = vmatprep.subr.bf16.mxu1 %v9556_v2 }
 0x2ed   : > { %8599 = vmatpush3.bf16.msra.mxu1 %v9556_v2  ;;  %v3985_v2 = vsel %vm1994_vm1, %v3982_v57, %v3984_v60 }
 0x2ee   : > { %8600 = vmatprep.subr.bf16.mxu1 %v9558_v11 }
 0x2f0   : > { %8577 = vmatmul.mubr.bf16.gmra.mrb[8].mxu1 %v3694_v23  ;;  %v9576_v23 = vld [vmem:[%s11692_s5 + $0x70] sm:$0xff]  }
 0x2f1   : > { %8580 = vmatprep.mubr.bf16.mxu1 %v3702_v25  ;;  %8601 = vmatpush3.bf16.msra.mxu1 %v9558_v11  ;;  %v3997_v11 = vsel %vm1994_vm1, %v3994_v28, %v3996_v42  ;;  %v9577_v25 = vld [vmem:[%s11692_s5 + $0x118] sm:$0xff]  }
 0x2f2   : > { %8602 = vmatprep.subr.bf16.mxu1 %v9560_v22  ;;  %8645 = vmatpush3.bf16.msra.mxu0 %v9576_v23 }
 0x2f3   : > { %8646 = vmatprep.subr.bf16.mxu0 %v11695_v16 }
 0x2f5   : > { %8603 = vmatpush3.bf16.msra.mxu1 %v9560_v22  ;;  %v9575_v22 = vld [vmem:[%s11692_s5 + $0x110] sm:$0xff]  }
 0x2f6   : > { %8604 = vmatprep.subr.bf16.mxu1 %v9563_v39  ;;  %8647 = vmatpush3.bf16.msra.mxu0 %v9579_v31 }
 0x2f7   : > { %8684 = vmatprep.subr.bf16.mxu0 %v11695_v16 }
 0x2f8   : > { %8581 = vmatmul.mubr.bf16.gmra.mrb[12].mxu1 %v3710_v36 }
 0x2f9   : > { %8584 = vmatprep.mubr.bf16.mxu1 %v3718_v0  ;;  %8605 = vmatpush3.bf16.msra.mxu1 %v9563_v39  ;;  %v9585_v39 = vld [vmem:[%s11692_s5 + $0x138] sm:$0xff]  }
 0x2fa   : > { %8606 = vmatprep.subr.bf16.mxu1 %v9566_v49 }
 0x2fd   : > { %8607 = vmatpush3.bf16.msra.mxu1 %v9566_v49 }
 0x2fe   : > { %8840 = vmatprep.subr.bf16.mxu1 %v11695_v16 }
 0x300   : > { %8585 = vmatmul.mubr.bf16.gmra.mrb[16].mxu1 %v3726_v35 }
 0x301   : > { %8588 = vmatprep.mubr.bf16.mxu1 %v3734_v52 }
 0x308   : > { %8589 = vmatmul.mubr.bf16.gmra.mrb[20].mxu1 %v3742_v56 }
 0x309   : > { %8608 = vmatprep.mubr.bf16.mxu1 %v3979_v30 }
 0x310   : > { %8609 = vmatmul.mubr.bf16.vlgmr.msra.gmra.mrb[0].mxu1 %v3981_v33 }
 0x311   : > { %8612 = vmatprep.mubr.bf16.mxu1 %v3983_v58  ;;  %8841 = vmatpush3.bf16.msra.mxu1 %v9572_v9 }
 0x312   : > { %8842 = vmatprep.subr.bf16.mxu1 %v11695_v16 }
 0x315   : > { %8843 = vmatpush3.bf16.msra.mxu1 %v9573_v19 }
 0x316   : > { %8844 = vmatprep.subr.bf16.mxu1 %v11695_v16 }
 0x318   : > { %8613 = vmatmul.mubr.bf16.gmra.mrb[4].mxu1 %v3985_v2 }
 0x319   : > { %8616 = vmatprep.mubr.bf16.mxu1 %v3987_v3  ;;  %8845 = vmatpush3.bf16.msra.mxu1 %v9575_v22  ;;  %v9584_v22 = vld [vmem:[%s11692_s5] sm:$0xff]  }
 0x31a   : > { %8846 = vmatprep.subr.bf16.mxu1 %v11695_v16 }
 0x31d   : > { %8847 = vmatpush3.bf16.msra.mxu1 %v9577_v25 }
 0x31e   : > { %8848 = vmatprep.subr.bf16.mxu1 %v11695_v16 }
 0x320   : > { %8617 = vmatmul.mubr.bf16.gmra.mrb[8].mxu1 %v3989_v4 }
 0x321   : > { %8620 = vmatprep.mubr.bf16.mxu1 %v3991_v6  ;;  %8849 = vmatpush3.bf16.msra.mxu1 %v9578_v26 }
 0x322   : > { %8850 = vmatprep.subr.bf16.mxu1 %v11695_v16 }
 0x325   : > { %8851 = vmatpush3.bf16.msra.mxu1 %v9580_v34 }
 0x326   : > { %8852 = vmatprep.subr.bf16.mxu1 %v11695_v16 }
 0x328   : > { %8621 = vmatmul.mubr.bf16.gmra.mrb[12].mxu1 %v3993_v63 }
 0x329   : > { %8624 = vmatprep.mubr.bf16.mxu1 %v3995_v10  ;;  %8853 = vmatpush3.bf16.msra.mxu1 %v9581_v38 }
 0x32a   : > { %8854 = vmatprep.subr.bf16.mxu1 %v11695_v16 }
 0x32d   : > { %8855 = vmatpush3.bf16.msra.mxu1 %v9585_v39 }
 0x32e   : > { %8944 = vmatprep.subr.bf16.mxu1 %v11695_v16 }
 0x330   : > { %8625 = vmatmul.mubr.bf16.gmra.mrb[16].mxu1 %v3997_v11 }
 0x331   : > { %8628 = vmatprep.mubr.bf16.mxu1 %v3999_v13 }
 0x338   : > { %8629 = vmatmul.mubr.bf16.gmra.mrb[20].mxu1 %v4001_v7 }
 0x339   : > { %8856 = vmatprep.mubr.msk.bf16.mxu1 %vm9702_vm2, %v11695_v16 }
 0x3e3   : > { %v8610_v37 = vpop.f32.mrb[0].mxu1 }
 0x3e4   : > { %v4224_v43 = vadd.f32 %v8610_v37, %v10491_v40  ;;  %v4096_v44 = vpop.f32.mrb[1].mxu1 }
 0x3e5   : > { %v4222_v46 = vadd.f32 %v10491_v40, %v4096_v44  ;;  %v8611_v47 = vpop.f32.mrb[2].mxu1 }
 0x3e6   : > { %v4225_v49 = vadd.f32 %v8611_v47, %v10491_v40  ;;  %v4099_v36 = vpop.f32.mrb[3].mxu1  ;;  %v4248_v59 = vmax.f32 %v4224_v43, 0.0 }
 0x3e7   : > { %v4223_v0 = vadd.f32 %v10491_v40, %v4099_v36  ;;  %v4246_v1 = vmax.f32 %v4222_v46, 0.0 }
 0x3e8   : > { %v4249_v32 = vmax.f32 %v4225_v49, 0.0 }
 0x3e9   : > { %v4247_v12 = vmax.f32 %v4223_v0, 0.0 }
 0x3ea   : > { %v7665_v5 = vpack.c.bf16 %v4249_v32, %v4248_v59 }
 0x3eb   : > { %v7660_v21 = vpack.c.bf16 %v4247_v12, %v4246_v1  ;;  %v8614_v55 = vpop.f32.mrb[4].mxu1  ;;  %v9589_v1 = vld [vmem:[%s11692_s5 + $0x8] sm:$0xff]   ;;  %v9603_v12 = vld [vmem:[%s11692_s5 + $0x180] sm:$0xff]  }
 0x3ec   : > { %7730 = vst [vmem:[#allocation3 + $0x8] sm:$0xff] %v7665_v5   ;;  %v4228_v20 = vadd.f32 %v8614_v55, %v10491_v40  ;;  %v4112_v24 = vpop.f32.mrb[5].mxu1 }
 0x3ed   : > { %7661 = vst [vmem:[#allocation3] sm:$0xff] %v7660_v21   ;;  %v4226_v35 = vadd.f32 %v10491_v40, %v4112_v24  ;;  %v8615_v41 = vpop.f32.mrb[6].mxu1 }
 0x3ee   : > { %v4229_v52 = vadd.f32 %v8615_v41, %v10491_v40  ;;  %v4115_v53 = vpop.f32.mrb[7].mxu1  ;;  %v4252_v29 = vmax.f32 %v4228_v20, 0.0 }
 0x3ef   : > { %v4227_v61 = vadd.f32 %v10491_v40, %v4115_v53  ;;  %v4250_v50 = vmax.f32 %v4226_v35, 0.0 }
 0x3f0   : > { %v4253_v27 = vmax.f32 %v4229_v52, 0.0 }
 0x3f1   : > { %v4251_v51 = vmax.f32 %v4227_v61, 0.0 }
 0x3f2   : > { %v7675_v56 = vpack.c.bf16 %v4253_v27, %v4252_v29 }
 0x3f3   : > { %v7670_v30 = vpack.c.bf16 %v4251_v51, %v4250_v50  ;;  %v8618_v54 = vpop.f32.mrb[8].mxu1  ;;  %v10501_v57 = vld [vmem:[#allocation3 + $0x8] sm:$0xff]   ;;  %v9592_v50 = vld [vmem:[%s11692_s5 + $0x10] sm:$0xff]  }
 0x3f4   : > { %7732 = vst [vmem:[#allocation3 + $0x18] sm:$0xff] %v7675_v56   ;;  %v4232_v33 = vadd.f32 %v8618_v54, %v10491_v40  ;;  %v4128_v58 = vpop.f32.mrb[9].mxu1  ;;  %v4391_v60 = vld [vmem:[#allocation3] sm:$0xf]  ;;  %v10504_v45 = vld [vmem:[#allocation3 + $0x4] sm:$0xf] }
 0x3f5   : > { %7731 = vst [vmem:[#allocation3 + $0x10] sm:$0xff] %v7670_v30   ;;  %v4230_v2 = vadd.f32 %v10491_v40, %v4128_v58  ;;  %v8619_v3 = vpop.f32.mrb[10].mxu1  ;;  %v10508_v48 = vcombine.low %v4391_v60, %v10504_v45  ;;  %v5371_v8 = vld [vmem:[#allocation3 + $0x8] sm:$0xf]  ;;  %v10510_v4 = vld [vmem:[#allocation3 + $0xc] sm:$0xf] }
 0x3f6   : > { %v4233_v6 = vadd.f32 %v8619_v3, %v10491_v40  ;;  %v4131_v17 = vpop.f32.mrb[11].mxu1  ;;  %v4499_v28 = vshll.u32 %v10501_v57, 16  ;;  %v7396_v63 = vcombine.low %v5371_v8, %v10510_v4  ;;  %v4256_v62 = vmax.f32 %v4232_v33, 0.0 }
 0x3f7   : > { %v4231_v10 = vadd.f32 %v10491_v40, %v4131_v17  ;;  %v4494_v42 = vshll.u32 %v10508_v48, 16  ;;  %v4254_v14 = vmax.f32 %v4230_v2, 0.0  ;;  %v4492_v15 = vshrl.u32 %v10508_v48, 16 }
 0x3f8   : > { %v4257_v11 = vmax.f32 %v4233_v6, 0.0  ;;  %v5458_v13 = vshll.u32 %v7396_v63, 16  ;;  %v4501_v19 = vrot.slane %v4499_v28, 1  ;;  %v5456_v36 = vshrl.u32 %v7396_v63, 16  ;;  %v9605_v6 = vld [vmem:[%s11692_s5 + $0x188] sm:$0xff]  }
 0x3f9   : > { %v4255_v7 = vmax.f32 %v4231_v10, 0.0  ;;  %v4496_v9 = vrot.slane %v4494_v42, 1  ;;  %v4503_v52 = vshrl.u32 %v10501_v57, 16  ;;  %v9595_v42 = vld [vmem:[%s11692_s5 + $0x18] sm:$0xff]  }
 0x3fa   : > { %v7685_v18 = vpack.c.bf16 %v4257_v11, %v4256_v62  ;;  %v5460_v31 = vrot.slane %v5458_v13, 1 }
 0x3fb   : > { %v7680_v23 = vpack.c.bf16 %v4255_v7, %v4254_v14  ;;  %v8622_v25 = vpop.f32.mrb[12].mxu1  ;;  %v4497_v26 = vor.u32 %v4496_v9, %v4492_v15  ;;  %v10541_v24 = vld [vmem:[#allocation3 + $0x18] sm:$0xff]   ;;  %v4505_v30 = vor.u32 %v4503_v52, %v4501_v19 }
 0x3fc   : > { %7734 = vst [vmem:[#allocation3 + $0x28] sm:$0xff] %v7685_v18   ;;  %v4236_v34 = vadd.f32 %v8622_v25, %v10491_v40  ;;  %v4144_v38 = vpop.f32.mrb[13].mxu1  ;;  %v10522_v39 = vld [vmem:[#allocation3 + $0x10] sm:$0xff]   ;;  %v5461_v55 = vor.u32 %v5460_v31, %v5456_v36  ;;  %v10549_v54 = vld [vmem:[#allocation3 + $0x18] sm:$0xff]   ;;  %v5471_v60 = vshll.u32 %v10541_v24, 16 }
 0x3fd   : > { %7733 = vst [vmem:[#allocation3 + $0x20] sm:$0xff] %v7680_v23   ;;  %v4234_v37 = vadd.f32 %v10491_v40, %v4144_v38  ;;  %v8623_v43 = vpop.f32.mrb[14].mxu1  ;;  %v4502_v44 = vsel %vm1494_vm0, %v4497_v26, %v4501_v19  ;;  %v10526_v46 = vld [vmem:[#allocation3 + $0x10] sm:$0xff]   ;;  %v5463_v0 = vshll.u32 %v10522_v39, 16  ;;  %v5467_v27 = vshrl.u32 %v10522_v39, 16  ;;  %v9608_v23 = vld [vmem:[%s11692_s5 + $0x190] sm:$0xff]  }
 0x3fe   : > { %v4237_v47 = vadd.f32 %v8623_v43, %v10491_v40  ;;  %v4147_v49 = vpop.f32.mrb[15].mxu1  ;;  %8649 = vmatmul.mubr.bf16.vlgmr.msra.gmra.mrb[28].mxu0 %v4502_v44  ;;  %v4507_v32 = vshll.u32 %v10526_v46, 16  ;;  %v4260_v5 = vmax.f32 %v4236_v34, 0.0  ;;  %v4511_v11 = vshrl.u32 %v10526_v46, 16  ;;  %v9598_v34 = vld [vmem:[%s11692_s5 + $0x20] sm:$0xff]  }
 0x3ff   : > { %v4235_v59 = vadd.f32 %v10491_v40, %v4147_v49  ;;  %8685 = vmatpush3.bf16.msra.mxu0 %v9584_v22  ;;  %8652 = vmatprep.mubr.msk.bf16.mxu0 %vm9702_vm2, %v11695_v16  ;;  %v5465_v20 = vrot.slane %v5463_v0, 1  ;;  %v4258_v35 = vmax.f32 %v4234_v37, 0.0  ;;  %v4515_v13 = vshll.u32 %v10549_v54, 16  ;;  %v9610_v49 = vld [vmem:[%s11692_s5 + $0x198] sm:$0xff]  }
 0x400   : > { %v4261_v21 = vmax.f32 %v4237_v47, 0.0  ;;  %8686 = vmatprep.subr.bf16.mxu0 %v11695_v16  ;;  %v4509_v53 = vrot.slane %v4507_v32, 1  ;;  %v5473_v15 = vrot.slane %v5471_v60, 1 }
 0x401   : > { %v4259_v41 = vmax.f32 %v4235_v59, 0.0  ;;  %v5466_v29 = vsel %vm1494_vm0, %v5461_v55, %v5465_v20  ;;  %v5469_v63 = vor.u32 %v5467_v27, %v5465_v20  ;;  %v4517_v43 = vrot.slane %v4515_v13, 1  ;;  %v9601_v20 = vld [vmem:[%s11692_s5 + $0x28] sm:$0xff]   ;;  %v9617_v13 = vld [vmem:[%s11692_s5 + $0x1b0] sm:$0xff]  }
 0x402   : > { %v7695_v61 = vpack.c.bf16 %v4261_v21, %v4260_v5  ;;  %8857 = vmatmul.mubr.bf16.vlgmr.msra.gmra.mrb[24].mxu1 %v5466_v29  ;;  %v4510_v8 = vsel %vm1494_vm0, %v4505_v30, %v4509_v53  ;;  %v4513_v19 = vor.u32 %v4511_v11, %v4509_v53  ;;  %v5475_v5 = vshrl.u32 %v10541_v24, 16  ;;  %v9607_v30 = vld [vmem:[%s11692_s5 + $0x30] sm:$0xff]  }
 0x403   : > { %v7690_v51 = vpack.c.bf16 %v4259_v41, %v4258_v35  ;;  %v8626_v56 = vpop.f32.mrb[16].mxu1  ;;  %8687 = vmatpush3.bf16.msra.mxu0 %v9589_v1  ;;  %8860 = vmatprep.mubr.msk.bf16.mxu1 %vm9702_vm2, %v11695_v16  ;;  %v5474_v26 = vsel %vm1494_vm0, %v5469_v63, %v5473_v15  ;;  %v10604_v53 = vld [vmem:[#allocation3 + $0x28] sm:$0xff]   ;;  %v4519_v27 = vshrl.u32 %v10549_v54, 16 }
 0x404   : > { %7736 = vst [vmem:[#allocation3 + $0x38] sm:$0xff] %v7695_v61   ;;  %v4240_v33 = vadd.f32 %v8626_v56, %v10491_v40  ;;  %v4160_v58 = vpop.f32.mrb[17].mxu1  ;;  %8688 = vmatprep.subr.bf16.mxu0 %v11695_v16  ;;  %8945 = vmatpush3.bf16.msra.mxu1 %v9603_v12  ;;  %v10562_v10 = vld [vmem:[#allocation3 + $0x20] sm:$0xff]   ;;  %v4518_v59 = vsel %vm1494_vm0, %v4513_v19, %v4517_v43  ;;  %v9612_v61 = vld [vmem:[%s11692_s5 + $0x1a0] sm:$0xff]  }
 0x405   : > { %7735 = vst [vmem:[#allocation3 + $0x30] sm:$0xff] %v7690_v51   ;;  %v4238_v2 = vadd.f32 %v10491_v40, %v4160_v58  ;;  %v8627_v3 = vpop.f32.mrb[18].mxu1  ;;  %8946 = vmatprep.subr.bf16.mxu1 %v11695_v16  ;;  %v10574_v22 = vld [vmem:[#allocation3 + $0x20] sm:$0xff]   ;;  %v5479_v31 = vshll.u32 %v10562_v10, 16  ;;  %v5477_v52 = vor.u32 %v5475_v5, %v5473_v15  ;;  %v4521_v58 = vor.u32 %v4519_v27, %v4517_v43  ;;  %v10616_v60 = vld [vmem:[#allocation3 + $0x28] sm:$0xff]  }
 0x406   : > { %v4241_v17 = vadd.f32 %v8627_v3, %v10491_v40  ;;  %v4163_v28 = vpop.f32.mrb[19].mxu1  ;;  %8653 = vmatmul.mubr.bf16.gmra.mrb[32].mxu0 %v4510_v8  ;;  %v4264_v14 = vmax.f32 %v4240_v33, 0.0  ;;  %v4523_v32 = vshll.u32 %v10574_v22, 16  ;;  %v5487_v3 = vshll.u32 %v10604_v53, 16 }
 0x407   : > { %v4239_v62 = vadd.f32 %v10491_v40, %v4163_v28  ;;  %8656 = vmatprep.mubr.msk.bf16.mxu0 %vm9702_vm2, %v11695_v16  ;;  %8689 = vmatpush3.bf16.msra.mxu0 %v9592_v50  ;;  %v4262_v9 = vmax.f32 %v4238_v2, 0.0  ;;  %v5481_v21 = vrot.slane %v5479_v31, 1  ;;  %v5483_v2 = vshrl.u32 %v10562_v10, 16 }
 0x408   : > { %v4265_v7 = vmax.f32 %v4241_v17, 0.0  ;;  %8690 = vmatprep.subr.bf16.mxu0 %v11695_v16  ;;  %8947 = vmatpush3.bf16.msra.mxu1 %v9605_v6  ;;  %v4525_v50 = vrot.slane %v4523_v32, 1  ;;  %v9615_v6 = vld [vmem:[%s11692_s5 + $0x1a8] sm:$0xff]   ;;  %v4527_v63 = vshrl.u32 %v10574_v22, 16  ;;  %v5489_v11 = vrot.slane %v5487_v3, 1 }
 0x409   : > { %v4263_v18 = vmax.f32 %v4239_v62, 0.0  ;;  %8948 = vmatprep.subr.bf16.mxu1 %v11695_v16  ;;  %v5482_v56 = vsel %vm1494_vm0, %v5477_v52, %v5481_v21  ;;  %v5485_v17 = vor.u32 %v5483_v2, %v5481_v21  ;;  %v9614_v62 = vld [vmem:[%s11692_s5 + $0x38] sm:$0xff]   ;;  %v4535_v43 = vshrl.u32 %v10616_v60, 16 }
 0x40a   : > { %v7705_v25 = vpack.c.bf16 %v4265_v7, %v4264_v14  ;;  %8861 = vmatmul.mubr.bf16.gmra.mrb[28].mxu1 %v5474_v26  ;;  %v4526_v8 = vsel %vm1494_vm0, %v4521_v58, %v4525_v50  ;;  %v4529_v14 = vor.u32 %v4527_v63, %v4525_v50  ;;  %v5491_v26 = vshrl.u32 %v10604_v53, 16 }
 0x40b   : > { %v7700_v38 = vpack.c.bf16 %v4263_v18, %v4262_v9  ;;  %v8630_v37 = vpop.f32.mrb[20].mxu1  ;;  %8691 = vmatpush3.bf16.msra.mxu0 %v9595_v42  ;;  %8864 = vmatprep.mubr.msk.bf16.mxu1 %vm9702_vm2, %v11695_v16  ;;  %v4531_v42 = vshll.u32 %v10616_v60, 16  ;;  %v5490_v15 = vsel %vm1494_vm0, %v5485_v17, %v5489_v11  ;;  %v5737_v58 = vrot.slane %v10562_v10, 1 }
 0x40c   : > { %7738 = vst [vmem:[#allocation3 + $0x48] sm:$0xff] %v7705_v25   ;;  %v4244_v44 = vadd.f32 %v8630_v37, %v10491_v40  ;;  %v4176_v47 = vpop.f32.mrb[21].mxu1  ;;  %8692 = vmatprep.subr.bf16.mxu0 %v11695_v16  ;;  %8949 = vmatpush3.bf16.msra.mxu1 %v9608_v23  ;;  %v10627_v28 = vld [vmem:[#allocation3 + $0x30] sm:$0xff]   ;;  %v9619_v25 = vld [vmem:[%s11692_s5 + $0x1b8] sm:$0xff]   ;;  %v10660_v37 = vld [vmem:[#allocation3 + $0x38] sm:$0xff]  }
 0x40d   : > { %7737 = vst [vmem:[#allocation3 + $0x40] sm:$0xff] %v7700_v38   ;;  %v4242_v36 = vadd.f32 %v10491_v40, %v4176_v47  ;;  %v8631_v0 = vpop.f32.mrb[22].mxu1  ;;  %8950 = vmatprep.subr.bf16.mxu1 %v11695_v16  ;;  %v10641_v7 = vld [vmem:[#allocation3 + $0x30] sm:$0xff]   ;;  %v5495_v9 = vshll.u32 %v10627_v28, 16  ;;  %v4533_v18 = vrot.slane %v4531_v42, 1  ;;  %v5493_v38 = vor.u32 %v5491_v26, %v5489_v11 }
 0x40e   : > { %v4245_v1 = vadd.f32 %v8631_v0, %v10491_v40  ;;  %v4179_v12 = vpop.f32.mrb[23].mxu1  ;;  %8657 = vmatmul.mubr.bf16.gmra.mrb[36].mxu0 %v4518_v59  ;;  %v4268_v35 = vmax.f32 %v4244_v44, 0.0  ;;  %v4539_v23 = vshll.u32 %v10641_v7, 16  ;;  %v5499_v59 = vshrl.u32 %v10627_v28, 16 }
 0x40f   : > { %v4243_v55 = vadd.f32 %v10491_v40, %v4179_v12  ;;  %8660 = vmatprep.mubr.msk.bf16.mxu0 %vm9702_vm2, %v11695_v16  ;;  %8693 = vmatpush3.bf16.msra.mxu0 %v9598_v34  ;;  %v4266_v40 = vmax.f32 %v4242_v36, 0.0  ;;  %v4534_v19 = vsel %vm1494_vm0, %v4529_v14, %v4533_v18  ;;  %v5497_v31 = vrot.slane %v5495_v9, 1  ;;  %v10658_v34 = vld [vmem:[#allocation3 + $0x38] sm:$0xff]  }
 0x410   : > { %v4269_v41 = vmax.f32 %v4245_v1, 0.0  ;;  %8694 = vmatprep.subr.bf16.mxu0 %v11695_v16  ;;  %8951 = vmatpush3.bf16.msra.mxu1 %v9610_v49  ;;  %v4541_v44 = vrot.slane %v4539_v23, 1  ;;  %v5711_v49 = vld [vmem:[#allocation3 + $0x8] sm:$0xe]  ;;  %v4537_v36 = vor.u32 %v4535_v43, %v4533_v18  ;;  %v5503_v0 = vshll.u32 %v10658_v34, 16 }
 0x411   : > { %v4267_v29 = vmax.f32 %v4243_v55, 0.0  ;;  %8952 = vmatprep.subr.bf16.mxu1 %v11695_v16  ;;  %v5498_v47 = vsel %vm1494_vm0, %v5493_v38, %v5497_v31  ;;  %v4547_v32 = vshll.u32 %v10660_v37, 16  ;;  %v5501_v5 = vor.u32 %v5499_v59, %v5497_v31 }
 0x412   : > { %v7715_v51 = vpack.c.bf16 %v4269_v41, %v4268_v35  ;;  %8865 = vmatmul.mubr.bf16.gmra.mrb[32].mxu1 %v5482_v56  ;;  %v4542_v1 = vsel %vm1494_vm0, %v4537_v36, %v4541_v44  ;;  %v7430_v21 = vcombine.low %v5711_v49, %v10510_v4  ;;  %v5505_v55 = vrot.slane %v5503_v0, 1 }
 0x413   : > { %v7710_v33 = vpack.c.bf16 %v4267_v29, %v4266_v40  ;;  %8695 = vmatpush3.bf16.msra.mxu0 %v9601_v20  ;;  %8868 = vmatprep.mubr.msk.bf16.mxu1 %vm9702_vm2, %v11695_v16  ;;  %v4543_v20 = vshrl.u32 %v10641_v7, 16  ;;  %v4549_v35 = vrot.slane %v4547_v32, 1  ;;  %v10680_v40 = vld [vmem:[#allocation3 + $0x48] sm:$0xff]   ;;  %v5733_v4 = vrot.slane %v10522_v39, 1 }
 0x414   : > { %7740 = vst [vmem:[#allocation3 + $0x58] sm:$0xff] %v7715_v51   ;;  %8696 = vmatprep.subr.bf16.mxu0 %v11695_v16  ;;  %8953 = vmatpush3.bf16.msra.mxu1 %v9612_v61  ;;  %v10671_v12 = vld [vmem:[#allocation3 + $0x40] sm:$0xff]   ;;  %v5506_v27 = vsel %vm1494_vm0, %v5501_v5, %v5505_v55  ;;  %v5732_v50 = vrot.slane %v7430_v21, 1  ;;  %v5507_v51 = vshrl.u32 %v10658_v34, 16  ;;  %v5735_v56 = vrot.slane %v10541_v24, 1  ;;  %v10700_v24 = vld [vmem:[#allocation3 + $0x28] sm:$0xff]  }
 0x415   : > { %7739 = vst [vmem:[#allocation3 + $0x50] sm:$0xff] %v7710_v33   ;;  %8954 = vmatprep.subr.bf16.mxu1 %v11695_v16  ;;  %v10677_v41 = vld [vmem:[#allocation3 + $0x40] sm:$0xff]   ;;  %v4545_v52 = vor.u32 %v4543_v20, %v4541_v44  ;;  %v5511_v61 = vshll.u32 %v10671_v12, 16  ;;  %v5741_v63 = vrot.slane %v10627_v28, 1  ;;  %v5743_v10 = vrot.slane %v10658_v34, 1 }
 0x416   : > { %8661 = vmatmul.mubr.bf16.gmra.mrb[40].mxu0 %v4526_v8  ;;  %v10692_v33 = vsel %vm1994_vm1, %v5732_v50, %v5733_v4  ;;  %v10697_v39 = vsel %vm1994_vm1, %v5733_v4, %v5735_v56  ;;  %v5739_v8 = vrot.slane %v10604_v53, 1  ;;  %v10705_v17 = vsel %vm1994_vm1, %v5735_v56, %v5737_v58  ;;  %v10739_v38 = vld [vmem:[#allocation3 + $0x40] sm:$0xff]  }
 0x417   : > { %8664 = vmatprep.mubr.msk.bf16.mxu0 %vm9702_vm2, %v11695_v16  ;;  %8697 = vmatpush3.bf16.msra.mxu0 %v9607_v30  ;;  %v4555_v30 = vshll.u32 %v10677_v41, 16  ;;  %v4550_v2 = vsel %vm1494_vm0, %v4545_v52, %v4549_v35  ;;  %v5513_v3 = vrot.slane %v5511_v61, 1  ;;  %v5745_v53 = vrot.slane %v10671_v12, 1  ;;  %v10755_v52 = vld [vmem:[#allocation3 + $0x48] sm:$0xff]  }
 0x418   : > { %8698 = vmatprep.subr.bf16.mxu0 %v11695_v16  ;;  %8955 = vmatpush3.bf16.msra.mxu1 %v9615_v6  ;;  %v10702_v6 = vld [vmem:[#allocation3 + $0x30] sm:$0xff]   ;;  %v10712_v42 = vsel %vm1994_vm1, %v5737_v58, %v5739_v8  ;;  %v4551_v14 = vshrl.u32 %v10660_v37, 16  ;;  %v10721_v28 = vsel %vm1994_vm1, %v5739_v8, %v5741_v63  ;;  %v10724_v9 = vsel %vm1994_vm1, %v5741_v63, %v5743_v10  ;;  %v10766_v58 = vld [vmem:[#allocation3 + $0x18] sm:$0xff]  }
 0x419   : > { %8956 = vmatprep.subr.bf16.mxu1 %v11695_v16  ;;  %v4557_v18 = vrot.slane %v4555_v30, 1  ;;  %v10729_v23 = vsel %vm1994_vm1, %v5743_v10, %v5745_v53  ;;  %v5519_v34 = vshll.u32 %v10680_v40, 16  ;;  %v6299_v43 = vshll.u32 %v10700_v24, 16 }
 0x41a   : > { %8869 = vmatmul.mubr.bf16.gmra.mrb[36].mxu1 %v5490_v15  ;;  %v10718_v15 = vld [vmem:[#allocation3 + $0x48] ss:$0 sps:$4 sm:$0x11]   ;;  %v6307_v44 = vshll.u32 %v10702_v6, 16  ;;  %v5515_v49 = vshrl.u32 %v10671_v12, 16  ;;  %v4559_v36 = vshrl.u32 %v10677_v41, 16 }
 0x41b   : > { %8699 = vmatpush3.bf16.msra.mxu0 %v9614_v62  ;;  %8872 = vmatprep.mubr.msk.bf16.mxu1 %vm9702_vm2, %v11695_v16  ;;  %v5747_v62 = vrot.slane %v10680_v40, 1  ;;  %v5523_v0 = vshrl.u32 %v10680_v40, 16  ;;  %v10748_v59 = vrot.slane %v6299_v43, 1  ;;  %v6303_v32 = vshrl.u32 %v10700_v24, 16 }
 0x41c   : > { %8736 = vmatprep.subr.bf16.mxu0 %v11695_v16  ;;  %8957 = vmatpush3.bf16.msra.mxu1 %v9617_v13  ;;  %v10682_v29 = vld [vmem:[#allocation3 + $0x50] ss:$0 sps:$4 sm:$0x11]   ;;  %v5509_v13 = vor.u32 %v5507_v51, %v5505_v55  ;;  %v4563_v21 = vshll.u32 %v10718_v15, 16  ;;  %v6311_v55 = vshrl.u32 %v10702_v6, 16  ;;  %v5517_v20 = vor.u32 %v5515_v49, %v5513_v3 }
 0x41d   : > { %8958 = vmatprep.subr.bf16.mxu1 %v11695_v16  ;;  %v5749_v11 = vrot.slane %v10682_v29, 1  ;;  %v6305_v61 = vor.u32 %v6303_v32, %v10748_v59  ;;  %v6323_v40 = vshll.u32 %v10739_v38, 16  ;;  %v10763_v50 = vld [vmem:[#allocation3 + $0x58] ss:$0 sps:$4 sm:$0x11]   ;;  %v4561_v30 = vor.u32 %v4559_v36, %v4557_v18 }
 0x41e   : > { %8665 = vmatmul.mubr.bf16.gmra.mrb[44].mxu0 %v4534_v19  ;;  %v10726_v19 = vld [vmem:[#allocation3 + $0x38] sm:$0xff]   ;;  %v5514_v31 = vsel %vm1494_vm0, %v5509_v13, %v5513_v3  ;;  %v6327_v63 = vshrl.u32 %v10739_v38, 16  ;;  %v4565_v10 = vrot.slane %v4563_v21, 1  ;;  %v6331_v43 = vshll.u32 %v10755_v52, 16 }
 0x41f   : > { %8668 = vmatprep.mubr.msk.bf16.mxu0 %vm9702_vm2, %v11695_v16  ;;  %v10735_v26 = vsel %vm1994_vm1, %v5747_v62, %v5749_v11  ;;  %v6315_v12 = vshll.u32 %v10726_v19, 16  ;;  %v6319_v56 = vshrl.u32 %v10726_v19, 16  ;;  %v6325_v8 = vrot.slane %v6323_v40, 1 }
 0x420   : > { %8959 = vmatpush3.bf16.msra.mxu1 %v9619_v25  ;;  %v10732_v25 = vsel %vm1994_vm1, %v5745_v53, %v5747_v62  ;;  %v5527_v53 = vshll.u32 %v10682_v29, 16  ;;  %v10775_v62 = vld [vmem:[#allocation3 + $0x14] sm:$0xf]  ;;  %v6335_v29 = vshrl.u32 %v10755_v52, 16  ;;  %v6347_v49 = vshll.u32 %v10763_v50, 16 }
 0x421   : > { %9100 = vmatprep.subr.bf16.mxu1 %v11695_v16  ;;  %v6317_v51 = vrot.slane %v6315_v12, 1  ;;  %v6333_v36 = vrot.slane %v6331_v43, 1  ;;  %v4566_v21 = vsel %vm1494_vm0, %v4561_v30, %v4565_v10  ;;  %v10846_v43 = vld [vmem:[%s11692_s5 + $0x208] sm:$0xff]  }
 0x422   : > { %8873 = vmatmul.mubr.bf16.gmra.mrb[40].mxu1 %v5498_v47  ;;  %v4553_v47 = vor.u32 %v4551_v14, %v4549_v35  ;;  %v5521_v35 = vrot.slane %v5519_v34, 1  ;;  %v6531_v14 = vld [vmem:[#allocation3 + $0x10] sm:$0xe]  ;;  %v6329_v34 = vor.u32 %v6327_v63, %v6325_v8 }
 0x423   : > { %8876 = vmatprep.mubr.msk.bf16.mxu1 %vm9702_vm2, %v11695_v16  ;;  %v6321_v13 = vor.u32 %v6319_v56, %v6317_v51  ;;  %v7522_v32 = vcombine.low %v6531_v14, %v10775_v62  ;;  %v6337_v40 = vor.u32 %v6335_v29, %v6333_v36  ;;  %v9625_v29 = vld [vmem:[%s11692_s5 + $0x98] sm:$0xff]  }
 0x424   : > { %v4558_v5 = vsel %vm1494_vm0, %v4553_v47, %v4557_v18  ;;  %v5522_v18 = vsel %vm1494_vm0, %v5517_v20, %v5521_v35  ;;  %v5525_v63 = vor.u32 %v5523_v0, %v5521_v35  ;;  %v9621_v0 = vld [vmem:[%s11692_s5 + $0x88] sm:$0xff]  }
 0x425   : > { %v9620_v35 = vld [vmem:[#allocation3 + $0x10] sm:$0xff]  }
 0x426   : > { %8669 = vmatmul.mubr.bf16.gmra.mrb[48].mxu0 %v4542_v1  ;;  %v6309_v1 = vrot.slane %v6307_v44, 1  ;;  %v10784_v44 = vsel %vm1494_vm0, %v6321_v13, %v6325_v8  ;;  %v6349_v8 = vrot.slane %v6347_v49, 1  ;;  %v10860_v49 = vld [vmem:[%s11692_s5 + $0x210] sm:$0xff]  }
 0x427   : > { %8672 = vmatprep.mubr.msk.bf16.mxu0 %vm9702_vm2, %v11695_v16 }
 0x428   : > { %v6313_v4 = vor.u32 %v6311_v55, %v6309_v1  ;;  %v10771_v3 = vsel %vm1494_vm0, %v6305_v61, %v6309_v1  ;;  %v6553_v1 = vrot.slane %v10766_v58, 1  ;;  %v5529_v55 = vrot.slane %v5527_v53, 1 }
 0x429   : > { %v10797_v61 = vsel %vm1494_vm0, %v6329_v34, %v6333_v36  ;;  %v10834_v34 = vld [vmem:[%s11692_s5 + $0x200] sm:$0xff]   ;;  %v10873_v36 = vld [vmem:[%s11692_s5 + $0x218] sm:$0xff]  }
 0x42a   : > { %8877 = vmatmul.mubr.bf16.gmra.mrb[44].mxu1 %v5506_v27  ;;  %v10761_v27 = vld [vmem:[#allocation3 + $0x50] sm:$0xff]   ;;  %v10778_v11 = vsel %vm1494_vm0, %v6313_v4, %v6317_v51  ;;  %v6552_v4 = vrot.slane %v7522_v32, 1  ;;  %v5530_v14 = vsel %vm1494_vm0, %v5525_v63, %v5529_v55  ;;  %v9633_v63 = vld [vmem:[#allocation3 + $0x40] sm:$0xff]  }
 0x42b   : > { %8880 = vmatprep.mubr.msk.bf16.mxu1 %vm9702_vm2, %v11695_v16  ;;  %v6339_v47 = vshll.u32 %v10761_v27, 16  ;;  %v6343_v20 = vshrl.u32 %v10761_v27, 16  ;;  %v9629_v32 = vld [vmem:[%s11692_s5 + $0xa8] sm:$0xff]  }
 0x42c   : > { %v10813_v53 = vsel %vm1994_vm1, %v6552_v4, %v6553_v1  ;;  %v10900_v55 = vld [vmem:[%s11692_s5 + $0x228] sm:$0xff]   ;;  %v10924_v4 = vld [vmem:[%s11692_s5 + $0x238] sm:$0xff]  }
 0x42d   : > { %v6341_v12 = vrot.slane %v6339_v47, 1  ;;  %v9622_v47 = vld [vmem:[#allocation3 + $0x18] sm:$0xff]  }
 0x42e   : > { %8673 = vmatmul.mubr.bf16.gmra.mrb[52].mxu0 %v4550_v2  ;;  %v10768_v2 = vld [vmem:[#allocation3 + $0x20] sm:$0xff]  }
 0x42f   : > { %8676 = vmatprep.mubr.msk.bf16.mxu0 %vm9702_vm2, %v11695_v16  ;;  %v6345_v56 = vor.u32 %v6343_v20, %v6341_v12  ;;  %v10810_v10 = vsel %vm1494_vm0, %v6337_v40, %v6341_v12  ;;  %v9639_v12 = vld [vmem:[%s11692_s5 + $0xb8] sm:$0xff]   ;;  %v10914_v40 = vld [vmem:[%s11692_s5 + $0x230] sm:$0xff]  }
 0x430   : > { %v9626_v20 = vld [vmem:[#allocation3 + $0x28] sm:$0xff]  }
 0x431   : > { %v10816_v13 = vsel %vm1494_vm0, %v6345_v56, %v6349_v8  ;;  %v9628_v56 = vld [vmem:[#allocation3 + $0x30] sm:$0xff]   ;;  %v9630_v8 = vld [vmem:[#allocation3 + $0x38] sm:$0xff]  }
 0x432   : > { %8881 = vmatmul.mubr.bf16.gmra.mrb[48].mxu1 %v5514_v31  ;;  %v6557_v31 = vrot.slane %v10700_v24, 1  ;;  %v9652_v24 = vld [vmem:[%s11692_s5 + $0xd8] sm:$0xff]  }
 0x433   : > { %8884 = vmatprep.mubr.msk.bf16.mxu1 %vm9702_vm2, %v11695_v16 }
 0x436   : > { %8677 = vmatmul.mubr.bf16.gmra.mrb[56].mxu0 %v4558_v5  ;;  %v6555_v5 = vrot.slane %v10768_v2, 1 }
 0x437   : > { %8680 = vmatprep.mubr.msk.bf16.mxu0 %vm9702_vm2, %v11695_v16 }
 0x438   : > { %v10800_v51 = vsel %vm1994_vm1, %v6553_v1, %v6555_v5  ;;  %v10807_v30 = vsel %vm1994_vm1, %v6555_v5, %v6557_v31  ;;  %v9624_v1 = vld [vmem:[#allocation3 + $0x20] sm:$0xff]   ;;  %v10887_v5 = vld [vmem:[%s11692_s5 + $0x220] sm:$0xff]  }
 0x43a   : > { %8885 = vmatmul.mubr.bf16.gmra.mrb[52].mxu1 %v5522_v18  ;;  %v9618_v18 = vld [vmem:[%s11692_s5 + $0x80] sm:$0xff]  }
 0x43b   : > { %8888 = vmatprep.mubr.msk.bf16.mxu1 %vm9702_vm2, %v11695_v16 }
 0x43e   : > { %8681 = vmatmul.mubr.bf16.gmra.mrb[60].mxu0 %v4566_v21  ;;  %v9634_v21 = vld [vmem:[%s11692_s5 + $0xb0] sm:$0xff]  }
 0x43f   : > { %8700 = vmatprep.mubr.msk.bf16.mxu0 %vm9702_vm2, %v11695_v16 }
 0x442   : > { %8889 = vmatmul.mubr.bf16.gmra.mrb[56].mxu1 %v5530_v14  ;;  %v9637_v14 = vld [vmem:[#allocation3 + $0x48] sm:$0xff]  }
 0x443   : > { %8960 = vmatprep.mubr.msk.bf16.mxu1 %vm9702_vm2, %v11695_v16 }
 0x446   : > { %8701 = vmatmul.mubr.bf16.vlgmr.msra.gmra.mrb[64].mxu0 %v10508_v48  ;;  %v9623_v48 = vld [vmem:[%s11692_s5 + $0x90] sm:$0xff]  }
 0x447   : > { %8737 = vmatpush3.bf16.msra.mxu0 %v9618_v18  ;;  %8704 = vmatprep.mubr.msk.bf16.mxu0 %vm9702_vm2, %v11695_v16  ;;  %v4891_v18 = vld [vmem:[#allocation3] sm:$0xe] }
 0x448   : > { %8738 = vmatprep.subr.bf16.mxu0 %v11695_v16 }
 0x44a   : > { %8961 = vmatmul.mubr.bf16.vlgmr.msra.gmra.mrb[60].mxu1 %v9620_v35  ;;  %v9641_v35 = vld [vmem:[#allocation3 + $0x50] sm:$0xff]  }
 0x44b   : > { %8739 = vmatpush3.bf16.msra.mxu0 %v9621_v0  ;;  %8964 = vmatprep.mubr.msk.bf16.mxu1 %vm9702_vm2, %v11695_v16  ;;  %v7338_v0 = vcombine.low %v4891_v18, %v10504_v45  ;;  %v6559_v45 = vrot.slane %v10702_v6, 1  ;;  %v9650_v6 = vld [vmem:[%s11692_s5 + $0xd0] sm:$0xff]  }
 0x44c   : > { %8740 = vmatprep.subr.bf16.mxu0 %v11695_v16  ;;  %9108 = vmatpush3.bf16.msra.mxu1 %v10834_v34 }
 0x44d   : > { %9101 = vmatprep.subr.bf16.mxu1 %v11695_v16 }
 0x44e   : > { %8705 = vmatmul.mubr.bf16.gmra.mrb[68].mxu0 %v10501_v57  ;;  %v9627_v57 = vld [vmem:[%s11692_s5 + $0xa0] sm:$0xff]  }
 0x44f   : > { %8708 = vmatprep.mubr.msk.bf16.mxu0 %vm9702_vm2, %v11695_v16  ;;  %8741 = vmatpush3.bf16.msra.mxu0 %v9623_v48  ;;  %v4912_v48 = vrot.slane %v7338_v0, 1 }
 0x450   : > { %8742 = vmatprep.subr.bf16.mxu0 %v11695_v16  ;;  %9109 = vmatpush3.bf16.msra.mxu1 %v10846_v43 }
 0x451   : > { %9102 = vmatprep.subr.bf16.mxu1 %v11695_v16 }
 0x452   : > { %8965 = vmatmul.mubr.bf16.gmra.mrb[64].mxu1 %v9622_v47 }
 0x453   : > { %8743 = vmatpush3.bf16.msra.mxu0 %v9625_v29  ;;  %8968 = vmatprep.mubr.msk.bf16.mxu1 %vm9702_vm2, %v11695_v16  ;;  %v9690_v29 = vld [vmem:[#allocation3 + $0x8] sm:$0xff]  }
 0x454   : > { %8744 = vmatprep.subr.bf16.mxu0 %v11695_v16  ;;  %9110 = vmatpush3.bf16.msra.mxu1 %v10860_v49  ;;  %v4913_v47 = vrot.slane %v9690_v29, 1 }
 0x455   : > { %9103 = vmatprep.subr.bf16.mxu1 %v11695_v16 }
 0x456   : > { %8709 = vmatmul.mubr.bf16.gmra.mrb[72].mxu0 %v10526_v46 }
 0x457   : > { %8712 = vmatprep.mubr.msk.bf16.mxu0 %vm9702_vm2, %v11695_v16  ;;  %8745 = vmatpush3.bf16.msra.mxu0 %v9627_v57  ;;  %v9644_v57 = vld [vmem:[%s11692_s5 + $0xc0] sm:$0xff]  }
 0x458   : > { %8746 = vmatprep.subr.bf16.mxu0 %v11695_v16  ;;  %9111 = vmatpush3.bf16.msra.mxu1 %v10873_v36 }
 0x459   : > { %9104 = vmatprep.subr.bf16.mxu1 %v11695_v16 }
 0x45a   : > { %8969 = vmatmul.mubr.bf16.gmra.mrb[68].mxu1 %v9624_v1  ;;  %v9648_v1 = vld [vmem:[%s11692_s5 + $0xc8] sm:$0xff]  }
 0x45b   : > { %8747 = vmatpush3.bf16.msra.mxu0 %v9629_v32  ;;  %8972 = vmatprep.mubr.msk.bf16.mxu1 %vm9702_vm2, %v11695_v16  ;;  %v4914_v32 = vsel %vm1994_vm1, %v4912_v48, %v4913_v47  ;;  %v4921_v48 = vrot.slane %v10616_v60, 1 }
 0x45c   : > { %8748 = vmatprep.subr.bf16.mxu0 %v11695_v16  ;;  %9112 = vmatpush3.bf16.msra.mxu1 %v10887_v5 }
 0x45d   : > { %9105 = vmatprep.subr.bf16.mxu1 %v11695_v16 }
 0x45e   : > { %8713 = vmatmul.mubr.bf16.gmra.mrb[76].mxu0 %v10549_v54 }
 0x45f   : > { %8716 = vmatprep.mubr.msk.bf16.mxu0 %vm9702_vm2, %v11695_v16  ;;  %8749 = vmatpush3.bf16.msra.mxu0 %v9634_v21  ;;  %v4915_v21 = vrot.slane %v10526_v46, 1  ;;  %v6561_v46 = vrot.slane %v10726_v19, 1  ;;  %v9654_v19 = vld [vmem:[%s11692_s5 + $0xe0] sm:$0xff]  }
 0x460   : > { %8750 = vmatprep.subr.bf16.mxu0 %v11695_v16  ;;  %9113 = vmatpush3.bf16.msra.mxu1 %v10900_v55 }
 0x461   : > { %9106 = vmatprep.subr.bf16.mxu1 %v11695_v16 }
 0x462   : > { %8973 = vmatmul.mubr.bf16.gmra.mrb[72].mxu1 %v9626_v20  ;;  %v4916_v20 = vsel %vm1994_vm1, %v4913_v47, %v4915_v21  ;;  %v6567_v47 = vrot.slane %v10761_v27, 1  ;;  %v4925_v27 = vrot.slane %v10660_v37, 1 }
 0x463   : > { %8751 = vmatpush3.bf16.msra.mxu0 %v9639_v12  ;;  %8976 = vmatprep.mubr.msk.bf16.mxu1 %vm9702_vm2, %v11695_v16  ;;  %v6560_v12 = vsel %vm1994_vm1, %v6557_v31, %v6559_v45  ;;  %v4917_v31 = vrot.slane %v10549_v54, 1  ;;  %v9656_v54 = vld [vmem:[%s11692_s5 + $0xe8] sm:$0xff]  }
 0x464   : > { %8788 = vmatprep.subr.bf16.mxu0 %v11695_v16  ;;  %9114 = vmatpush3.bf16.msra.mxu1 %v10914_v40 }
 0x465   : > { %9107 = vmatprep.subr.bf16.mxu1 %v11695_v16 }
 0x466   : > { %8717 = vmatmul.mubr.bf16.gmra.mrb[80].mxu0 %v10574_v22 }
 0x467   : > { %8720 = vmatprep.mubr.msk.bf16.mxu0 %vm9702_vm2, %v11695_v16 }
 0x468   : > { %9115 = vmatpush3.bf16.msra.mxu1 %v10924_v4 }
 0x46a   : > { %8977 = vmatmul.mubr.bf16.gmra.mrb[76].mxu1 %v9628_v56  ;;  %v6562_v56 = vsel %vm1994_vm1, %v6559_v45, %v6561_v46  ;;  %v6569_v45 = vrot.slane %v10763_v50, 1  ;;  %v4929_v50 = vrot.slane %v10718_v15, 1 }
 0x46b   : > { %8980 = vmatprep.mubr.msk.bf16.mxu1 %vm9702_vm2, %v11695_v16 }
 0x46e   : > { %8721 = vmatmul.mubr.bf16.gmra.mrb[84].mxu0 %v10616_v60 }
 0x46f   : > { %8724 = vmatprep.mubr.msk.bf16.mxu0 %vm9702_vm2, %v11695_v16 }
 0x472   : > { %8981 = vmatmul.mubr.bf16.gmra.mrb[80].mxu1 %v9630_v8  ;;  %v4918_v8 = vsel %vm1994_vm1, %v4915_v21, %v4917_v31  ;;  %v4927_v21 = vrot.slane %v10677_v41, 1 }
 0x473   : > { %8984 = vmatprep.mubr.msk.bf16.mxu1 %vm9702_vm2, %v11695_v16 }
 0x476   : > { %8725 = vmatmul.mubr.bf16.gmra.mrb[88].mxu0 %v10641_v7 }
 0x477   : > { %8728 = vmatprep.mubr.msk.bf16.mxu0 %vm9702_vm2, %v11695_v16 }
 0x47a   : > { %8985 = vmatmul.mubr.bf16.gmra.mrb[84].mxu1 %v9633_v63  ;;  %v6563_v63 = vrot.slane %v10739_v38, 1  ;;  %v9658_v38 = vld [vmem:[%s11692_s5 + $0xf0] sm:$0xff]  }
 0x47b   : > { %8988 = vmatprep.mubr.msk.bf16.mxu1 %vm9702_vm2, %v11695_v16 }
 0x47c   : > { %v6564_v18 = vsel %vm1994_vm1, %v6561_v46, %v6563_v63 }
 0x47e   : > { %8729 = vmatmul.mubr.bf16.gmra.mrb[92].mxu0 %v10660_v37  ;;  %v4930_v37 = vsel %vm1994_vm1, %v4927_v21, %v4929_v50 }
 0x47f   : > { %8732 = vmatprep.mubr.msk.bf16.mxu0 %vm9702_vm2, %v11695_v16 }
 0x482   : > { %8989 = vmatmul.mubr.bf16.gmra.mrb[88].mxu1 %v9637_v14  ;;  %v4919_v14 = vrot.slane %v10574_v22, 1  ;;  %v9659_v22 = vld [vmem:[%s11692_s5 + $0xf8] sm:$0xff]  }
 0x483   : > { %8992 = vmatprep.mubr.msk.bf16.mxu1 %vm9702_vm2, %v11695_v16 }
 0x484   : > { %v4920_v0 = vsel %vm1994_vm1, %v4917_v31, %v4919_v14  ;;  %v9660_v31 = vld [vmem:[#allocation3 + $0x8] sm:$0xff]  }
 0x486   : > { %8733 = vmatmul.mubr.bf16.gmra.mrb[96].mxu0 %v10677_v41  ;;  %v9661_v41 = vld [vmem:[%s11692_s5 + $0x140] sm:$0xff]  }
 0x487   : > { %8752 = vmatprep.mubr.msk.bf16.mxu0 %vm9702_vm2, %v11695_v16 }
 0x48a   : > { %8993 = vmatmul.mubr.bf16.gmra.mrb[92].mxu1 %v9641_v35  ;;  %v6565_v35 = vrot.slane %v10755_v52, 1  ;;  %v4922_v52 = vsel %vm1994_vm1, %v4919_v14, %v4921_v48 }
 0x48b   : > { %9076 = vmatprep.mubr.msk.bf16.mxu1 %vm9702_vm2, %v11695_v16 }
 0x48c   : > { %v6566_v29 = vsel %vm1994_vm1, %v6563_v63, %v6565_v35  ;;  %v6568_v60 = vsel %vm1994_vm1, %v6565_v35, %v6567_v47  ;;  %v9662_v35 = vld [vmem:[#allocation3 + $0x10] sm:$0xff]  }
 0x48e   : > { %8753 = vmatmul.mubr.bf16.vlgmr.msra.gmra.mrb[100].mxu0 %v4914_v32 }
 0x48f   : > { %8789 = vmatpush3.bf16.msra.mxu0 %v9644_v57  ;;  %8756 = vmatprep.mubr.msk.bf16.mxu0 %vm9702_vm2, %v11695_v16  ;;  %v4923_v57 = vrot.slane %v10641_v7, 1 }
 0x490   : > { %8790 = vmatprep.subr.bf16.mxu0 %v11695_v16 }
 0x491   : > { %v4924_v32 = vsel %vm1994_vm1, %v4921_v48, %v4923_v57  ;;  %v4926_v7 = vsel %vm1994_vm1, %v4923_v57, %v4925_v27 }
 0x492   : > { %9077 = vmatmul.mubr.bf16.vlgmr.msra.gmra.mrb[96].mxu1 %v6560_v12  ;;  %v4928_v12 = vsel %vm1994_vm1, %v4925_v27, %v4927_v21 }
 0x493   : > { %8791 = vmatpush3.bf16.msra.mxu0 %v9648_v1  ;;  %9080 = vmatprep.mubr.msk.bf16.mxu1 %vm9702_vm2, %v11695_v16  ;;  %v6570_v1 = vsel %vm1994_vm1, %v6567_v47, %v6569_v45  ;;  %v9669_v45 = vld [vmem:[%s11692_s5 + $0x160] sm:$0xff]  }
 0x494   : > { %8792 = vmatprep.subr.bf16.mxu0 %v11695_v16 }
 0x496   : > { %8757 = vmatmul.mubr.bf16.gmra.mrb[104].mxu0 %v4916_v20 }
 0x497   : > { %8760 = vmatprep.mubr.msk.bf16.mxu0 %vm9702_vm2, %v11695_v16  ;;  %8793 = vmatpush3.bf16.msra.mxu0 %v9650_v6 }
 0x498   : > { %8794 = vmatprep.subr.bf16.mxu0 %v11695_v16 }
 0x49a   : > { %9081 = vmatmul.mubr.bf16.gmra.mrb[100].mxu1 %v6562_v56 }
 0x49b   : > { %8795 = vmatpush3.bf16.msra.mxu0 %v9652_v24  ;;  %9084 = vmatprep.mubr.msk.bf16.mxu1 %vm9702_vm2, %v11695_v16 }
 0x49c   : > { %8796 = vmatprep.subr.bf16.mxu0 %v11695_v16 }
 0x49e   : > { %8761 = vmatmul.mubr.bf16.gmra.mrb[108].mxu0 %v4918_v8 }
 0x49f   : > { %8764 = vmatprep.mubr.msk.bf16.mxu0 %vm9702_vm2, %v11695_v16  ;;  %8797 = vmatpush3.bf16.msra.mxu0 %v9654_v19  ;;  %v9663_v19 = vld [vmem:[%s11692_s5 + $0x148] sm:$0xff]  }
 0x4a0   : > { %8798 = vmatprep.subr.bf16.mxu0 %v11695_v16 }
 0x4a2   : > { %9085 = vmatmul.mubr.bf16.gmra.mrb[104].mxu1 %v6564_v18 }
 0x4a3   : > { %8799 = vmatpush3.bf16.msra.mxu0 %v9656_v54  ;;  %9088 = vmatprep.mubr.msk.bf16.mxu1 %vm9702_vm2, %v11695_v16 }
 0x4a4   : > { %8800 = vmatprep.subr.bf16.mxu0 %v11695_v16 }
 0x4a6   : > { %8765 = vmatmul.mubr.bf16.gmra.mrb[112].mxu0 %v4920_v0 }
 0x4a7   : > { %8768 = vmatprep.mubr.msk.bf16.mxu0 %vm9702_vm2, %v11695_v16  ;;  %8801 = vmatpush3.bf16.msra.mxu0 %v9658_v38  ;;  %v9665_v38 = vld [vmem:[%s11692_s5 + $0x150] sm:$0xff]  }
 0x4a8   : > { %8802 = vmatprep.subr.bf16.mxu0 %v11695_v16 }
 0x4aa   : > { %9089 = vmatmul.mubr.bf16.gmra.mrb[108].mxu1 %v6566_v29  ;;  %v9667_v29 = vld [vmem:[%s11692_s5 + $0x158] sm:$0xff]  }
 0x4ab   : > { %8803 = vmatpush3.bf16.msra.mxu0 %v9659_v22  ;;  %9092 = vmatprep.mubr.msk.bf16.mxu1 %vm9702_vm2, %v11695_v16 }
 0x4ac   : > { %8892 = vmatprep.subr.bf16.mxu0 %v11695_v16 }
 0x4ae   : > { %8769 = vmatmul.mubr.bf16.gmra.mrb[116].mxu0 %v4922_v52 }
 0x4af   : > { %8772 = vmatprep.mubr.msk.bf16.mxu0 %vm9702_vm2, %v11695_v16 }
 0x4b2   : > { %9093 = vmatmul.mubr.bf16.gmra.mrb[112].mxu1 %v6568_v60 }
 0x4b3   : > { %9096 = vmatprep.mubr.msk.bf16.mxu1 %vm9702_vm2, %v11695_v16 }
 0x4b6   : > { %8773 = vmatmul.mubr.bf16.gmra.mrb[120].mxu0 %v4924_v32 }
 0x4b7   : > { %8776 = vmatprep.mubr.msk.bf16.mxu0 %vm9702_vm2, %v11695_v16 }
 0x4ba   : > { %9097 = vmatmul.mubr.bf16.gmra.mrb[116].mxu1 %v6570_v1  ;;  %v9664_v1 = vld [vmem:[#allocation3 + $0x18] sm:$0xff]  }
 0x4be   : > { %8777 = vmatmul.mubr.bf16.gmra.mrb[124].mxu0 %v4926_v7 }
 0x4bf   : > { %8780 = vmatprep.mubr.msk.bf16.mxu0 %vm9702_vm2, %v11695_v16 }
 0x4c6   : > { %8781 = vmatmul.mubr.bf16.gmra.mrb[128].mxu0 %v4928_v12  ;;  %v9671_v12 = vld [vmem:[%s11692_s5 + $0x168] sm:$0xff]  }
 0x4c7   : > { %8784 = vmatprep.mubr.msk.bf16.mxu0 %vm9702_vm2, %v11695_v16 }
 0x4ce   : > { %8785 = vmatmul.mubr.bf16.gmra.mrb[132].mxu0 %v4930_v37 }
 0x4cf   : > { %8804 = vmatprep.mubr.msk.bf16.mxu0 %vm9702_vm2, %v11695_v16 }
 0x4d1   : > { %v11045_v6 = vpop.f32.mrb[28].mxu0 }
 0x4d2   : > { %v8650_v20 = vpop.f32.mrb[29].mxu0 }
 0x4d3   : > { %v11047_v46 = vpop.f32.mrb[30].mxu0 }
 0x4d4   : > { %v8651_v24 = vpop.f32.mrb[31].mxu0 }
 0x4d5   : > { %v11052_v56 = vpop.f32.mrb[24].mxu1 }
 0x4d6   : > { %8805 = vmatmul.mubr.bf16.vlgmr.msra.gmra.mrb[136].mxu0 %v9660_v31  ;;  %v8858_v15 = vpop.f32.mrb[25].mxu1  ;;  %v9673_v31 = vld [vmem:[%s11692_s5 + $0x170] sm:$0xff]  }
 0x4d7   : > { %8893 = vmatpush3.bf16.msra.mxu0 %v9661_v41  ;;  %8808 = vmatprep.mubr.msk.bf16.mxu0 %vm9702_vm2, %v11695_v16  ;;  %v11059_v8 = vpop.f32.mrb[26].mxu1 }
 0x4d8   : > { %8894 = vmatprep.subr.bf16.mxu0 %v11695_v16  ;;  %v8859_v54 = vpop.f32.mrb[27].mxu1 }
 0x4d9   : > { %v11062_v63 = vpop.f32.mrb[32].mxu0 }
 0x4da   : > { %v8654_v14 = vpop.f32.mrb[33].mxu0 }
 0x4db   : > { %v11064_v18 = vpop.f32.mrb[34].mxu0  ;;  %8895 = vmatpush3.bf16.msra.mxu0 %v9663_v19  ;;  %v9666_v19 = vld [vmem:[#allocation3 + $0x20] sm:$0xff]  }
 0x4dc   : > { %v8655_v0 = vpop.f32.mrb[35].mxu0  ;;  %8896 = vmatprep.subr.bf16.mxu0 %v11695_v16 }
 0x4dd   : > { %v11070_v22 = vpop.f32.mrb[28].mxu1 }
 0x4de   : > { %8809 = vmatmul.mubr.bf16.gmra.mrb[140].mxu0 %v9662_v35  ;;  %v8862_v48 = vpop.f32.mrb[29].mxu1 }
 0x4df   : > { %8812 = vmatprep.mubr.msk.bf16.mxu0 %vm9702_vm2, %v11695_v16  ;;  %8897 = vmatpush3.bf16.msra.mxu0 %v9665_v38  ;;  %v11077_v52 = vpop.f32.mrb[30].mxu1  ;;  %v9676_v38 = vld [vmem:[%s11692_s5 + $0x178] sm:$0xff]  }
 0x4e0   : > { %8898 = vmatprep.subr.bf16.mxu0 %v11695_v16  ;;  %v8863_v57 = vpop.f32.mrb[31].mxu1 }
 0x4e1   : > { %v11080_v47 = vpop.f32.mrb[36].mxu0 }
 0x4e2   : > { %v8658_v60 = vpop.f32.mrb[37].mxu0 }
 0x4e3   : > { %v11082_v32 = vpop.f32.mrb[38].mxu0  ;;  %8899 = vmatpush3.bf16.msra.mxu0 %v9667_v29 }
 0x4e4   : > { %v8659_v27 = vpop.f32.mrb[39].mxu0  ;;  %8900 = vmatprep.subr.bf16.mxu0 %v11695_v16 }
 0x4e5   : > { %v11088_v7 = vpop.f32.mrb[32].mxu1 }
 0x4e6   : > { %8813 = vmatmul.mubr.bf16.gmra.mrb[144].mxu0 %v9664_v1  ;;  %v8866_v21 = vpop.f32.mrb[33].mxu1 }
 0x4e7   : > { %8816 = vmatprep.mubr.msk.bf16.mxu0 %vm9702_vm2, %v11695_v16  ;;  %8901 = vmatpush3.bf16.msra.mxu0 %v9669_v45  ;;  %v11095_v50 = vpop.f32.mrb[34].mxu1  ;;  %v9668_v45 = vld [vmem:[#allocation3 + $0x28] sm:$0xff]  }
 0x4e8   : > { %11697 = vst [vmem:[#allocation4_spill] sm:$0xff] %v11095_v50  ;;  %8902 = vmatprep.subr.bf16.mxu0 %v11695_v16  ;;  %v8867_v20 = vpop.f32.mrb[35].mxu1 }
 0x4e9   : > { %v11098_v37 = vpop.f32.mrb[40].mxu0 }
 0x4ea   : > { %v8662_v41 = vpop.f32.mrb[41].mxu0 }
 0x4eb   : > { %v11100_v24 = vpop.f32.mrb[42].mxu0  ;;  %8903 = vmatpush3.bf16.msra.mxu0 %v9671_v12 }
 0x4ec   : > { %v8663_v15 = vpop.f32.mrb[43].mxu0  ;;  %8904 = vmatprep.subr.bf16.mxu0 %v11695_v16 }
 0x4ed   : > { %v11106_v54 = vpop.f32.mrb[36].mxu1 }
 0x4ee   : > { %8817 = vmatmul.mubr.bf16.gmra.mrb[148].mxu0 %v9666_v19  ;;  %11698 = vst [vmem:[#allocation5_spill] sm:$0xff] %v11106_v54  ;;  %v8870_v14 = vpop.f32.mrb[37].mxu1  ;;  %v9670_v19 = vld [vmem:[#allocation3 + $0x30] sm:$0xff]  }
 0x4ef   : > { %8820 = vmatprep.mubr.msk.bf16.mxu0 %vm9702_vm2, %v11695_v16  ;;  %8905 = vmatpush3.bf16.msra.mxu0 %v9673_v31  ;;  %v11113_v0 = vpop.f32.mrb[38].mxu1 }
 0x4f0   : > { %11699 = vst [vmem:[#allocation6_spill] sm:$0xff] %v11113_v0  ;;  %8906 = vmatprep.subr.bf16.mxu0 %v11695_v16  ;;  %v8871_v48 = vpop.f32.mrb[39].mxu1 }
 0x4f1   : > { %v11116_v35 = vpop.f32.mrb[44].mxu0 }
 0x4f2   : > { %v8666_v29 = vpop.f32.mrb[45].mxu0 }
 0x4f3   : > { %v11118_v57 = vpop.f32.mrb[46].mxu0  ;;  %8907 = vmatpush3.bf16.msra.mxu0 %v9676_v38 }
 0x4f4   : > { %v8667_v60 = vpop.f32.mrb[47].mxu0  ;;  %8996 = vmatprep.subr.bf16.mxu0 %v11695_v16 }
 0x4f5   : > { %v11121_v27 = vpop.f32.mrb[40].mxu1 }
 0x4f6   : > { %8821 = vmatmul.mubr.bf16.gmra.mrb[152].mxu0 %v9668_v45  ;;  %11700 = vst [vmem:[#allocation7_spill] sm:$0xff] %v11121_v27  ;;  %v8874_v1 = vpop.f32.mrb[41].mxu1 }
 0x4f7   : > { %8824 = vmatprep.mubr.msk.bf16.mxu0 %vm9702_vm2, %v11695_v16  ;;  %v11125_v21 = vpop.f32.mrb[42].mxu1 }
 0x4f8   : > { %11701 = vst [vmem:[#allocation8_spill] sm:$0xff] %v11125_v21  ;;  %v8875_v20 = vpop.f32.mrb[43].mxu1 }
 0x4f9   : > { %v11127_v12 = vpop.f32.mrb[48].mxu0 }
 0x4fa   : > { %v8670_v41 = vpop.f32.mrb[49].mxu0 }
 0x4fb   : > { %v11129_v31 = vpop.f32.mrb[50].mxu0  ;;  %v9672_v41 = vld [vmem:[#allocation3 + $0x38] sm:$0xff]  }
 0x4fc   : > { %v8671_v15 = vpop.f32.mrb[51].mxu0 }
 0x4fd   : > { %v11131_v14 = vpop.f32.mrb[44].mxu1 }
 0x4fe   : > { %8825 = vmatmul.mubr.bf16.gmra.mrb[156].mxu0 %v9670_v19  ;;  %11702 = vst [vmem:[#allocation9_spill] sm:$0xff] %v11131_v14  ;;  %v8878_v38 = vpop.f32.mrb[45].mxu1 }
 0x4ff   : > { %8828 = vmatprep.mubr.msk.bf16.mxu0 %vm9702_vm2, %v11695_v16  ;;  %v11135_v48 = vpop.f32.mrb[46].mxu1 }
 0x500   : > { %11703 = vst [vmem:[#allocation10_spill] sm:$0xff] %v11135_v48  ;;  %v8879_v60 = vpop.f32.mrb[47].mxu1 }
 0x501   : > { %v11137_v29 = vpop.f32.mrb[52].mxu0 }
 0x502   : > { %v8674_v45 = vpop.f32.mrb[53].mxu0 }
 0x503   : > { %v11139_v1 = vpop.f32.mrb[54].mxu0  ;;  %v9674_v45 = vld [vmem:[#allocation3 + $0x40] sm:$0xff]  }
 0x504   : > { %v8675_v20 = vpop.f32.mrb[55].mxu0 }
 0x505   : > { %v11141_v15 = vpop.f32.mrb[48].mxu1 }
 0x506   : > { %8829 = vmatmul.mubr.bf16.gmra.mrb[160].mxu0 %v9672_v41  ;;  %11704 = vst [vmem:[#allocation11_spill] sm:$0xff] %v11141_v15  ;;  %v8882_v19 = vpop.f32.mrb[49].mxu1 }
 0x507   : > { %8832 = vmatprep.mubr.msk.bf16.mxu0 %vm9702_vm2, %v11695_v16  ;;  %v11145_v38 = vpop.f32.mrb[50].mxu1 }
 0x508   : > { %11705 = vst [vmem:[#allocation12_spill] sm:$0xff] %v11145_v38  ;;  %v8883_v48 = vpop.f32.mrb[51].mxu1 }
 0x509   : > { %v11147_v14 = vpop.f32.mrb[56].mxu0  ;;  %v9675_v48 = vld [vmem:[#allocation3 + $0x48] sm:$0xff]  }
 0x50a   : > { %v8678_v21 = vpop.f32.mrb[57].mxu0 }
 0x50b   : > { %v11149_v27 = vpop.f32.mrb[58].mxu0 }
 0x50c   : > { %v8679_v60 = vpop.f32.mrb[59].mxu0 }
 0x50d   : > { %v11151_v20 = vpop.f32.mrb[52].mxu1 }
 0x50e   : > { %8833 = vmatmul.mubr.bf16.gmra.mrb[164].mxu0 %v9674_v45  ;;  %11706 = vst [vmem:[#allocation13_spill] sm:$0xff] %v11151_v20  ;;  %v8886_v41 = vpop.f32.mrb[53].mxu1 }
 0x50f   : > { %8836 = vmatprep.mubr.msk.bf16.mxu0 %vm9702_vm2, %v11695_v16  ;;  %v11155_v19 = vpop.f32.mrb[54].mxu1 }
 0x510   : > { %11707 = vst [vmem:[#allocation14_spill] sm:$0xff] %v11155_v19  ;;  %v8887_v38 = vpop.f32.mrb[55].mxu1 }
 0x511   : > { %v11157_v15 = vpop.f32.mrb[60].mxu0 }
 0x512   : > { %v8682_v0 = vpop.f32.mrb[61].mxu0 }
 0x513   : > { %v11159_v54 = vpop.f32.mrb[62].mxu0 }
 0x514   : > { %v8683_v21 = vpop.f32.mrb[63].mxu0 }
 0x515   : > { %v11161_v60 = vpop.f32.mrb[56].mxu1  ;;  %v9678_v21 = vld [vmem:[%s11692_s5 + $0x1c0] sm:$0xff]  }
 0x516   : > { %8837 = vmatmul.mubr.bf16.gmra.mrb[168].mxu0 %v9675_v48  ;;  %v8890_v45 = vpop.f32.mrb[57].mxu1 }
 0x517   : > { %8908 = vmatprep.mubr.msk.bf16.mxu0 %vm9702_vm2, %v11695_v16  ;;  %v11165_v41 = vpop.f32.mrb[58].mxu1 }
 0x518   : > { %11708 = vst [vmem:[#allocation15_spill] sm:$0xff] %v11165_v41  ;;  %v8891_v50 = vpop.f32.mrb[59].mxu1 }
 0x519   : > { %v4820_v20 = vpop.f32.mrb[64].mxu0  ;;  %v11710_v50 = vmov 0.0  }
 0x51a   : > { %v11168_v19 = vadd.f32 %v4820_v20, %v11045_v6  ;;  %v8702_v38 = vpop.f32.mrb[65].mxu0  ;;  %v9679_v6 = vld [vmem:[%s11692_s5 + $0x1c8] sm:$0xff]  }
 0x51b   : > { %v4823_v0 = vpop.f32.mrb[66].mxu0 }
 0x51c   : > { %v11174_v48 = vadd.f32 %v4823_v0, %v11047_v46  ;;  %v8703_v45 = vpop.f32.mrb[67].mxu0 }
 0x51d   : > { %v11177_v16 = vpop.f32.mrb[60].mxu1 }
 0x51e   : > { %8909 = vmatmul.mubr.bf16.vlgmr.msra.gmra.mrb[172].mxu0 %v10692_v33  ;;  %11709 = vst [vmem:[#allocation16_spill] sm:$0xff] %v11177_v16  ;;  %v8962_v41 = vpop.f32.mrb[61].mxu1 }
 0x51f   : > { %8997 = vmatpush3.bf16.msra.mxu0 %v9678_v21  ;;  %8912 = vmatprep.mubr.msk.bf16.mxu0 %vm9702_vm2, %v11710_v50  ;;  %v11184_v20 = vpop.f32.mrb[62].mxu1  ;;  %v9680_v41 = vld [vmem:[%s11692_s5 + $0x1d0] sm:$0xff]  }
 0x520   : > { %11711 = vst [vmem:[#allocation17_spill] sm:$0xff] %v11184_v20  ;;  %8998 = vmatprep.subr.bf16.mxu0 %v11710_v50  ;;  %v8963_v38 = vpop.f32.mrb[63].mxu1 }
 0x521   : > { %v4828_v46 = vpop.f32.mrb[68].mxu0 }
 0x522   : > { %v11188_v0 = vadd.f32 %v4828_v46, %v11062_v63  ;;  %v8706_v33 = vpop.f32.mrb[69].mxu0  ;;  %v9681_v63 = vld [vmem:[%s11692_s5 + $0x1d8] sm:$0xff]  }
 0x523   : > { %v4831_v45 = vpop.f32.mrb[70].mxu0  ;;  %8999 = vmatpush3.bf16.msra.mxu0 %v9679_v6 }
 0x524   : > { %v11194_v21 = vadd.f32 %v4831_v45, %v11064_v18  ;;  %v8707_v16 = vpop.f32.mrb[71].mxu0  ;;  %9000 = vmatprep.subr.bf16.mxu0 %v11710_v50  ;;  %v9682_v45 = vld [vmem:[%s11692_s5 + $0x1e0] sm:$0xff]  }
 0x525   : > { %v11198_v20 = vpop.f32.mrb[64].mxu1 }
 0x526   : > { %8913 = vmatmul.mubr.bf16.gmra.mrb[176].mxu0 %v10697_v39  ;;  %v8966_v38 = vpop.f32.mrb[65].mxu1 }
 0x527   : > { %8916 = vmatprep.mubr.msk.bf16.mxu0 %vm9702_vm2, %v11710_v50  ;;  %9001 = vmatpush3.bf16.msra.mxu0 %v9680_v41  ;;  %v11205_v6 = vpop.f32.mrb[66].mxu1 }
 0x528   : > { %11712 = vst [vmem:[#allocation18_spill] sm:$0xff] %v11205_v6  ;;  %9002 = vmatprep.subr.bf16.mxu0 %v11710_v50  ;;  %v8967_v18 = vpop.f32.mrb[67].mxu1 }
 0x529   : > { %v4836_v16 = vpop.f32.mrb[72].mxu0 }
 0x52a   : > { %v11209_v46 = vadd.f32 %v4836_v16, %v11080_v47  ;;  %v8710_v39 = vpop.f32.mrb[73].mxu0  ;;  %v9683_v47 = vld [vmem:[%s11692_s5 + $0x1e8] sm:$0xff]  }
 0x52b   : > { %v4839_v33 = vpop.f32.mrb[74].mxu0  ;;  %9003 = vmatpush3.bf16.msra.mxu0 %v9681_v63 }
 0x52c   : > { %v11215_v41 = vadd.f32 %v4839_v33, %v11082_v32  ;;  %v8711_v38 = vpop.f32.mrb[75].mxu0  ;;  %9004 = vmatprep.subr.bf16.mxu0 %v11710_v50 }
 0x52d   : > { %v11219_v6 = vpop.f32.mrb[68].mxu1 }
 0x52e   : > { %8917 = vmatmul.mubr.bf16.gmra.mrb[180].mxu0 %v10705_v17  ;;  %v8970_v18 = vpop.f32.mrb[69].mxu1 }
 0x52f   : > { %8920 = vmatprep.mubr.msk.bf16.mxu0 %vm9702_vm2, %v11710_v50  ;;  %9005 = vmatpush3.bf16.msra.mxu0 %v9682_v45  ;;  %v11226_v63 = vpop.f32.mrb[70].mxu1  ;;  %v9684_v45 = vld [vmem:[%s11692_s5 + $0x1f0] sm:$0xff]  }
 0x530   : > { %11713 = vst [vmem:[#allocation19_spill] sm:$0xff] %v11226_v63  ;;  %9006 = vmatprep.subr.bf16.mxu0 %v11710_v50  ;;  %v8971_v16 = vpop.f32.mrb[71].mxu1 }
 0x531   : > { %v4844_v32 = vpop.f32.mrb[76].mxu0 }
 0x532   : > { %v11230_v39 = vadd.f32 %v4844_v32, %v11098_v37  ;;  %v8714_v17 = vpop.f32.mrb[77].mxu0  ;;  %v9685_v37 = vld [vmem:[%s11692_s5 + $0x1f8] sm:$0xff]  }
 0x533   : > { %v4847_v33 = vpop.f32.mrb[78].mxu0  ;;  %9007 = vmatpush3.bf16.msra.mxu0 %v9683_v47 }
 0x534   : > { %v11236_v38 = vadd.f32 %v4847_v33, %v11100_v24  ;;  %v8715_v18 = vpop.f32.mrb[79].mxu0  ;;  %9008 = vmatprep.subr.bf16.mxu0 %v11710_v50 }
 0x535   : > { %v11240_v63 = vpop.f32.mrb[72].mxu1 }
 0x536   : > { %8921 = vmatmul.mubr.bf16.gmra.mrb[184].mxu0 %v10712_v42  ;;  %v8974_v16 = vpop.f32.mrb[73].mxu1 }
 0x537   : > { %8924 = vmatprep.mubr.msk.bf16.mxu0 %vm9702_vm2, %v11710_v50  ;;  %9009 = vmatpush3.bf16.msra.mxu0 %v9684_v45  ;;  %v11247_v47 = vpop.f32.mrb[74].mxu1 }
 0x538   : > { %11714 = vst [vmem:[#allocation20_spill] sm:$0xff] %v11247_v47  ;;  %9010 = vmatprep.subr.bf16.mxu0 %v11710_v50  ;;  %v8975_v32 = vpop.f32.mrb[75].mxu1 }
 0x539   : > { %v4852_v24 = vpop.f32.mrb[80].mxu0 }
 0x53a   : > { %v11251_v17 = vadd.f32 %v4852_v24, %v11116_v35  ;;  %v8718_v42 = vpop.f32.mrb[81].mxu0 }
 0x53b   : > { %v4855_v33 = vpop.f32.mrb[82].mxu0  ;;  %9011 = vmatpush3.bf16.msra.mxu0 %v9685_v37 }
 0x53c   : > { %v11254_v18 = vadd.f32 %v4855_v33, %v11118_v57  ;;  %v8719_v45 = vpop.f32.mrb[83].mxu0  ;;  %9048 = vmatprep.subr.bf16.mxu0 %v11710_v50 }
 0x53d   : > { %v11258_v16 = vpop.f32.mrb[76].mxu1 }
 0x53e   : > { %8925 = vmatmul.mubr.bf16.gmra.mrb[188].mxu0 %v10721_v28  ;;  %11715 = vst [vmem:[#allocation21_spill] sm:$0xff] %v11258_v16  ;;  %v8978_v47 = vpop.f32.mrb[77].mxu1 }
 0x53f   : > { %8928 = vmatprep.mubr.msk.bf16.mxu0 %vm9702_vm2, %v11710_v50  ;;  %v11262_v32 = vpop.f32.mrb[78].mxu1 }
 0x540   : > { %11716 = vst [vmem:[#allocation22_spill] sm:$0xff] %v11262_v32  ;;  %v8979_v24 = vpop.f32.mrb[79].mxu1 }
 0x541   : > { %v4860_v35 = vpop.f32.mrb[84].mxu0 }
 0x542   : > { %v11265_v37 = vadd.f32 %v4860_v35, %v11127_v12  ;;  %v8722_v57 = vpop.f32.mrb[85].mxu0 }
 0x543   : > { %v4863_v42 = vpop.f32.mrb[86].mxu0 }
 0x544   : > { %v11268_v33 = vadd.f32 %v4863_v42, %v11129_v31  ;;  %v8723_v45 = vpop.f32.mrb[87].mxu0 }
 0x545   : > { %v11271_v28 = vpop.f32.mrb[80].mxu1 }
 0x546   : > { %8929 = vmatmul.mubr.bf16.gmra.mrb[192].mxu0 %v10724_v9  ;;  %11717 = vst [vmem:[#allocation23_spill] sm:$0xff] %v11271_v28  ;;  %v8982_v47 = vpop.f32.mrb[81].mxu1 }
 0x547   : > { %8932 = vmatprep.mubr.msk.bf16.mxu0 %vm9702_vm2, %v11710_v50  ;;  %v11275_v32 = vpop.f32.mrb[82].mxu1 }
 0x548   : > { %11718 = vst [vmem:[#allocation24_spill] sm:$0xff] %v11275_v32  ;;  %v8983_v16 = vpop.f32.mrb[83].mxu1 }
 0x549   : > { %v4868_v24 = vpop.f32.mrb[88].mxu0 }
 0x54a   : > { %v11278_v12 = vadd.f32 %v4868_v24, %v11137_v29  ;;  %v8726_v35 = vpop.f32.mrb[89].mxu0 }
 0x54b   : > { %v4871_v57 = vpop.f32.mrb[90].mxu0  ;;  %v6191_v35 = vld [vmem:[#allocation3 + $0x10] sm:$0xf] }
 0x54c   : > { %v11281_v31 = vadd.f32 %v4871_v57, %v11139_v1  ;;  %v8727_v42 = vpop.f32.mrb[91].mxu0 }
 0x54d   : > { %v11284_v9 = vpop.f32.mrb[84].mxu1  ;;  %v7488_v42 = vcombine.low %v6191_v35, %v10775_v62 }
 0x54e   : > { %8933 = vmatmul.mubr.bf16.gmra.mrb[196].mxu0 %v10729_v23  ;;  %11719 = vst [vmem:[#allocation25_spill] sm:$0xff] %v11284_v9  ;;  %v8986_v45 = vpop.f32.mrb[85].mxu1 }
 0x54f   : > { %8936 = vmatprep.mubr.msk.bf16.mxu0 %vm9702_vm2, %v11710_v50  ;;  %v11288_v47 = vpop.f32.mrb[86].mxu1 }
 0x550   : > { %11720 = vst [vmem:[#allocation26_spill] sm:$0xff] %v11288_v47  ;;  %v8987_v32 = vpop.f32.mrb[87].mxu1 }
 0x551   : > { %v4876_v16 = vpop.f32.mrb[92].mxu0 }
 0x552   : > { %v11291_v29 = vadd.f32 %v4876_v16, %v11147_v14  ;;  %v8730_v24 = vpop.f32.mrb[93].mxu0 }
 0x553   : > { %v4879_v1 = vpop.f32.mrb[94].mxu0  ;;  %v6278_v24 = vshll.u32 %v7488_v42, 16 }
 0x554   : > { %v11294_v57 = vadd.f32 %v4879_v1, %v11149_v27  ;;  %v8731_v23 = vpop.f32.mrb[95].mxu0 }
 0x555   : > { %v11298_v45 = vpop.f32.mrb[88].mxu1  ;;  %v6280_v35 = vrot.slane %v6278_v24, 1 }
 0x556   : > { %8937 = vmatmul.mubr.bf16.gmra.mrb[200].mxu0 %v10732_v25  ;;  %11721 = vst [vmem:[#allocation27_spill] sm:$0xff] %v11298_v45  ;;  %v8990_v9 = vpop.f32.mrb[89].mxu1 }
 0x557   : > { %8940 = vmatprep.mubr.msk.bf16.mxu0 %vm9702_vm2, %v11710_v50  ;;  %v11302_v32 = vpop.f32.mrb[90].mxu1 }
 0x558   : > { %11722 = vst [vmem:[#allocation28_spill] sm:$0xff] %v11302_v32  ;;  %v8991_v16 = vpop.f32.mrb[91].mxu1  ;;  %v6283_v32 = vshll.u32 %v10766_v58, 16 }
 0x559   : > { %v4884_v14 = vpop.f32.mrb[96].mxu0  ;;  %v6276_v16 = vshrl.u32 %v7488_v42, 16  ;;  %v6291_v42 = vshll.u32 %v10768_v2, 16 }
 0x55a   : > { %v11305_v47 = vadd.f32 %v4884_v14, %v11157_v15  ;;  %v8734_v27 = vpop.f32.mrb[97].mxu0 }
 0x55b   : > { %v4887_v1 = vpop.f32.mrb[98].mxu0  ;;  %v6281_v45 = vor.u32 %v6280_v35, %v6276_v16  ;;  %v6287_v16 = vshrl.u32 %v10766_v58, 16 }
 0x55c   : > { %v11308_v62 = vadd.f32 %v4887_v1, %v11159_v54  ;;  %v8735_v25 = vpop.f32.mrb[99].mxu0 }
 0x55d   : > { %v11311_v9 = vpop.f32.mrb[92].mxu1 }
 0x55e   : > { %8941 = vmatmul.mubr.bf16.gmra.mrb[204].mxu0 %v10735_v26  ;;  %11723 = vst [vmem:[#allocation29_spill] sm:$0xff] %v11311_v9  ;;  %v8994_v23 = vpop.f32.mrb[93].mxu1  ;;  %v6285_v26 = vrot.slane %v6283_v32, 1 }
 0x55f   : > { %9012 = vmatprep.mubr.msk.bf16.mxu0 %vm9702_vm2, %v11710_v50  ;;  %v11316_v15 = vpop.f32.mrb[94].mxu1 }
 0x560   : > { %v8995_v27 = vpop.f32.mrb[95].mxu1  ;;  %v6286_v9 = vsel %vm1494_vm0, %v6281_v45, %v6285_v26  ;;  %v6293_v45 = vrot.slane %v6291_v42, 1 }
 0x561   : > { %v5022_v14 = vpop.f32.mrb[100].mxu0  ;;  %v6289_v27 = vor.u32 %v6287_v16, %v6285_v26 }
 0x562   : > { %v11319_v54 = vadd.f32 %v5022_v14, %v11168_v19  ;;  %v8754_v24 = vpop.f32.mrb[101].mxu0 }
 0x563   : > { %v5025_v1 = vpop.f32.mrb[102].mxu0 }
 0x564   : > { %v11322_v25 = vadd.f32 %v5025_v1, %v11174_v48  ;;  %v8755_v23 = vpop.f32.mrb[103].mxu0  ;;  %v6294_v1 = vsel %vm1494_vm0, %v6289_v27, %v6293_v45 }
 0x565   : > { %v11326_v28 = vpop.f32.mrb[96].mxu1 }
 0x566   : > { %9013 = vmatmul.mubr.bf16.vlgmr.msra.gmra.mrb[208].mxu0 %v6286_v9  ;;  %v9078_v35 = vpop.f32.mrb[97].mxu1 }
 0x567   : > { %9049 = vmatpush3.bf16.msra.mxu0 %v10834_v34  ;;  %9016 = vmatprep.mubr.msk.bf16.mxu0 %vm9702_vm2, %v11710_v50  ;;  %v11331_v19 = vpop.f32.mrb[98].mxu1 }
 0x568   : > { %9050 = vmatprep.subr.bf16.mxu0 %v11710_v50  ;;  %v9079_v32 = vpop.f32.mrb[99].mxu1 }
 0x569   : > { %v5030_v48 = vpop.f32.mrb[104].mxu0 }
 0x56a   : > { %v11336_v2 = vadd.f32 %v5030_v48, %v11188_v0  ;;  %v8758_v9 = vpop.f32.mrb[105].mxu0  ;;  %v9691_v0 = vld [vmem:[#allocation3 + $0x20] sm:$0xff]  }
 0x56b   : > { %v5033_v14 = vpop.f32.mrb[106].mxu0  ;;  %9051 = vmatpush3.bf16.msra.mxu0 %v10846_v43  ;;  %v6295_v42 = vshrl.u32 %v9691_v0, 16 }
 0x56c   : > { %v11340_v34 = vadd.f32 %v5033_v14, %v11194_v21  ;;  %v8759_v24 = vpop.f32.mrb[107].mxu0  ;;  %9052 = vmatprep.subr.bf16.mxu0 %v11710_v50 }
 0x56d   : > { %v11344_v23 = vpop.f32.mrb[100].mxu1  ;;  %v6297_v35 = vor.u32 %v6295_v42, %v6293_v45 }
 0x56e   : > { %9017 = vmatmul.mubr.bf16.gmra.mrb[212].mxu0 %v6294_v1  ;;  %v9082_v58 = vpop.f32.mrb[101].mxu1 }
 0x56f   : > { %9020 = vmatprep.mubr.msk.bf16.mxu0 %vm9702_vm2, %v11710_v50  ;;  %9053 = vmatpush3.bf16.msra.mxu0 %v10860_v49  ;;  %v11349_v43 = vpop.f32.mrb[102].mxu1  ;;  %v6302_v49 = vsel %vm1494_vm0, %v6297_v35, %v10748_v59 }
 0x570   : > { %9054 = vmatprep.subr.bf16.mxu0 %v11710_v50  ;;  %v9083_v26 = vpop.f32.mrb[103].mxu1 }
 0x571   : > { %v5038_v21 = vpop.f32.mrb[108].mxu0 }
 0x572   : > { %v11353_v48 = vadd.f32 %v5038_v21, %v11209_v46  ;;  %v8762_v32 = vpop.f32.mrb[109].mxu0 }
 0x573   : > { %v5041_v16 = vpop.f32.mrb[110].mxu0  ;;  %9055 = vmatpush3.bf16.msra.mxu0 %v10873_v36 }
 0x574   : > { %v11357_v9 = vadd.f32 %v5041_v16, %v11215_v41  ;;  %v8763_v14 = vpop.f32.mrb[111].mxu0  ;;  %9056 = vmatprep.subr.bf16.mxu0 %v11710_v50 }
 0x575   : > { %v11362_v27 = vpop.f32.mrb[104].mxu1 }
 0x576   : > { %9021 = vmatmul.mubr.bf16.gmra.mrb[216].mxu0 %v6302_v49  ;;  %v9086_v45 = vpop.f32.mrb[105].mxu1 }
 0x577   : > { %9024 = vmatprep.mubr.msk.bf16.mxu0 %vm9702_vm2, %v11710_v50  ;;  %9057 = vmatpush3.bf16.msra.mxu0 %v10887_v5  ;;  %v11367_v46 = vpop.f32.mrb[106].mxu1 }
 0x578   : > { %9058 = vmatprep.subr.bf16.mxu0 %v11710_v50  ;;  %v9087_v41 = vpop.f32.mrb[107].mxu1 }
 0x579   : > { %v5046_v36 = vpop.f32.mrb[112].mxu0 }
 0x57a   : > { %v11371_v24 = vadd.f32 %v5046_v36, %v11230_v39  ;;  %v8766_v1 = vpop.f32.mrb[113].mxu0 }
 0x57b   : > { %v5049_v59 = vpop.f32.mrb[114].mxu0  ;;  %9059 = vmatpush3.bf16.msra.mxu0 %v10900_v55 }
 0x57c   : > { %v11375_v58 = vadd.f32 %v5049_v59, %v11236_v38  ;;  %v8767_v0 = vpop.f32.mrb[115].mxu0  ;;  %9060 = vmatprep.subr.bf16.mxu0 %v11710_v50 }
 0x57d   : > { %v11379_v5 = vpop.f32.mrb[108].mxu1 }
 0x57e   : > { %9025 = vmatmul.mubr.bf16.gmra.mrb[220].mxu0 %v10771_v3  ;;  %v9090_v42 = vpop.f32.mrb[109].mxu1 }
 0x57f   : > { %9028 = vmatprep.mubr.msk.bf16.mxu0 %vm9702_vm2, %v11710_v50  ;;  %9061 = vmatpush3.bf16.msra.mxu0 %v10914_v40  ;;  %v11384_v39 = vpop.f32.mrb[110].mxu1 }
 0x580   : > { %9062 = vmatprep.subr.bf16.mxu0 %v11710_v50  ;;  %v9091_v38 = vpop.f32.mrb[111].mxu1 }
 0x581   : > { %v5054_v55 = vpop.f32.mrb[116].mxu0 }
 0x582   : > { %v11388_v21 = vadd.f32 %v5054_v55, %v11251_v17  ;;  %v8770_v26 = vpop.f32.mrb[117].mxu0 }
 0x583   : > { %v5057_v35 = vpop.f32.mrb[118].mxu0  ;;  %9063 = vmatpush3.bf16.msra.mxu0 %v10924_v4 }
 0x584   : > { %v11392_v3 = vadd.f32 %v5057_v35, %v11254_v18  ;;  %v8771_v32 = vpop.f32.mrb[119].mxu0 }
 0x585   : > { %v11395_v40 = vpop.f32.mrb[112].mxu1 }
 0x586   : > { %9029 = vmatmul.mubr.bf16.gmra.mrb[224].mxu0 %v10778_v11  ;;  %v9094_v16 = vpop.f32.mrb[113].mxu1 }
 0x587   : > { %9032 = vmatprep.mubr.msk.bf16.mxu0 %vm9702_vm2, %v11710_v50  ;;  %v11399_v14 = vpop.f32.mrb[114].mxu1 }
 0x588   : > { %v9095_v49 = vpop.f32.mrb[115].mxu1 }
 0x589   : > { %v5062_v17 = vpop.f32.mrb[120].mxu0 }
 0x58a   : > { %v11402_v45 = vadd.f32 %v5062_v17, %v11265_v37  ;;  %v8774_v4 = vpop.f32.mrb[121].mxu0 }
 0x58b   : > { %v5065_v36 = vpop.f32.mrb[122].mxu0 }
 0x58c   : > { %v11405_v18 = vadd.f32 %v5065_v36, %v11268_v33  ;;  %v8775_v41 = vpop.f32.mrb[123].mxu0 }
 0x58d   : > { %v11408_v11 = vpop.f32.mrb[116].mxu1 }
 0x58e   : > { %9033 = vmatmul.mubr.bf16.gmra.mrb[228].mxu0 %v10784_v44  ;;  %v9098_v1 = vpop.f32.mrb[117].mxu1 }
 0x58f   : > { %9036 = vmatprep.mubr.msk.bf16.mxu0 %vm9702_vm2, %v11710_v50  ;;  %v11412_v59 = vpop.f32.mrb[118].mxu1 }
 0x590   : > { %v9099_v42 = vpop.f32.mrb[119].mxu1 }
 0x591   : > { %v5070_v0 = vpop.f32.mrb[124].mxu0 }
 0x592   : > { %v11415_v37 = vadd.f32 %v5070_v0, %v11278_v12  ;;  %v8778_v55 = vpop.f32.mrb[125].mxu0 }
 0x593   : > { %v5073_v38 = vpop.f32.mrb[126].mxu0 }
 0x594   : > { %v11418_v33 = vadd.f32 %v5073_v38, %v11281_v31  ;;  %v8779_v26 = vpop.f32.mrb[127].mxu0 }
 0x596   : > { %9037 = vmatmul.mubr.bf16.gmra.mrb[232].mxu0 %v10797_v61 }
 0x597   : > { %9040 = vmatprep.mubr.msk.bf16.mxu0 %vm9702_vm2, %v11710_v50 }
 0x599   : > { %v5078_v44 = vpop.f32.mrb[128].mxu0 }
 0x59a   : > { %v11424_v35 = vadd.f32 %v5078_v44, %v11291_v29  ;;  %v8782_v32 = vpop.f32.mrb[129].mxu0 }
 0x59b   : > { %v5081_v16 = vpop.f32.mrb[130].mxu0 }
 0x59c   : > { %v11427_v12 = vadd.f32 %v5081_v16, %v11294_v57  ;;  %v8783_v17 = vpop.f32.mrb[131].mxu0 }
 0x59e   : > { %9041 = vmatmul.mubr.bf16.gmra.mrb[236].mxu0 %v10810_v10 }
 0x59f   : > { %9044 = vmatprep.mubr.msk.bf16.mxu0 %vm9702_vm2, %v11710_v50 }
 0x5a1   : > { %v5086_v31 = vpop.f32.mrb[132].mxu0 }
 0x5a2   : > { %v11433_v61 = vadd.f32 %v5086_v31, %v11305_v47  ;;  %v8786_v49 = vpop.f32.mrb[133].mxu0 }
 0x5a3   : > { %v5089_v4 = vpop.f32.mrb[134].mxu0 }
 0x5a4   : > { %v11436_v29 = vadd.f32 %v5089_v4, %v11308_v62  ;;  %v8787_v36 = vpop.f32.mrb[135].mxu0 }
 0x5a5   : > { %v11725_v36 = vld [vmem:[#allocation5_spill] sm:$0xff] }
 0x5a6   : > { %9045 = vmatmul.mubr.bf16.gmra.mrb[240].mxu0 %v10816_v13 }
 0x5a7   : > { %9064 = vmatprep.mubr.msk.bf16.mxu0 %vm9702_vm2, %v11710_v50 }
 0x5a9   : > { %v5282_v57 = vpop.f32.mrb[136].mxu0 }
 0x5aa   : > { %v5353_v10 = vadd.f32 %v5282_v57, %v11319_v54  ;;  %v8806_v41 = vpop.f32.mrb[137].mxu0 }
 0x5ab   : > { %v5285_v1 = vpop.f32.mrb[138].mxu0 }
 0x5ac   : > { %v5354_v0 = vadd.f32 %v5285_v1, %v11322_v25  ;;  %v8807_v47 = vpop.f32.mrb[139].mxu0  ;;  %v11444_v42 = vadd.f32 %v11052_v56, %v5353_v10 }
 0x5ae   : > { %9065 = vmatmul.mubr.bf16.vlgmr.msra.gmra.mrb[244].mxu0 %v10813_v53  ;;  %v11448_v62 = vadd.f32 %v11059_v8, %v5354_v0 }
 0x5af   : > { %9068 = vmatprep.mubr.msk.bf16.mxu0 %vm9702_vm2, %v11710_v50 }
 0x5b1   : > { %v5290_v13 = vpop.f32.mrb[140].mxu0 }
 0x5b2   : > { %v5355_v55 = vadd.f32 %v5290_v13, %v11336_v2  ;;  %v8810_v54 = vpop.f32.mrb[141].mxu0 }
 0x5b3   : > { %v5293_v38 = vpop.f32.mrb[142].mxu0 }
 0x5b4   : > { %v5356_v26 = vadd.f32 %v5293_v38, %v11340_v34  ;;  %v8811_v25 = vpop.f32.mrb[143].mxu0  ;;  %v11455_v44 = vadd.f32 %v11070_v22, %v5355_v55  ;;  %v11728_v55 = vld [vmem:[#allocation8_spill] sm:$0xff] }
 0x5b6   : > { %9069 = vmatmul.mubr.bf16.gmra.mrb[248].mxu0 %v10800_v51  ;;  %v11459_v53 = vadd.f32 %v11077_v52, %v5356_v26  ;;  %v11724_v51 = vld [vmem:[#allocation4_spill] sm:$0xff] }
 0x5b7   : > { %9072 = vmatprep.mubr.msk.bf16.mxu0 %vm9702_vm2, %v11710_v50 }
 0x5b9   : > { %v5298_v56 = vpop.f32.mrb[144].mxu0 }
 0x5ba   : > { %v5357_v8 = vadd.f32 %v5298_v56, %v11353_v48  ;;  %v8814_v2 = vpop.f32.mrb[145].mxu0 }
 0x5bb   : > { %v5301_v32 = vpop.f32.mrb[146].mxu0 }
 0x5bc   : > { %v5358_v16 = vadd.f32 %v5301_v32, %v11357_v9  ;;  %v8815_v34 = vpop.f32.mrb[147].mxu0  ;;  %v11466_v17 = vadd.f32 %v11088_v7, %v5357_v8  ;;  %v11726_v9 = vld [vmem:[#allocation6_spill] sm:$0xff] }
 0x5bd   : > { %v11730_v32 = vld [vmem:[#allocation10_spill] sm:$0xff] }
 0x5be   : > { %9073 = vmatmul.mubr.bf16.gmra.mrb[252].mxu0 %v10807_v30  ;;  %v11470_v22 = vadd.f32 %v11724_v51, %v5358_v16 }
 0x5c1   : > { %v5306_v52 = vpop.f32.mrb[148].mxu0 }
 0x5c2   : > { %v5359_v31 = vadd.f32 %v5306_v52, %v11371_v24  ;;  %v8818_v50 = vpop.f32.mrb[149].mxu0  ;;  %v11727_v24 = vld [vmem:[#allocation7_spill] sm:$0xff] }
 0x5c3   : > { %v5309_v49 = vpop.f32.mrb[150].mxu0 }
 0x5c4   : > { %v5360_v48 = vadd.f32 %v5309_v49, %v11375_v58  ;;  %v8819_v4 = vpop.f32.mrb[151].mxu0  ;;  %v11475_v57 = vadd.f32 %v11725_v36, %v5359_v31 }
 0x5c6   : > { %v11478_v10 = vadd.f32 %v11726_v9, %v5360_v48  ;;  %v11732_v48 = vld [vmem:[#allocation12_spill] sm:$0xff] }
 0x5c9   : > { %v5314_v7 = vpop.f32.mrb[152].mxu0 }
 0x5ca   : > { %v5361_v30 = vadd.f32 %v5314_v7, %v11388_v21  ;;  %v8822_v41 = vpop.f32.mrb[153].mxu0  ;;  %v11729_v21 = vld [vmem:[#allocation9_spill] sm:$0xff] }
 0x5cb   : > { %v5317_v1 = vpop.f32.mrb[154].mxu0 }
 0x5cc   : > { %v5362_v0 = vadd.f32 %v5317_v1, %v11392_v3  ;;  %v8823_v47 = vpop.f32.mrb[155].mxu0  ;;  %v11483_v13 = vadd.f32 %v11727_v24, %v5361_v30 }
 0x5ce   : > { %v11486_v58 = vadd.f32 %v11728_v55, %v5362_v0  ;;  %v11734_v0 = vld [vmem:[#allocation14_spill] sm:$0xff] }
 0x5d1   : > { %v5322_v54 = vpop.f32.mrb[156].mxu0 }
 0x5d2   : > { %v5363_v38 = vadd.f32 %v5322_v54, %v11402_v45  ;;  %v8826_v26 = vpop.f32.mrb[157].mxu0  ;;  %v11731_v45 = vld [vmem:[#allocation11_spill] sm:$0xff] }
 0x5d3   : > { %v5325_v25 = vpop.f32.mrb[158].mxu0 }
 0x5d4   : > { %v5364_v56 = vadd.f32 %v5325_v25, %v11405_v18  ;;  %v8827_v8 = vpop.f32.mrb[159].mxu0  ;;  %v11491_v2 = vadd.f32 %v11729_v21, %v5363_v38  ;;  %v11735_v25 = vld [vmem:[#allocation15_spill] sm:$0xff] }
 0x5d6   : > { %v11494_v3 = vadd.f32 %v11730_v32, %v5364_v56 }
 0x5d9   : > { %v5330_v16 = vpop.f32.mrb[160].mxu0 }
 0x5da   : > { %v5365_v34 = vadd.f32 %v5330_v16, %v11415_v37  ;;  %v8830_v51 = vpop.f32.mrb[161].mxu0  ;;  %v11733_v37 = vld [vmem:[#allocation13_spill] sm:$0xff] }
 0x5db   : > { %v5333_v52 = vpop.f32.mrb[162].mxu0 }
 0x5dc   : > { %v5366_v31 = vadd.f32 %v5333_v52, %v11418_v33  ;;  %v8831_v50 = vpop.f32.mrb[163].mxu0  ;;  %v11499_v49 = vadd.f32 %v11731_v45, %v5365_v34  ;;  %v11737_v52 = vld [vmem:[#allocation17_spill] sm:$0xff] }
 0x5de   : > { %v11502_v18 = vadd.f32 %v11732_v48, %v5366_v31 }
 0x5e1   : > { %v5338_v4 = vpop.f32.mrb[164].mxu0 }
 0x5e2   : > { %v5367_v36 = vadd.f32 %v5338_v4, %v11424_v35  ;;  %v8834_v9 = vpop.f32.mrb[165].mxu0 }
 0x5e3   : > { %v5341_v7 = vpop.f32.mrb[166].mxu0 }
 0x5e4   : > { %v5368_v30 = vadd.f32 %v5341_v7, %v11427_v12  ;;  %v8835_v41 = vpop.f32.mrb[167].mxu0  ;;  %v11507_v1 = vadd.f32 %v11733_v37, %v5367_v36  ;;  %v11738_v36 = vld [vmem:[#allocation18_spill] sm:$0xff] }
 0x5e6   : > { %v11510_v33 = vadd.f32 %v11734_v0, %v5368_v30 }
 0x5e9   : > { %v5346_v47 = vpop.f32.mrb[168].mxu0 }
 0x5ea   : > { %v5369_v24 = vadd.f32 %v5346_v47, %v11433_v61  ;;  %v8838_v55 = vpop.f32.mrb[169].mxu0  ;;  %v11736_v61 = vld [vmem:[#allocation16_spill] sm:$0xff]  ;;  %v11739_v47 = vld [vmem:[#allocation19_spill] sm:$0xff] }
 0x5eb   : > { %v5349_v54 = vpop.f32.mrb[170].mxu0 }
 0x5ec   : > { %v5370_v38 = vadd.f32 %v5349_v54, %v11436_v29  ;;  %v8839_v26 = vpop.f32.mrb[171].mxu0  ;;  %v11515_v35 = vadd.f32 %v11161_v60, %v5369_v24 }
 0x5ee   : > { %v11518_v12 = vadd.f32 %v11735_v25, %v5370_v38  ;;  %v11740_v25 = vld [vmem:[#allocation20_spill] sm:$0xff] }
 0x5f1   : > { %v5842_v56 = vpop.f32.mrb[172].mxu0 }
 0x5f2   : > { %v5913_v8 = vadd.f32 %v5842_v56, %v11444_v42  ;;  %v8910_v21 = vpop.f32.mrb[173].mxu0 }
 0x5f3   : > { %v5845_v32 = vpop.f32.mrb[174].mxu0 }
 0x5f4   : > { %v5914_v16 = vadd.f32 %v5845_v32, %v11448_v62  ;;  %v8911_v34 = vpop.f32.mrb[175].mxu0  ;;  %v11523_v51 = vadd.f32 %v11736_v61, %v5913_v8  ;;  %v11742_v61 = vld [vmem:[#allocation22_spill] sm:$0xff] }
 0x5f5   : > { %v11741_v34 = vld [vmem:[#allocation21_spill] sm:$0xff] }
 0x5f6   : > { %v11526_v29 = vadd.f32 %v11737_v52, %v5914_v16 }
 0x5f9   : > { %v5850_v31 = vpop.f32.mrb[176].mxu0 }
 0x5fa   : > { %v5915_v60 = vadd.f32 %v5850_v31, %v11455_v44  ;;  %v8914_v50 = vpop.f32.mrb[177].mxu0 }
 0x5fb   : > { %v5853_v45 = vpop.f32.mrb[178].mxu0 }
 0x5fc   : > { %v5916_v48 = vadd.f32 %v5853_v45, %v11459_v53  ;;  %v8915_v4 = vpop.f32.mrb[179].mxu0  ;;  %v11531_v42 = vadd.f32 %v11198_v20, %v5915_v60 }
 0x5fd   : > { %v11744_v4 = vld [vmem:[#allocation24_spill] sm:$0xff] }
 0x5fe   : > { %v11534_v62 = vadd.f32 %v11738_v36, %v5916_v48 }
 0x601   : > { %v5858_v9 = vpop.f32.mrb[180].mxu0 }
 0x602   : > { %v5917_v7 = vadd.f32 %v5858_v9, %v11466_v17  ;;  %v8918_v30 = vpop.f32.mrb[181].mxu0 }
 0x603   : > { %v5861_v41 = vpop.f32.mrb[182].mxu0 }
 0x604   : > { %v5918_v37 = vadd.f32 %v5861_v41, %v11470_v22  ;;  %v8919_v0 = vpop.f32.mrb[183].mxu0  ;;  %v11539_v44 = vadd.f32 %v11219_v6, %v5917_v7 }
 0x606   : > { %v11542_v53 = vadd.f32 %v11739_v47, %v5918_v37  ;;  %v11746_v47 = vld [vmem:[#allocation26_spill] sm:$0xff] }
 0x609   : > { %v5866_v24 = vpop.f32.mrb[184].mxu0 }
 0x60a   : > { %v5919_v20 = vadd.f32 %v5866_v24, %v11475_v57  ;;  %v8922_v55 = vpop.f32.mrb[185].mxu0 }
 0x60b   : > { %v5869_v54 = vpop.f32.mrb[186].mxu0 }
 0x60c   : > { %v5920_v38 = vadd.f32 %v5869_v54, %v11478_v10  ;;  %v8923_v26 = vpop.f32.mrb[187].mxu0  ;;  %v6179_v17 = vadd.f32 %v11240_v63, %v5919_v20 }
 0x60e   : > { %v11548_v56 = vadd.f32 %v11740_v25, %v5920_v38 }
 0x611   : > { %v5874_v22 = vpop.f32.mrb[188].mxu0 }
 0x612   : > { %v5921_v6 = vadd.f32 %v5874_v22, %v11483_v13  ;;  %v8926_v8 = vpop.f32.mrb[189].mxu0  ;;  %v11743_v13 = vld [vmem:[#allocation23_spill] sm:$0xff]  ;;  %v11748_v22 = vld [vmem:[#allocation28_spill] sm:$0xff] }
 0x613   : > { %v5877_v21 = vpop.f32.mrb[190].mxu0 }
 0x614   : > { %v5922_v32 = vadd.f32 %v5877_v21, %v11486_v58  ;;  %v8927_v16 = vpop.f32.mrb[191].mxu0  ;;  %v11553_v57 = vadd.f32 %v11741_v34, %v5921_v6 }
 0x616   : > { %v11556_v52 = vadd.f32 %v11742_v61, %v5922_v32 }
 0x619   : > { %v5882_v10 = vpop.f32.mrb[192].mxu0 }
 0x61a   : > { %v5923_v63 = vadd.f32 %v5882_v10, %v11491_v2  ;;  %v8930_v31 = vpop.f32.mrb[193].mxu0  ;;  %v11745_v2 = vld [vmem:[#allocation25_spill] sm:$0xff] }
 0x61b   : > { %v5885_v60 = vpop.f32.mrb[194].mxu0 }
 0x61c   : > { %v5924_v50 = vadd.f32 %v5885_v60, %v11494_v3  ;;  %v8931_v45 = vpop.f32.mrb[195].mxu0  ;;  %v11561_v48 = vadd.f32 %v11743_v13, %v5923_v63 }
 0x61e   : > { %v11564_v58 = vadd.f32 %v11744_v4, %v5924_v50 }
 0x621   : > { %v5890_v36 = vpop.f32.mrb[196].mxu0 }
 0x622   : > { %v5925_v9 = vadd.f32 %v5890_v36, %v11499_v49  ;;  %v8934_v7 = vpop.f32.mrb[197].mxu0  ;;  %v11747_v49 = vld [vmem:[#allocation27_spill] sm:$0xff] }
 0x623   : > { %v5893_v30 = vpop.f32.mrb[198].mxu0 }
 0x624   : > { %v5926_v41 = vadd.f32 %v5893_v30, %v11502_v18  ;;  %v8935_v37 = vpop.f32.mrb[199].mxu0  ;;  %v11569_v0 = vadd.f32 %v11745_v2, %v5925_v9 }
 0x626   : > { %v11572_v3 = vadd.f32 %v11746_v47, %v5926_v41 }
 0x629   : > { %v5898_v24 = vpop.f32.mrb[200].mxu0 }
 0x62a   : > { %v5927_v20 = vadd.f32 %v5898_v24, %v11507_v1  ;;  %v8938_v55 = vpop.f32.mrb[201].mxu0  ;;  %v11749_v1 = vld [vmem:[#allocation29_spill] sm:$0xff] }
 0x62b   : > { %v5901_v54 = vpop.f32.mrb[202].mxu0 }
 0x62c   : > { %v5928_v38 = vadd.f32 %v5901_v54, %v11510_v33  ;;  %v8939_v26 = vpop.f32.mrb[203].mxu0  ;;  %v11577_v25 = vadd.f32 %v11747_v49, %v5927_v20 }
 0x62e   : > { %v11580_v18 = vadd.f32 %v11748_v22, %v5928_v38 }
 0x631   : > { %v5906_v6 = vpop.f32.mrb[204].mxu0 }
 0x632   : > { %v5929_v8 = vadd.f32 %v5906_v6, %v11515_v35  ;;  %v8942_v21 = vpop.f32.mrb[205].mxu0 }
 0x633   : > { %v5909_v32 = vpop.f32.mrb[206].mxu0 }
 0x634   : > { %v5930_v16 = vadd.f32 %v5909_v32, %v11518_v12  ;;  %v8943_v34 = vpop.f32.mrb[207].mxu0  ;;  %v11585_v61 = vadd.f32 %v11749_v1, %v5929_v8 }
 0x636   : > { %v11588_v33 = vadd.f32 %v11316_v15, %v5930_v16 }
 0x639   : > { %v6442_v10 = vpop.f32.mrb[208].mxu0 }
 0x63a   : > { %v11591_v63 = vadd.f32 %v6442_v10, %v11523_v51  ;;  %v9014_v31 = vpop.f32.mrb[209].mxu0 }
 0x63b   : > { %v6445_v60 = vpop.f32.mrb[210].mxu0 }
 0x63c   : > { %v11594_v50 = vadd.f32 %v6445_v60, %v11526_v29  ;;  %v9015_v35 = vpop.f32.mrb[211].mxu0 }
 0x641   : > { %v6450_v45 = vpop.f32.mrb[212].mxu0 }
 0x642   : > { %v11597_v12 = vadd.f32 %v6450_v45, %v11531_v42  ;;  %v9018_v13 = vpop.f32.mrb[213].mxu0 }
 0x643   : > { %v6453_v4 = vpop.f32.mrb[214].mxu0 }
 0x644   : > { %v11600_v15 = vadd.f32 %v6453_v4, %v11534_v62  ;;  %v9019_v36 = vpop.f32.mrb[215].mxu0  ;;  %v11612_v62 = vld [vmem:[%s11693_s6] ss:$0 sm:$0xff] }
 0x649   : > { %v6458_v9 = vpop.f32.mrb[216].mxu0 }
 0x64a   : > { %v11603_v51 = vadd.f32 %v6458_v9, %v11539_v44  ;;  %v9022_v7 = vpop.f32.mrb[217].mxu0 }
 0x64b   : > { %v6461_v30 = vpop.f32.mrb[218].mxu0 }
 0x64c   : > { %v11606_v29 = vadd.f32 %v6461_v30, %v11542_v53  ;;  %v9023_v41 = vpop.f32.mrb[219].mxu0 }
 0x651   : > { %v6466_v37 = vpop.f32.mrb[220].mxu0 }
 0x652   : > { %v6519_v2 = vadd.f32 %v6466_v37, %v6179_v17  ;;  %v9026_v42 = vpop.f32.mrb[221].mxu0 }
 0x653   : > { %v6469_v47 = vpop.f32.mrb[222].mxu0 }
 0x654   : > { %v6739_v24 = vadd.f32 %v11326_v28, %v6519_v2  ;;  %v6520_v44 = vadd.f32 %v6469_v47, %v11548_v56  ;;  %v9027_v20 = vpop.f32.mrb[223].mxu0 }
 0x656   : > { %v6764_v55 = vadd.f32 %v11612_v62, %v6739_v24  ;;  %v6740_v53 = vadd.f32 %v11331_v19, %v6520_v44 }
 0x658   : > { %v6782_v17 = vmax.f32 %v6764_v55, 0.0  ;;  %v6765_v54 = vadd.f32 %v11612_v62, %v6740_v53 }
 0x659   : > { %v6474_v38 = vpop.f32.mrb[224].mxu0 }
 0x65a   : > { %6800 = vst [vmem:[%s11621_s18 + $0x30] sm:$0xff] %v6782_v17  ;;  %v6783_v28 = vmax.f32 %v6765_v54, 0.0  ;;  %v6521_v56 = vadd.f32 %v6474_v38, %v11553_v57  ;;  %v9030_v26 = vpop.f32.mrb[225].mxu0 }
 0x65b   : > { %v6477_v49 = vpop.f32.mrb[226].mxu0 }
 0x65c   : > { %6801 = vst [vmem:[%s11621_s18 + $0x38] sm:$0xff] %v6783_v28  ;;  %v6741_v19 = vadd.f32 %v11344_v23, %v6521_v56  ;;  %v6522_v22 = vadd.f32 %v6477_v49, %v11556_v52  ;;  %v9031_v6 = vpop.f32.mrb[227].mxu0 }
 0x65e   : > { %v6766_v8 = vadd.f32 %v11612_v62, %v6741_v19  ;;  %v6742_v21 = vadd.f32 %v11349_v43, %v6522_v22 }
 0x660   : > { %v6784_v32 = vmax.f32 %v6766_v8, 0.0  ;;  %v6767_v16 = vadd.f32 %v11612_v62, %v6742_v21 }
 0x661   : > { %v6482_v34 = vpop.f32.mrb[228].mxu0 }
 0x662   : > { %6802 = vst [vmem:[%s11621_s18 + $0x40] sm:$0xff] %v6784_v32  ;;  %v6785_v57 = vmax.f32 %v6767_v16, 0.0  ;;  %v6523_v1 = vadd.f32 %v6482_v34, %v11561_v48  ;;  %v9034_v10 = vpop.f32.mrb[229].mxu0 }
 0x663   : > { %v6485_v31 = vpop.f32.mrb[230].mxu0 }
 0x664   : > { %6803 = vst [vmem:[%s11621_s18 + $0x48] sm:$0xff] %v6785_v57  ;;  %v6743_v23 = vadd.f32 %v11362_v27, %v6523_v1  ;;  %v6524_v52 = vadd.f32 %v6485_v31, %v11564_v58  ;;  %v9035_v60 = vpop.f32.mrb[231].mxu0 }
 0x666   : > { %v6768_v43 = vadd.f32 %v11612_v62, %v6743_v23  ;;  %v6744_v35 = vadd.f32 %v11367_v46, %v6524_v52 }
 0x668   : > { %v6786_v45 = vmax.f32 %v6768_v43, 0.0  ;;  %v6769_v13 = vadd.f32 %v11612_v62, %v6744_v35 }
 0x669   : > { %v6490_v4 = vpop.f32.mrb[232].mxu0 }
 0x66a   : > { %6804 = vst [vmem:[%s11621_s18 + $0x50] sm:$0xff] %v6786_v45  ;;  %v6787_v48 = vmax.f32 %v6769_v13, 0.0  ;;  %v6525_v36 = vadd.f32 %v6490_v4, %v11569_v0  ;;  %v9038_v9 = vpop.f32.mrb[233].mxu0 }
 0x66b   : > { %v6493_v7 = vpop.f32.mrb[234].mxu0 }
 0x66c   : > { %6805 = vst [vmem:[%s11621_s18 + $0x58] sm:$0xff] %v6787_v48  ;;  %v6745_v27 = vadd.f32 %v11379_v5, %v6525_v36  ;;  %v6526_v58 = vadd.f32 %v6493_v7, %v11572_v3  ;;  %v9039_v30 = vpop.f32.mrb[235].mxu0 }
 0x66e   : > { %v6770_v46 = vadd.f32 %v11612_v62, %v6745_v27  ;;  %v6746_v41 = vadd.f32 %v11384_v39, %v6526_v58 }
 0x670   : > { %v6788_v37 = vmax.f32 %v6770_v46, 0.0  ;;  %v6771_v2 = vadd.f32 %v11612_v62, %v6746_v41 }
 0x671   : > { %v6498_v42 = vpop.f32.mrb[236].mxu0 }
 0x672   : > { %6806 = vst [vmem:[%s11621_s18 + $0x60] sm:$0xff] %v6788_v37  ;;  %v6789_v0 = vmax.f32 %v6771_v2, 0.0  ;;  %v6527_v47 = vadd.f32 %v6498_v42, %v11577_v25  ;;  %v9042_v24 = vpop.f32.mrb[237].mxu0 }
 0x673   : > { %v6501_v44 = vpop.f32.mrb[238].mxu0 }
 0x674   : > { %6807 = vst [vmem:[%s11621_s18 + $0x68] sm:$0xff] %v6789_v0  ;;  %v6747_v5 = vadd.f32 %v11395_v40, %v6527_v47  ;;  %v6528_v3 = vadd.f32 %v6501_v44, %v11580_v18  ;;  %v9043_v20 = vpop.f32.mrb[239].mxu0 }
 0x676   : > { %v6772_v39 = vadd.f32 %v11612_v62, %v6747_v5  ;;  %v6748_v55 = vadd.f32 %v11399_v14, %v6528_v3 }
 0x678   : > { %v6790_v53 = vmax.f32 %v6772_v39, 0.0  ;;  %v6773_v17 = vadd.f32 %v11612_v62, %v6748_v55 }
 0x679   : > { %v6506_v54 = vpop.f32.mrb[240].mxu0 }
 0x67a   : > { %6808 = vst [vmem:[%s11621_s18 + $0x70] sm:$0xff] %v6790_v53  ;;  %v6791_v25 = vmax.f32 %v6773_v17, 0.0  ;;  %v6529_v38 = vadd.f32 %v6506_v54, %v11585_v61  ;;  %v9046_v28 = vpop.f32.mrb[241].mxu0 }
 0x67b   : > { %v6509_v56 = vpop.f32.mrb[242].mxu0 }
 0x67c   : > { %6809 = vst [vmem:[%s11621_s18 + $0x78] sm:$0xff] %v6791_v25  ;;  %v6749_v40 = vadd.f32 %v11408_v11, %v6529_v38  ;;  %v6530_v18 = vadd.f32 %v6509_v56, %v11588_v33  ;;  %v9047_v26 = vpop.f32.mrb[243].mxu0 }
 0x67e   : > { %v6774_v14 = vadd.f32 %v11612_v62, %v6749_v40  ;;  %v6750_v49 = vadd.f32 %v11412_v59, %v6530_v18 }
 0x680   : > { %v6792_v19 = vmax.f32 %v6774_v14, 0.0  ;;  %v6775_v22 = vadd.f32 %v11612_v62, %v6750_v49 }
 0x681   : > { %v6662_v6 = vpop.f32.mrb[244].mxu0 }
 0x682   : > { %6810 = vst [vmem:[%s11621_s18 + $0x80] sm:$0xff] %v6792_v19  ;;  %v6793_v61 = vmax.f32 %v6775_v22, 0.0  ;;  %v6733_v8 = vadd.f32 %v6662_v6, %v11591_v63  ;;  %v9066_v21 = vpop.f32.mrb[245].mxu0 }
 0x683   : > { %v6665_v32 = vpop.f32.mrb[246].mxu0 }
 0x684   : > { %6811 = vst [vmem:[%s11621_s18 + $0x88] sm:$0xff] %v6793_v61  ;;  %v6758_v11 = vadd.f32 %v11612_v62, %v6733_v8  ;;  %v6734_v33 = vadd.f32 %v6665_v32, %v11594_v50  ;;  %v9067_v16 = vpop.f32.mrb[247].mxu0 }
 0x686   : > { %v6776_v34 = vmax.f32 %v6758_v11, 0.0  ;;  %v6759_v59 = vadd.f32 %v11612_v62, %v6734_v33 }
 0x688   : > { %6794 = vst [vmem:[%s11621_s18] sm:$0xff] %v6776_v34  ;;  %v6777_v57 = vmax.f32 %v6759_v59, 0.0 }
 0x689   : > { %v6670_v1 = vpop.f32.mrb[248].mxu0 }
 0x68a   : > { %6795 = vst [vmem:[%s11621_s18 + $0x8] sm:$0xff] %v6777_v57  ;;  %v6735_v10 = vadd.f32 %v6670_v1, %v11597_v12  ;;  %v9070_v63 = vpop.f32.mrb[249].mxu0 }
 0x68b   : > { %v6673_v31 = vpop.f32.mrb[250].mxu0 }
 0x68c   : > { %v6760_v23 = vadd.f32 %v11612_v62, %v6735_v10  ;;  %v6736_v52 = vadd.f32 %v6673_v31, %v11600_v15  ;;  %v9071_v50 = vpop.f32.mrb[251].mxu0 }
 0x68e   : > { %v6778_v60 = vmax.f32 %v6760_v23, 0.0  ;;  %v6761_v43 = vadd.f32 %v11612_v62, %v6736_v52 }
 0x690   : > { %6796 = vst [vmem:[%s11621_s18 + $0x10] sm:$0xff] %v6778_v60  ;;  %v6779_v35 = vmax.f32 %v6761_v43, 0.0 }
 0x691   : > { %v6678_v45 = vpop.f32.mrb[252].mxu0 }
 0x692   : > { %6797 = vst [vmem:[%s11621_s18 + $0x18] sm:$0xff] %v6779_v35  ;;  %v6737_v13 = vadd.f32 %v6678_v45, %v11603_v51  ;;  %v9074_v4 = vpop.f32.mrb[253].mxu0 }
 0x693   : > { %v6681_v12 = vpop.f32.mrb[254].mxu0 }
 0x694   : > { %v6762_v48 = vadd.f32 %v11612_v62, %v6737_v13  ;;  %v6738_v36 = vadd.f32 %v6681_v12, %v11606_v29  ;;  %v9075_v9 = vpop.f32.mrb[255].mxu0 }
 0x696   : > { %v6780_v15 = vmax.f32 %v6762_v48, 0.0  ;;  %v6763_v7 = vadd.f32 %v11612_v62, %v6738_v36 }
 0x698   : > { %6798 = vst [vmem:[%s11621_s18 + $0x20] sm:$0xff] %v6780_v15  ;;  %v6781_v27 = vmax.f32 %v6763_v7, 0.0 }
 0x69a   : > { %6799 = vst [vmem:[%s11621_s18 + $0x28] sm:$0xff] %v6781_v27 }
 0x69b PF: > { %s17_s24 = sadd.s32 1, %s9698_s24  }
 0x69c   : > { %p14_p4 = scmp.ge.s32.totalorder %s17_s24, 4  }
 0x69e   :  { %16 = sbr.rel (!%p14_p4) target bundleno = 1 (0x1), region = 96 }

</bundles_post_ra>
